<compile_context>
chip_gen: v7x
topology: tpu7x:2x2x1
jax: 0.10.0
libtpu: 0.0.40
codegen_flags: <defaults>
</compile_context>

<pallas_src>
import functools

import jax
import jax.numpy as jnp
from jax.experimental import pallas as pl
from jax.experimental.pallas import tpu as pltpu


# ---------------------------------------------------------------------------
# Fused per-layer kernel: input projection (prologue) + bidirectional LSTM
# recurrence (single block-diagonal recurrent matmul per step) + dense output
# store (epilogue).
#   x2d:    (T*B, D_in)   time-major layer input, row index = t*B + b
#   w_ih:   (D_in, 8*hs)  [W_ih_fwd^T | W_ih_bwd^T], gate order (i, f, g, o)
#   whh_bd: (2*hs, 8*hs)  blockdiag(W_hh_fwd^T, W_hh_bwd^T)
#   b:      (1, 8*hs)     [b_fwd | b_bwd], each = b_ih + b_hh
#   y:      (T, B, 2*hs)  [..., :hs] forward hidden, [..., hs:] backward hidden
# ---------------------------------------------------------------------------
def _bilstm_layer_kernel(x2d_ref, wih_ref, whhbd_ref, b_ref, y_ref,
                         xg_sc, yf_sc, yb_sc, *, T, B, hs):
    H4 = 4 * hs

    # ---- Prologue: one big input-projection matmul for all timesteps & dirs ----
    xg_sc[...] = (
        jnp.dot(x2d_ref[...], wih_ref[...], preferred_element_type=jnp.float32)
        + b_ref[...]
    )

    whh_bd = whhbd_ref[...]            # (2*hs, 8*hs) block-diagonal recurrent weight

    # Lane mask for the tanh ('g') gate block inside a (B, 4*hs) gate tile
    # (hoisted out of the loop -- JAX does not CSE broadcasts).
    lane = jax.lax.broadcasted_iota(jnp.int32, (B, H4), 1)
    g_mask = (lane >= 2 * hs) & (lane < 3 * hs)

    def half_cell(gates, c_prev):
        # Full-tile nonlinearities + one select, then slice (i, f, g, o).
        sig = jax.nn.sigmoid(gates)
        tnh = jnp.tanh(gates)
        act = jnp.where(g_mask, tnh, sig)
        i = act[:, 0:hs]
        f = act[:, hs:2 * hs]
        g = act[:, 2 * hs:3 * hs]
        o = act[:, 3 * hs:4 * hs]
        c = f * c_prev + i * g
        h = o * jnp.tanh(c)
        return h, c

    def step(t, carry):
        h_f, h_b, c_f, c_b = carry
        tb = T - 1 - t
        # Single block-diagonal recurrent matmul covering both directions.
        h_cat = jnp.concatenate([h_f, h_b], axis=-1)                    # (B, 2*hs)
        g_all = jnp.dot(h_cat, whh_bd,
                        preferred_element_type=jnp.float32)             # (B, 8*hs)
        xg_f = xg_sc[pl.ds(t * B, B), :]                                # (B, 8*hs)
        xg_b = xg_sc[pl.ds(tb * B, B), :]
        g_f = g_all[:, 0:H4] + xg_f[:, 0:H4]
        g_b = g_all[:, H4:2 * H4] + xg_b[:, H4:2 * H4]
        h_f, c_f = half_cell(g_f, c_f)
        h_b, c_b = half_cell(g_b, c_b)
        yf_sc[t] = h_f
        yb_sc[tb] = h_b
        return h_f, h_b, c_f, c_b

    z = jnp.zeros((B, hs), jnp.float32)
    jax.lax.fori_loop(0, T, step, (z, z, z, z), unroll=True)

    # ---- Epilogue: one dense store of the combined output (no half-lane stores) ----
    y_ref[...] = jnp.concatenate([yf_sc[...], yb_sc[...]], axis=-1).astype(y_ref.dtype)


def bilstm_layer_pallas(h_tbd, w_ih, whh_bd, b, hs):
    """One bidirectional LSTM layer.

    h_tbd:  (T, B, D_in) time-major input
    w_ih:   (D_in, 8*hs) fused input weights   (built once at init)
    whh_bd: (2*hs, 8*hs) block-diagonal recurrent weights (built once at init)
    b:      (1, 8*hs)    fused biases
    returns (T, B, 2*hs)
    """
    T, B, D = h_tbd.shape
    x2d = h_tbd.reshape(T * B, D)        # contiguous -> free metadata reshape
    kernel = functools.partial(_bilstm_layer_kernel, T=T, B=B, hs=hs)
    return pl.pallas_call(
        kernel,
        out_shape=jax.ShapeDtypeStruct((T, B, 2 * hs), jnp.float32),
        scratch_shapes=[
            pltpu.VMEM((T * B, 8 * hs), jnp.float32),   # xg: projected gates
            pltpu.VMEM((T, B, hs), jnp.float32),        # forward hidden history
            pltpu.VMEM((T, B, hs), jnp.float32),        # backward hidden history
        ],
    )(x2d, w_ih, whh_bd, b)


# ---------------------------------------------------------------------------
# Weight preparation (done ONCE at init, outside the jitted forward).
# ---------------------------------------------------------------------------
def prepare_params(raw_params, hs):
    prepared = []
    for (wih_f, whh_f, b_f, wih_b, whh_b, b_b) in raw_params:
        w_ih = jnp.concatenate([wih_f, wih_b], axis=1)          # (D_in, 8*hs)
        b = jnp.concatenate([b_f, b_b], axis=1)                 # (1, 8*hs)
        whh_bd = jnp.zeros((2 * hs, 8 * hs), jnp.float32)       # blockdiag(whh_f, whh_b)
        whh_bd = whh_bd.at[:hs, :4 * hs].set(whh_f)
        whh_bd = whh_bd.at[hs:, 4 * hs:].set(whh_b)
        prepared.append((w_ih, whh_bd, b))
    return prepared


# ---------------------------------------------------------------------------
# Encoder forward (bidirectional, n_layers), matching the PyTorch module.
# ---------------------------------------------------------------------------
def encoder_forward(x_bct, prepared_params, hs):
    """x_bct: (B, C, T) -> (B, 2*hs, T)   (matches PyTorch Encoder.forward)."""
    h = jnp.transpose(x_bct, (2, 0, 1))      # (T, B, C), like x.permute(2, 0, 1)
    for (w_ih, whh_bd, b) in prepared_params:
        h = bilstm_layer_pallas(h, w_ih, whh_bd, b, hs)
    return jnp.transpose(h, (1, 2, 0))       # (B, 2*hs, T), like y.permute(1, 2, 0)


# ---------------------------------------------------------------------------
# Pure-JAX reference (lax.scan) for correctness check.
# ---------------------------------------------------------------------------
def lstm_direction_ref(x_tbd, w_ih_t, w_hh_t, b, hs):
    T, B, _ = x_tbd.shape

    def step(carry, x_t):
        hprev, cprev = carry
        gates = x_t @ w_ih_t + hprev @ w_hh_t + b
        i = jax.nn.sigmoid(gates[:, 0 * hs:1 * hs])
        f = jax.nn.sigmoid(gates[:, 1 * hs:2 * hs])
        g = jnp.tanh(gates[:, 2 * hs:3 * hs])
        o = jax.nn.sigmoid(gates[:, 3 * hs:4 * hs])
        c = f * cprev + i * g
        hh = o * jnp.tanh(c)
        return (hh, c), hh

    init = (jnp.zeros((B, hs), jnp.float32), jnp.zeros((B, hs), jnp.float32))
    _, ys = jax.lax.scan(step, init, x_tbd)
    return ys


def encoder_forward_ref(x_bct, raw_params, hs):
    h = jnp.transpose(x_bct, (2, 0, 1))
    for (wih_f, whh_f, b_f, wih_b, whh_b, b_b) in raw_params:
        y_f = lstm_direction_ref(h, wih_f, whh_f, b_f, hs)
        y_b = lstm_direction_ref(h[::-1], wih_b, whh_b, b_b, hs)[::-1]
        h = jnp.concatenate([y_f, y_b], axis=-1)
    return jnp.transpose(h, (1, 2, 0))


# ---------------------------------------------------------------------------
# Deterministic parameter init (same shapes as nn.LSTM, uniform(-1/sqrt(hs), ..)).
# ---------------------------------------------------------------------------
def init_params(key, input_sz, hs, n_layers):
    k = 1.0 / jnp.sqrt(jnp.float32(hs))
    params = []
    for layer in range(n_layers):
        d_in = input_sz if layer == 0 else 2 * hs
        layer_p = []
        for _direction in range(2):
            key, k1, k2, k3, k4 = jax.random.split(key, 5)
            w_ih_t = jax.random.uniform(k1, (d_in, 4 * hs), jnp.float32, -k, k)
            w_hh_t = jax.random.uniform(k2, (hs, 4 * hs), jnp.float32, -k, k)
            b_ih = jax.random.uniform(k3, (4 * hs,), jnp.float32, -k, k)
            b_hh = jax.random.uniform(k4, (4 * hs,), jnp.float32, -k, k)
            b = (b_ih + b_hh).reshape(1, 4 * hs)
            layer_p.extend([w_ih_t, w_hh_t, b])
        params.append(tuple(layer_p))
    return params


if __name__ == "__main__":
    B, INPUT_SZ, T = 2, 32, 8
    HS, N_LAYERS = 32, 2   # bidirectional, rnn_dropout=0.0, rnn_type='lstm'

    key = jax.random.PRNGKey(0)
    key, kx = jax.random.split(key)
    x = jax.random.normal(kx, (B, INPUT_SZ, T), jnp.float32)  # (B, C, T) as in PyTorch

    raw_params = init_params(key, INPUT_SZ, HS, N_LAYERS)
    params = prepare_params(raw_params, HS)   # fuse weights once, outside jit

    fwd = jax.jit(functools.partial(encoder_forward, hs=HS))
    y = jax.block_until_ready(fwd(x, params))

    assert y.shape == (B, 2 * HS, T), y.shape

    y_ref = jax.block_until_ready(encoder_forward_ref(x, raw_params, HS))
    assert jnp.allclose(y, y_ref, rtol=1e-4, atol=1e-4), (
        "mismatch vs reference: max abs diff "
        + str(float(jnp.max(jnp.abs(y - y_ref))))
    )

    print("KERNEL_OK")
</pallas_src>

<mosaic_0001>
module attributes {stable_mosaic.version = 11 : i64} {
  func.func @_bilstm_layer_kernel(%arg0: memref<16x64xf32, #tpu.memory_space<vmem>>, %arg1: memref<64x256xf32, #tpu.memory_space<vmem>>, %arg2: memref<64x256xf32, #tpu.memory_space<vmem>>, %arg3: memref<1x256xf32, #tpu.memory_space<vmem>>, %arg4: memref<8x2x64xf32, #tpu.memory_space<vmem>>, %arg5: memref<16x256xf32, #tpu.memory_space<vmem>>, %arg6: memref<8x2x32xf32, #tpu.memory_space<vmem>>, %arg7: memref<8x2x32xf32, #tpu.memory_space<vmem>>) attributes {dimension_semantics = [], scalar_prefetch = 0 : i64, scratch_operands = 3 : i64, tpu.core_type = #tpu.core_type<tc>} {
    %c0 = arith.constant 0 : index
    %c0_0 = arith.constant 0 : index
    %0 = vector.load %arg0[%c0, %c0_0] : memref<16x64xf32, #tpu.memory_space<vmem>>, vector<16x64xf32>
    %c0_1 = arith.constant 0 : index
    %c0_2 = arith.constant 0 : index
    %1 = vector.load %arg1[%c0_1, %c0_2] : memref<64x256xf32, #tpu.memory_space<vmem>>, vector<64x256xf32>
    %cst = arith.constant dense<0.000000e+00> : vector<16x256xf32>
    %2 = tpu.matmul %0, %1, %cst {dimension_numbers = #tpu.dot_dimension_numbers<[1], [0], [0], [1], [0, 0, 1, 1], [], []>} : vector<16x64xf32>, vector<64x256xf32>, vector<16x256xf32> -> vector<16x256xf32>
    %c0_3 = arith.constant 0 : index
    %c0_4 = arith.constant 0 : index
    %3 = vector.load %arg3[%c0_3, %c0_4] : memref<1x256xf32, #tpu.memory_space<vmem>>, vector<1x256xf32>
    %4 = vector.broadcast %3 : vector<1x256xf32> to vector<16x256xf32>
    %5 = arith.addf %2, %4 : vector<16x256xf32>
    %c0_5 = arith.constant 0 : index
    %c0_6 = arith.constant 0 : index
    %6 = vector.load %arg5[%c0_5, %c0_6] : memref<16x256xf32, #tpu.memory_space<vmem>>, vector<16x256xf32>
    tpu.vector_store %arg5[%c0_5, %c0_6], %5 {strides = array<i32>} : memref<16x256xf32, #tpu.memory_space<vmem>>, vector<16x256xf32>,
    %c0_7 = arith.constant 0 : index
    %c0_8 = arith.constant 0 : index
    %7 = vector.load %arg2[%c0_7, %c0_8] : memref<64x256xf32, #tpu.memory_space<vmem>>, vector<64x256xf32>
    %8 = tpu.iota {dimensions = array<i32: 1>} : vector<2x128xi32>
    %c64_i32 = arith.constant 64 : i32
    %9 = vector.broadcast %c64_i32 : i32 to vector<2x128xi32>
    %10 = arith.cmpi sge, %8, %9 : vector<2x128xi32>
    %c96_i32 = arith.constant 96 : i32
    %11 = vector.broadcast %c96_i32 : i32 to vector<2x128xi32>
    %12 = arith.cmpi slt, %8, %11 : vector<2x128xi32>
    %13 = arith.andi %10, %12 : vector<2x128xi1>
    %cst_9 = arith.constant 0.000000e+00 : f32
    %14 = vector.broadcast %cst_9 : f32 to vector<2x32xf32>
    %c0_i32 = arith.constant 0 : i32
    %c7_i32 = arith.constant 7 : i32
    %15 = arith.subi %c7_i32, %c0_i32 : i32
    %16 = tpu.concatenate %14, %14 in 1 : vector<2x32xf32>, vector<2x32xf32> -> vector<2x64xf32>
    %cst_10 = arith.constant dense<0.000000e+00> : vector<2x256xf32>
    %17 = tpu.matmul %16, %7, %cst_10 {dimension_numbers = #tpu.dot_dimension_numbers<[1], [0], [0], [1], [0, 0, 1, 1], [], []>} : vector<2x64xf32>, vector<64x256xf32>, vector<2x256xf32> -> vector<2x256xf32>
    %c2_i32 = arith.constant 2 : i32
    %18 = arith.muli %c0_i32, %c2_i32 : i32
    %19 = arith.index_cast %18 : i32 to index
    %c0_11 = arith.constant 0 : index
    %20 = vector.load %arg5[%19, %c0_11] : memref<16x256xf32, #tpu.memory_space<vmem>>, vector<2x256xf32>
    %c2_i32_12 = arith.constant 2 : i32
    %21 = arith.muli %15, %c2_i32_12 : i32
    %22 = arith.index_cast %21 : i32 to index
    %c0_13 = arith.constant 0 : index
    %23 = vector.load %arg5[%22, %c0_13] : memref<16x256xf32, #tpu.memory_space<vmem>>, vector<2x256xf32>
    %24 = vector.extract_strided_slice %17 {offsets = [0, 0], sizes = [2, 128], strides = [1, 1]} : vector<2x256xf32> to vector<2x128xf32>
    %25 = vector.extract_strided_slice %20 {offsets = [0, 0], sizes = [2, 128], strides = [1, 1]} : vector<2x256xf32> to vector<2x128xf32>
    %26 = arith.addf %24, %25 : vector<2x128xf32>
    %27 = vector.extract_strided_slice %17 {offsets = [0, 128], sizes = [2, 128], strides = [1, 1]} : vector<2x256xf32> to vector<2x128xf32>
    %28 = vector.extract_strided_slice %23 {offsets = [0, 128], sizes = [2, 128], strides = [1, 1]} : vector<2x256xf32> to vector<2x128xf32>
    %29 = arith.addf %27, %28 : vector<2x128xf32>
    %30 = arith.negf %26 : vector<2x128xf32>
    %31 = math.exp %30 : vector<2x128xf32>
    %cst_14 = arith.constant 1.000000e+00 : f32
    %32 = vector.broadcast %cst_14 : f32 to vector<2x128xf32>
    %33 = arith.addf %32, %31 : vector<2x128xf32>
    %34 = arith.divf %32, %33 : vector<2x128xf32>
    %35 = math.tanh %26 : vector<2x128xf32>
    %36 = arith.select %13, %35, %34 : vector<2x128xi1>, vector<2x128xf32>
    %37 = vector.extract_strided_slice %36 {offsets = [0, 0], sizes = [2, 32], strides = [1, 1]} : vector<2x128xf32> to vector<2x32xf32>
    %38 = vector.extract_strided_slice %36 {offsets = [0, 32], sizes = [2, 32], strides = [1, 1]} : vector<2x128xf32> to vector<2x32xf32>
    %39 = vector.extract_strided_slice %36 {offsets = [0, 64], sizes = [2, 32], strides = [1, 1]} : vector<2x128xf32> to vector<2x32xf32>
    %40 = vector.extract_strided_slice %36 {offsets = [0, 96], sizes = [2, 32], strides = [1, 1]} : vector<2x128xf32> to vector<2x32xf32>
    %41 = arith.mulf %38, %14 : vector<2x32xf32>
    %42 = arith.mulf %37, %39 : vector<2x32xf32>
    %43 = arith.addf %41, %42 : vector<2x32xf32>
    %44 = math.tanh %43 : vector<2x32xf32>
    %45 = arith.mulf %40, %44 : vector<2x32xf32>
    %46 = arith.negf %29 : vector<2x128xf32>
    %47 = math.exp %46 : vector<2x128xf32>
    %cst_15 = arith.constant 1.000000e+00 : f32
    %48 = vector.broadcast %cst_15 : f32 to vector<2x128xf32>
    %49 = arith.addf %48, %47 : vector<2x128xf32>
    %50 = arith.divf %48, %49 : vector<2x128xf32>
    %51 = math.tanh %29 : vector<2x128xf32>
    %52 = arith.select %13, %51, %50 : vector<2x128xi1>, vector<2x128xf32>
    %53 = vector.extract_strided_slice %52 {offsets = [0, 0], sizes = [2, 32], strides = [1, 1]} : vector<2x128xf32> to vector<2x32xf32>
    %54 = vector.extract_strided_slice %52 {offsets = [0, 32], sizes = [2, 32], strides = [1, 1]} : vector<2x128xf32> to vector<2x32xf32>
    %55 = vector.extract_strided_slice %52 {offsets = [0, 64], sizes = [2, 32], strides = [1, 1]} : vector<2x128xf32> to vector<2x32xf32>
    %56 = vector.extract_strided_slice %52 {offsets = [0, 96], sizes = [2, 32], strides = [1, 1]} : vector<2x128xf32> to vector<2x32xf32>
    %57 = arith.mulf %54, %14 : vector<2x32xf32>
    %58 = arith.mulf %53, %55 : vector<2x32xf32>
    %59 = arith.addf %57, %58 : vector<2x32xf32>
    %60 = math.tanh %59 : vector<2x32xf32>
    %61 = arith.mulf %56, %60 : vector<2x32xf32>
    %62 = arith.index_cast %c0_i32 : i32 to index
    %c0_16 = arith.constant 0 : index
    %c0_17 = arith.constant 0 : index
    %63 = vector.load %arg6[%62, %c0_16, %c0_17] : memref<8x2x32xf32, #tpu.memory_space<vmem>>, vector<1x2x32xf32>
    %64 = vector.shape_cast %63 : vector<1x2x32xf32> to vector<2x32xf32>
    %65 = vector.shape_cast %45 : vector<2x32xf32> to vector<1x2x32xf32>
    tpu.vector_store %arg6[%62, %c0_16, %c0_17], %65 {strides = array<i32>} : memref<8x2x32xf32, #tpu.memory_space<vmem>>, vector<1x2x32xf32>,
    %66 = arith.index_cast %15 : i32 to index
    %c0_18 = arith.constant 0 : index
    %c0_19 = arith.constant 0 : index
    %67 = vector.load %arg7[%66, %c0_18, %c0_19] : memref<8x2x32xf32, #tpu.memory_space<vmem>>, vector<1x2x32xf32>
    %68 = vector.shape_cast %67 : vector<1x2x32xf32> to vector<2x32xf32>
    %69 = vector.shape_cast %61 : vector<2x32xf32> to vector<1x2x32xf32>
    tpu.vector_store %arg7[%66, %c0_18, %c0_19], %69 {strides = array<i32>} : memref<8x2x32xf32, #tpu.memory_space<vmem>>, vector<1x2x32xf32>,
    %c1_i32 = arith.constant 1 : i32
    %c7_i32_20 = arith.constant 7 : i32
    %70 = arith.subi %c7_i32_20, %c1_i32 : i32
    %71 = tpu.concatenate %45, %61 in 1 : vector<2x32xf32>, vector<2x32xf32> -> vector<2x64xf32>
    %cst_21 = arith.constant dense<0.000000e+00> : vector<2x256xf32>
    %72 = tpu.matmul %71, %7, %cst_21 {dimension_numbers = #tpu.dot_dimension_numbers<[1], [0], [0], [1], [0, 0, 1, 1], [], []>} : vector<2x64xf32>, vector<64x256xf32>, vector<2x256xf32> -> vector<2x256xf32>
    %c2_i32_22 = arith.constant 2 : i32
    %73 = arith.muli %c1_i32, %c2_i32_22 : i32
    %74 = arith.index_cast %73 : i32 to index
    %c0_23 = arith.constant 0 : index
    %75 = vector.load %arg5[%74, %c0_23] : memref<16x256xf32, #tpu.memory_space<vmem>>, vector<2x256xf32>
    %c2_i32_24 = arith.constant 2 : i32
    %76 = arith.muli %70, %c2_i32_24 : i32
    %77 = arith.index_cast %76 : i32 to index
    %c0_25 = arith.constant 0 : index
    %78 = vector.load %arg5[%77, %c0_25] : memref<16x256xf32, #tpu.memory_space<vmem>>, vector<2x256xf32>
    %79 = vector.extract_strided_slice %72 {offsets = [0, 0], sizes = [2, 128], strides = [1, 1]} : vector<2x256xf32> to vector<2x128xf32>
    %80 = vector.extract_strided_slice %75 {offsets = [0, 0], sizes = [2, 128], strides = [1, 1]} : vector<2x256xf32> to vector<2x128xf32>
    %81 = arith.addf %79, %80 : vector<2x128xf32>
    %82 = vector.extract_strided_slice %72 {offsets = [0, 128], sizes = [2, 128], strides = [1, 1]} : vector<2x256xf32> to vector<2x128xf32>
    %83 = vector.extract_strided_slice %78 {offsets = [0, 128], sizes = [2, 128], strides = [1, 1]} : vector<2x256xf32> to vector<2x128xf32>
    %84 = arith.addf %82, %83 : vector<2x128xf32>
    %85 = arith.negf %81 : vector<2x128xf32>
    %86 = math.exp %85 : vector<2x128xf32>
    %cst_26 = arith.constant 1.000000e+00 : f32
    %87 = vector.broadcast %cst_26 : f32 to vector<2x128xf32>
    %88 = arith.addf %87, %86 : vector<2x128xf32>
    %89 = arith.divf %87, %88 : vector<2x128xf32>
    %90 = math.tanh %81 : vector<2x128xf32>
    %91 = arith.select %13, %90, %89 : vector<2x128xi1>, vector<2x128xf32>
    %92 = vector.extract_strided_slice %91 {offsets = [0, 0], sizes = [2, 32], strides = [1, 1]} : vector<2x128xf32> to vector<2x32xf32>
    %93 = vector.extract_strided_slice %91 {offsets = [0, 32], sizes = [2, 32], strides = [1, 1]} : vector<2x128xf32> to vector<2x32xf32>
    %94 = vector.extract_strided_slice %91 {offsets = [0, 64], sizes = [2, 32], strides = [1, 1]} : vector<2x128xf32> to vector<2x32xf32>
    %95 = vector.extract_strided_slice %91 {offsets = [0, 96], sizes = [2, 32], strides = [1, 1]} : vector<2x128xf32> to vector<2x32xf32>
    %96 = arith.mulf %93, %43 : vector<2x32xf32>
    %97 = arith.mulf %92, %94 : vector<2x32xf32>
    %98 = arith.addf %96, %97 : vector<2x32xf32>
    %99 = math.tanh %98 : vector<2x32xf32>
    %100 = arith.mulf %95, %99 : vector<2x32xf32>
    %101 = arith.negf %84 : vector<2x128xf32>
    %102 = math.exp %101 : vector<2x128xf32>
    %cst_27 = arith.constant 1.000000e+00 : f32
    %103 = vector.broadcast %cst_27 : f32 to vector<2x128xf32>
    %104 = arith.addf %103, %102 : vector<2x128xf32>
    %105 = arith.divf %103, %104 : vector<2x128xf32>
    %106 = math.tanh %84 : vector<2x128xf32>
    %107 = arith.select %13, %106, %105 : vector<2x128xi1>, vector<2x128xf32>
    %108 = vector.extract_strided_slice %107 {offsets = [0, 0], sizes = [2, 32], strides = [1, 1]} : vector<2x128xf32> to vector<2x32xf32>
    %109 = vector.extract_strided_slice %107 {offsets = [0, 32], sizes = [2, 32], strides = [1, 1]} : vector<2x128xf32> to vector<2x32xf32>
    %110 = vector.extract_strided_slice %107 {offsets = [0, 64], sizes = [2, 32], strides = [1, 1]} : vector<2x128xf32> to vector<2x32xf32>
    %111 = vector.extract_strided_slice %107 {offsets = [0, 96], sizes = [2, 32], strides = [1, 1]} : vector<2x128xf32> to vector<2x32xf32>
    %112 = arith.mulf %109, %59 : vector<2x32xf32>
    %113 = arith.mulf %108, %110 : vector<2x32xf32>
    %114 = arith.addf %112, %113 : vector<2x32xf32>
    %115 = math.tanh %114 : vector<2x32xf32>
    %116 = arith.mulf %111, %115 : vector<2x32xf32>
    %117 = arith.index_cast %c1_i32 : i32 to index
    %c0_28 = arith.constant 0 : index
    %c0_29 = arith.constant 0 : index
    %118 = vector.load %arg6[%117, %c0_28, %c0_29] : memref<8x2x32xf32, #tpu.memory_space<vmem>>, vector<1x2x32xf32>
    %119 = vector.shape_cast %118 : vector<1x2x32xf32> to vector<2x32xf32>
    %120 = vector.shape_cast %100 : vector<2x32xf32> to vector<1x2x32xf32>
    tpu.vector_store %arg6[%117, %c0_28, %c0_29], %120 {strides = array<i32>} : memref<8x2x32xf32, #tpu.memory_space<vmem>>, vector<1x2x32xf32>,
    %121 = arith.index_cast %70 : i32 to index
    %c0_30 = arith.constant 0 : index
    %c0_31 = arith.constant 0 : index
    %122 = vector.load %arg7[%121, %c0_30, %c0_31] : memref<8x2x32xf32, #tpu.memory_space<vmem>>, vector<1x2x32xf32>
    %123 = vector.shape_cast %122 : vector<1x2x32xf32> to vector<2x32xf32>
    %124 = vector.shape_cast %116 : vector<2x32xf32> to vector<1x2x32xf32>
    tpu.vector_store %arg7[%121, %c0_30, %c0_31], %124 {strides = array<i32>} : memref<8x2x32xf32, #tpu.memory_space<vmem>>, vector<1x2x32xf32>,
    %c2_i32_32 = arith.constant 2 : i32
    %c7_i32_33 = arith.constant 7 : i32
    %125 = arith.subi %c7_i32_33, %c2_i32_32 : i32
    %126 = tpu.concatenate %100, %116 in 1 : vector<2x32xf32>, vector<2x32xf32> -> vector<2x64xf32>
    %cst_34 = arith.constant dense<0.000000e+00> : vector<2x256xf32>
    %127 = tpu.matmul %126, %7, %cst_34 {dimension_numbers = #tpu.dot_dimension_numbers<[1], [0], [0], [1], [0, 0, 1, 1], [], []>} : vector<2x64xf32>, vector<64x256xf32>, vector<2x256xf32> -> vector<2x256xf32>
    %c2_i32_35 = arith.constant 2 : i32
    %128 = arith.muli %c2_i32_32, %c2_i32_35 : i32
    %129 = arith.index_cast %128 : i32 to index
    %c0_36 = arith.constant 0 : index
    %130 = vector.load %arg5[%129, %c0_36] : memref<16x256xf32, #tpu.memory_space<vmem>>, vector<2x256xf32>
    %c2_i32_37 = arith.constant 2 : i32
    %131 = arith.muli %125, %c2_i32_37 : i32
    %132 = arith.index_cast %131 : i32 to index
    %c0_38 = arith.constant 0 : index
    %133 = vector.load %arg5[%132, %c0_38] : memref<16x256xf32, #tpu.memory_space<vmem>>, vector<2x256xf32>
    %134 = vector.extract_strided_slice %127 {offsets = [0, 0], sizes = [2, 128], strides = [1, 1]} : vector<2x256xf32> to vector<2x128xf32>
    %135 = vector.extract_strided_slice %130 {offsets = [0, 0], sizes = [2, 128], strides = [1, 1]} : vector<2x256xf32> to vector<2x128xf32>
    %136 = arith.addf %134, %135 : vector<2x128xf32>
    %137 = vector.extract_strided_slice %127 {offsets = [0, 128], sizes = [2, 128], strides = [1, 1]} : vector<2x256xf32> to vector<2x128xf32>
    %138 = vector.extract_strided_slice %133 {offsets = [0, 128], sizes = [2, 128], strides = [1, 1]} : vector<2x256xf32> to vector<2x128xf32>
    %139 = arith.addf %137, %138 : vector<2x128xf32>
    %140 = arith.negf %136 : vector<2x128xf32>
    %141 = math.exp %140 : vector<2x128xf32>
    %cst_39 = arith.constant 1.000000e+00 : f32
    %142 = vector.broadcast %cst_39 : f32 to vector<2x128xf32>
    %143 = arith.addf %142, %141 : vector<2x128xf32>
    %144 = arith.divf %142, %143 : vector<2x128xf32>
    %145 = math.tanh %136 : vector<2x128xf32>
    %146 = arith.select %13, %145, %144 : vector<2x128xi1>, vector<2x128xf32>
    %147 = vector.extract_strided_slice %146 {offsets = [0, 0], sizes = [2, 32], strides = [1, 1]} : vector<2x128xf32> to vector<2x32xf32>
    %148 = vector.extract_strided_slice %146 {offsets = [0, 32], sizes = [2, 32], strides = [1, 1]} : vector<2x128xf32> to vector<2x32xf32>
    %149 = vector.extract_strided_slice %146 {offsets = [0, 64], sizes = [2, 32], strides = [1, 1]} : vector<2x128xf32> to vector<2x32xf32>
    %150 = vector.extract_strided_slice %146 {offsets = [0, 96], sizes = [2, 32], strides = [1, 1]} : vector<2x128xf32> to vector<2x32xf32>
    %151 = arith.mulf %148, %98 : vector<2x32xf32>
    %152 = arith.mulf %147, %149 : vector<2x32xf32>
    %153 = arith.addf %151, %152 : vector<2x32xf32>
    %154 = math.tanh %153 : vector<2x32xf32>
    %155 = arith.mulf %150, %154 : vector<2x32xf32>
    %156 = arith.negf %139 : vector<2x128xf32>
    %157 = math.exp %156 : vector<2x128xf32>
    %cst_40 = arith.constant 1.000000e+00 : f32
    %158 = vector.broadcast %cst_40 : f32 to vector<2x128xf32>
    %159 = arith.addf %158, %157 : vector<2x128xf32>
    %160 = arith.divf %158, %159 : vector<2x128xf32>
    %161 = math.tanh %139 : vector<2x128xf32>
    %162 = arith.select %13, %161, %160 : vector<2x128xi1>, vector<2x128xf32>
    %163 = vector.extract_strided_slice %162 {offsets = [0, 0], sizes = [2, 32], strides = [1, 1]} : vector<2x128xf32> to vector<2x32xf32>
    %164 = vector.extract_strided_slice %162 {offsets = [0, 32], sizes = [2, 32], strides = [1, 1]} : vector<2x128xf32> to vector<2x32xf32>
    %165 = vector.extract_strided_slice %162 {offsets = [0, 64], sizes = [2, 32], strides = [1, 1]} : vector<2x128xf32> to vector<2x32xf32>
    %166 = vector.extract_strided_slice %162 {offsets = [0, 96], sizes = [2, 32], strides = [1, 1]} : vector<2x128xf32> to vector<2x32xf32>
    %167 = arith.mulf %164, %114 : vector<2x32xf32>
    %168 = arith.mulf %163, %165 : vector<2x32xf32>
    %169 = arith.addf %167, %168 : vector<2x32xf32>
    %170 = math.tanh %169 : vector<2x32xf32>
    %171 = arith.mulf %166, %170 : vector<2x32xf32>
    %172 = arith.index_cast %c2_i32_32 : i32 to index
    %c0_41 = arith.constant 0 : index
    %c0_42 = arith.constant 0 : index
    %173 = vector.load %arg6[%172, %c0_41, %c0_42] : memref<8x2x32xf32, #tpu.memory_space<vmem>>, vector<1x2x32xf32>
    %174 = vector.shape_cast %173 : vector<1x2x32xf32> to vector<2x32xf32>
    %175 = vector.shape_cast %155 : vector<2x32xf32> to vector<1x2x32xf32>
    tpu.vector_store %arg6[%172, %c0_41, %c0_42], %175 {strides = array<i32>} : memref<8x2x32xf32, #tpu.memory_space<vmem>>, vector<1x2x32xf32>,
    %176 = arith.index_cast %125 : i32 to index
    %c0_43 = arith.constant 0 : index
    %c0_44 = arith.constant 0 : index
    %177 = vector.load %arg7[%176, %c0_43, %c0_44] : memref<8x2x32xf32, #tpu.memory_space<vmem>>, vector<1x2x32xf32>
    %178 = vector.shape_cast %177 : vector<1x2x32xf32> to vector<2x32xf32>
    %179 = vector.shape_cast %171 : vector<2x32xf32> to vector<1x2x32xf32>
    tpu.vector_store %arg7[%176, %c0_43, %c0_44], %179 {strides = array<i32>} : memref<8x2x32xf32, #tpu.memory_space<vmem>>, vector<1x2x32xf32>,
    %c3_i32 = arith.constant 3 : i32
    %c7_i32_45 = arith.constant 7 : i32
    %180 = arith.subi %c7_i32_45, %c3_i32 : i32
    %181 = tpu.concatenate %155, %171 in 1 : vector<2x32xf32>, vector<2x32xf32> -> vector<2x64xf32>
    %cst_46 = arith.constant dense<0.000000e+00> : vector<2x256xf32>
    %182 = tpu.matmul %181, %7, %cst_46 {dimension_numbers = #tpu.dot_dimension_numbers<[1], [0], [0], [1], [0, 0, 1, 1], [], []>} : vector<2x64xf32>, vector<64x256xf32>, vector<2x256xf32> -> vector<2x256xf32>
    %c2_i32_47 = arith.constant 2 : i32
    %183 = arith.muli %c3_i32, %c2_i32_47 : i32
    %184 = arith.index_cast %183 : i32 to index
    %c0_48 = arith.constant 0 : index
    %185 = vector.load %arg5[%184, %c0_48] : memref<16x256xf32, #tpu.memory_space<vmem>>, vector<2x256xf32>
    %c2_i32_49 = arith.constant 2 : i32
    %186 = arith.muli %180, %c2_i32_49 : i32
    %187 = arith.index_cast %186 : i32 to index
    %c0_50 = arith.constant 0 : index
    %188 = vector.load %arg5[%187, %c0_50] : memref<16x256xf32, #tpu.memory_space<vmem>>, vector<2x256xf32>
    %189 = vector.extract_strided_slice %182 {offsets = [0, 0], sizes = [2, 128], strides = [1, 1]} : vector<2x256xf32> to vector<2x128xf32>
    %190 = vector.extract_strided_slice %185 {offsets = [0, 0], sizes = [2, 128], strides = [1, 1]} : vector<2x256xf32> to vector<2x128xf32>
    %191 = arith.addf %189, %190 : vector<2x128xf32>
    %192 = vector.extract_strided_slice %182 {offsets = [0, 128], sizes = [2, 128], strides = [1, 1]} : vector<2x256xf32> to vector<2x128xf32>
    %193 = vector.extract_strided_slice %188 {offsets = [0, 128], sizes = [2, 128], strides = [1, 1]} : vector<2x256xf32> to vector<2x128xf32>
    %194 = arith.addf %192, %193 : vector<2x128xf32>
    %195 = arith.negf %191 : vector<2x128xf32>
    %196 = math.exp %195 : vector<2x128xf32>
    %cst_51 = arith.constant 1.000000e+00 : f32
    %197 = vector.broadcast %cst_51 : f32 to vector<2x128xf32>
    %198 = arith.addf %197, %196 : vector<2x128xf32>
    %199 = arith.divf %197, %198 : vector<2x128xf32>
    %200 = math.tanh %191 : vector<2x128xf32>
    %201 = arith.select %13, %200, %199 : vector<2x128xi1>, vector<2x128xf32>
    %202 = vector.extract_strided_slice %201 {offsets = [0, 0], sizes = [2, 32], strides = [1, 1]} : vector<2x128xf32> to vector<2x32xf32>
    %203 = vector.extract_strided_slice %201 {offsets = [0, 32], sizes = [2, 32], strides = [1, 1]} : vector<2x128xf32> to vector<2x32xf32>
    %204 = vector.extract_strided_slice %201 {offsets = [0, 64], sizes = [2, 32], strides = [1, 1]} : vector<2x128xf32> to vector<2x32xf32>
    %205 = vector.extract_strided_slice %201 {offsets = [0, 96], sizes = [2, 32], strides = [1, 1]} : vector<2x128xf32> to vector<2x32xf32>
    %206 = arith.mulf %203, %153 : vector<2x32xf32>
    %207 = arith.mulf %202, %204 : vector<2x32xf32>
    %208 = arith.addf %206, %207 : vector<2x32xf32>
    %209 = math.tanh %208 : vector<2x32xf32>
    %210 = arith.mulf %205, %209 : vector<2x32xf32>
    %211 = arith.negf %194 : vector<2x128xf32>
    %212 = math.exp %211 : vector<2x128xf32>
    %cst_52 = arith.constant 1.000000e+00 : f32
    %213 = vector.broadcast %cst_52 : f32 to vector<2x128xf32>
    %214 = arith.addf %213, %212 : vector<2x128xf32>
    %215 = arith.divf %213, %214 : vector<2x128xf32>
    %216 = math.tanh %194 : vector<2x128xf32>
    %217 = arith.select %13, %216, %215 : vector<2x128xi1>, vector<2x128xf32>
    %218 = vector.extract_strided_slice %217 {offsets = [0, 0], sizes = [2, 32], strides = [1, 1]} : vector<2x128xf32> to vector<2x32xf32>
    %219 = vector.extract_strided_slice %217 {offsets = [0, 32], sizes = [2, 32], strides = [1, 1]} : vector<2x128xf32> to vector<2x32xf32>
    %220 = vector.extract_strided_slice %217 {offsets = [0, 64], sizes = [2, 32], strides = [1, 1]} : vector<2x128xf32> to vector<2x32xf32>
    %221 = vector.extract_strided_slice %217 {offsets = [0, 96], sizes = [2, 32], strides = [1, 1]} : vector<2x128xf32> to vector<2x32xf32>
    %222 = arith.mulf %219, %169 : vector<2x32xf32>
    %223 = arith.mulf %218, %220 : vector<2x32xf32>
    %224 = arith.addf %222, %223 : vector<2x32xf32>
    %225 = math.tanh %224 : vector<2x32xf32>
    %226 = arith.mulf %221, %225 : vector<2x32xf32>
    %227 = arith.index_cast %c3_i32 : i32 to index
    %c0_53 = arith.constant 0 : index
    %c0_54 = arith.constant 0 : index
    %228 = vector.load %arg6[%227, %c0_53, %c0_54] : memref<8x2x32xf32, #tpu.memory_space<vmem>>, vector<1x2x32xf32>
    %229 = vector.shape_cast %228 : vector<1x2x32xf32> to vector<2x32xf32>
    %230 = vector.shape_cast %210 : vector<2x32xf32> to vector<1x2x32xf32>
    tpu.vector_store %arg6[%227, %c0_53, %c0_54], %230 {strides = array<i32>} : memref<8x2x32xf32, #tpu.memory_space<vmem>>, vector<1x2x32xf32>,
    %231 = arith.index_cast %180 : i32 to index
    %c0_55 = arith.constant 0 : index
    %c0_56 = arith.constant 0 : index
    %232 = vector.load %arg7[%231, %c0_55, %c0_56] : memref<8x2x32xf32, #tpu.memory_space<vmem>>, vector<1x2x32xf32>
    %233 = vector.shape_cast %232 : vector<1x2x32xf32> to vector<2x32xf32>
    %234 = vector.shape_cast %226 : vector<2x32xf32> to vector<1x2x32xf32>
    tpu.vector_store %arg7[%231, %c0_55, %c0_56], %234 {strides = array<i32>} : memref<8x2x32xf32, #tpu.memory_space<vmem>>, vector<1x2x32xf32>,
    %c4_i32 = arith.constant 4 : i32
    %c7_i32_57 = arith.constant 7 : i32
    %235 = arith.subi %c7_i32_57, %c4_i32 : i32
    %236 = tpu.concatenate %210, %226 in 1 : vector<2x32xf32>, vector<2x32xf32> -> vector<2x64xf32>
    %cst_58 = arith.constant dense<0.000000e+00> : vector<2x256xf32>
    %237 = tpu.matmul %236, %7, %cst_58 {dimension_numbers = #tpu.dot_dimension_numbers<[1], [0], [0], [1], [0, 0, 1, 1], [], []>} : vector<2x64xf32>, vector<64x256xf32>, vector<2x256xf32> -> vector<2x256xf32>
    %c2_i32_59 = arith.constant 2 : i32
    %238 = arith.muli %c4_i32, %c2_i32_59 : i32
    %239 = arith.index_cast %238 : i32 to index
    %c0_60 = arith.constant 0 : index
    %240 = vector.load %arg5[%239, %c0_60] : memref<16x256xf32, #tpu.memory_space<vmem>>, vector<2x256xf32>
    %c2_i32_61 = arith.constant 2 : i32
    %241 = arith.muli %235, %c2_i32_61 : i32
    %242 = arith.index_cast %241 : i32 to index
    %c0_62 = arith.constant 0 : index
    %243 = vector.load %arg5[%242, %c0_62] : memref<16x256xf32, #tpu.memory_space<vmem>>, vector<2x256xf32>
    %244 = vector.extract_strided_slice %237 {offsets = [0, 0], sizes = [2, 128], strides = [1, 1]} : vector<2x256xf32> to vector<2x128xf32>
    %245 = vector.extract_strided_slice %240 {offsets = [0, 0], sizes = [2, 128], strides = [1, 1]} : vector<2x256xf32> to vector<2x128xf32>
    %246 = arith.addf %244, %245 : vector<2x128xf32>
    %247 = vector.extract_strided_slice %237 {offsets = [0, 128], sizes = [2, 128], strides = [1, 1]} : vector<2x256xf32> to vector<2x128xf32>
    %248 = vector.extract_strided_slice %243 {offsets = [0, 128], sizes = [2, 128], strides = [1, 1]} : vector<2x256xf32> to vector<2x128xf32>
    %249 = arith.addf %247, %248 : vector<2x128xf32>
    %250 = arith.negf %246 : vector<2x128xf32>
    %251 = math.exp %250 : vector<2x128xf32>
    %cst_63 = arith.constant 1.000000e+00 : f32
    %252 = vector.broadcast %cst_63 : f32 to vector<2x128xf32>
    %253 = arith.addf %252, %251 : vector<2x128xf32>
    %254 = arith.divf %252, %253 : vector<2x128xf32>
    %255 = math.tanh %246 : vector<2x128xf32>
    %256 = arith.select %13, %255, %254 : vector<2x128xi1>, vector<2x128xf32>
    %257 = vector.extract_strided_slice %256 {offsets = [0, 0], sizes = [2, 32], strides = [1, 1]} : vector<2x128xf32> to vector<2x32xf32>
    %258 = vector.extract_strided_slice %256 {offsets = [0, 32], sizes = [2, 32], strides = [1, 1]} : vector<2x128xf32> to vector<2x32xf32>
    %259 = vector.extract_strided_slice %256 {offsets = [0, 64], sizes = [2, 32], strides = [1, 1]} : vector<2x128xf32> to vector<2x32xf32>
    %260 = vector.extract_strided_slice %256 {offsets = [0, 96], sizes = [2, 32], strides = [1, 1]} : vector<2x128xf32> to vector<2x32xf32>
    %261 = arith.mulf %258, %208 : vector<2x32xf32>
    %262 = arith.mulf %257, %259 : vector<2x32xf32>
    %263 = arith.addf %261, %262 : vector<2x32xf32>
    %264 = math.tanh %263 : vector<2x32xf32>
    %265 = arith.mulf %260, %264 : vector<2x32xf32>
    %266 = arith.negf %249 : vector<2x128xf32>
    %267 = math.exp %266 : vector<2x128xf32>
    %cst_64 = arith.constant 1.000000e+00 : f32
    %268 = vector.broadcast %cst_64 : f32 to vector<2x128xf32>
    %269 = arith.addf %268, %267 : vector<2x128xf32>
    %270 = arith.divf %268, %269 : vector<2x128xf32>
    %271 = math.tanh %249 : vector<2x128xf32>
    %272 = arith.select %13, %271, %270 : vector<2x128xi1>, vector<2x128xf32>
    %273 = vector.extract_strided_slice %272 {offsets = [0, 0], sizes = [2, 32], strides = [1, 1]} : vector<2x128xf32> to vector<2x32xf32>
    %274 = vector.extract_strided_slice %272 {offsets = [0, 32], sizes = [2, 32], strides = [1, 1]} : vector<2x128xf32> to vector<2x32xf32>
    %275 = vector.extract_strided_slice %272 {offsets = [0, 64], sizes = [2, 32], strides = [1, 1]} : vector<2x128xf32> to vector<2x32xf32>
    %276 = vector.extract_strided_slice %272 {offsets = [0, 96], sizes = [2, 32], strides = [1, 1]} : vector<2x128xf32> to vector<2x32xf32>
    %277 = arith.mulf %274, %224 : vector<2x32xf32>
    %278 = arith.mulf %273, %275 : vector<2x32xf32>
    %279 = arith.addf %277, %278 : vector<2x32xf32>
    %280 = math.tanh %279 : vector<2x32xf32>
    %281 = arith.mulf %276, %280 : vector<2x32xf32>
    %282 = arith.index_cast %c4_i32 : i32 to index
    %c0_65 = arith.constant 0 : index
    %c0_66 = arith.constant 0 : index
    %283 = vector.load %arg6[%282, %c0_65, %c0_66] : memref<8x2x32xf32, #tpu.memory_space<vmem>>, vector<1x2x32xf32>
    %284 = vector.shape_cast %283 : vector<1x2x32xf32> to vector<2x32xf32>
    %285 = vector.shape_cast %265 : vector<2x32xf32> to vector<1x2x32xf32>
    tpu.vector_store %arg6[%282, %c0_65, %c0_66], %285 {strides = array<i32>} : memref<8x2x32xf32, #tpu.memory_space<vmem>>, vector<1x2x32xf32>,
    %286 = arith.index_cast %235 : i32 to index
    %c0_67 = arith.constant 0 : index
    %c0_68 = arith.constant 0 : index
    %287 = vector.load %arg7[%286, %c0_67, %c0_68] : memref<8x2x32xf32, #tpu.memory_space<vmem>>, vector<1x2x32xf32>
    %288 = vector.shape_cast %287 : vector<1x2x32xf32> to vector<2x32xf32>
    %289 = vector.shape_cast %281 : vector<2x32xf32> to vector<1x2x32xf32>
    tpu.vector_store %arg7[%286, %c0_67, %c0_68], %289 {strides = array<i32>} : memref<8x2x32xf32, #tpu.memory_space<vmem>>, vector<1x2x32xf32>,
    %c5_i32 = arith.constant 5 : i32
    %c7_i32_69 = arith.constant 7 : i32
    %290 = arith.subi %c7_i32_69, %c5_i32 : i32
    %291 = tpu.concatenate %265, %281 in 1 : vector<2x32xf32>, vector<2x32xf32> -> vector<2x64xf32>
    %cst_70 = arith.constant dense<0.000000e+00> : vector<2x256xf32>
    %292 = tpu.matmul %291, %7, %cst_70 {dimension_numbers = #tpu.dot_dimension_numbers<[1], [0], [0], [1], [0, 0, 1, 1], [], []>} : vector<2x64xf32>, vector<64x256xf32>, vector<2x256xf32> -> vector<2x256xf32>
    %c2_i32_71 = arith.constant 2 : i32
    %293 = arith.muli %c5_i32, %c2_i32_71 : i32
    %294 = arith.index_cast %293 : i32 to index
    %c0_72 = arith.constant 0 : index
    %295 = vector.load %arg5[%294, %c0_72] : memref<16x256xf32, #tpu.memory_space<vmem>>, vector<2x256xf32>
    %c2_i32_73 = arith.constant 2 : i32
    %296 = arith.muli %290, %c2_i32_73 : i32
    %297 = arith.index_cast %296 : i32 to index
    %c0_74 = arith.constant 0 : index
    %298 = vector.load %arg5[%297, %c0_74] : memref<16x256xf32, #tpu.memory_space<vmem>>, vector<2x256xf32>
    %299 = vector.extract_strided_slice %292 {offsets = [0, 0], sizes = [2, 128], strides = [1, 1]} : vector<2x256xf32> to vector<2x128xf32>
    %300 = vector.extract_strided_slice %295 {offsets = [0, 0], sizes = [2, 128], strides = [1, 1]} : vector<2x256xf32> to vector<2x128xf32>
    %301 = arith.addf %299, %300 : vector<2x128xf32>
    %302 = vector.extract_strided_slice %292 {offsets = [0, 128], sizes = [2, 128], strides = [1, 1]} : vector<2x256xf32> to vector<2x128xf32>
    %303 = vector.extract_strided_slice %298 {offsets = [0, 128], sizes = [2, 128], strides = [1, 1]} : vector<2x256xf32> to vector<2x128xf32>
    %304 = arith.addf %302, %303 : vector<2x128xf32>
    %305 = arith.negf %301 : vector<2x128xf32>
    %306 = math.exp %305 : vector<2x128xf32>
    %cst_75 = arith.constant 1.000000e+00 : f32
    %307 = vector.broadcast %cst_75 : f32 to vector<2x128xf32>
    %308 = arith.addf %307, %306 : vector<2x128xf32>
    %309 = arith.divf %307, %308 : vector<2x128xf32>
    %310 = math.tanh %301 : vector<2x128xf32>
    %311 = arith.select %13, %310, %309 : vector<2x128xi1>, vector<2x128xf32>
    %312 = vector.extract_strided_slice %311 {offsets = [0, 0], sizes = [2, 32], strides = [1, 1]} : vector<2x128xf32> to vector<2x32xf32>
    %313 = vector.extract_strided_slice %311 {offsets = [0, 32], sizes = [2, 32], strides = [1, 1]} : vector<2x128xf32> to vector<2x32xf32>
    %314 = vector.extract_strided_slice %311 {offsets = [0, 64], sizes = [2, 32], strides = [1, 1]} : vector<2x128xf32> to vector<2x32xf32>
    %315 = vector.extract_strided_slice %311 {offsets = [0, 96], sizes = [2, 32], strides = [1, 1]} : vector<2x128xf32> to vector<2x32xf32>
    %316 = arith.mulf %313, %263 : vector<2x32xf32>
    %317 = arith.mulf %312, %314 : vector<2x32xf32>
    %318 = arith.addf %316, %317 : vector<2x32xf32>
    %319 = math.tanh %318 : vector<2x32xf32>
    %320 = arith.mulf %315, %319 : vector<2x32xf32>
    %321 = arith.negf %304 : vector<2x128xf32>
    %322 = math.exp %321 : vector<2x128xf32>
    %cst_76 = arith.constant 1.000000e+00 : f32
    %323 = vector.broadcast %cst_76 : f32 to vector<2x128xf32>
    %324 = arith.addf %323, %322 : vector<2x128xf32>
    %325 = arith.divf %323, %324 : vector<2x128xf32>
    %326 = math.tanh %304 : vector<2x128xf32>
    %327 = arith.select %13, %326, %325 : vector<2x128xi1>, vector<2x128xf32>
    %328 = vector.extract_strided_slice %327 {offsets = [0, 0], sizes = [2, 32], strides = [1, 1]} : vector<2x128xf32> to vector<2x32xf32>
    %329 = vector.extract_strided_slice %327 {offsets = [0, 32], sizes = [2, 32], strides = [1, 1]} : vector<2x128xf32> to vector<2x32xf32>
    %330 = vector.extract_strided_slice %327 {offsets = [0, 64], sizes = [2, 32], strides = [1, 1]} : vector<2x128xf32> to vector<2x32xf32>
    %331 = vector.extract_strided_slice %327 {offsets = [0, 96], sizes = [2, 32], strides = [1, 1]} : vector<2x128xf32> to vector<2x32xf32>
    %332 = arith.mulf %329, %279 : vector<2x32xf32>
    %333 = arith.mulf %328, %330 : vector<2x32xf32>
    %334 = arith.addf %332, %333 : vector<2x32xf32>
    %335 = math.tanh %334 : vector<2x32xf32>
    %336 = arith.mulf %331, %335 : vector<2x32xf32>
    %337 = arith.index_cast %c5_i32 : i32 to index
    %c0_77 = arith.constant 0 : index
    %c0_78 = arith.constant 0 : index
    %338 = vector.load %arg6[%337, %c0_77, %c0_78] : memref<8x2x32xf32, #tpu.memory_space<vmem>>, vector<1x2x32xf32>
    %339 = vector.shape_cast %338 : vector<1x2x32xf32> to vector<2x32xf32>
    %340 = vector.shape_cast %320 : vector<2x32xf32> to vector<1x2x32xf32>
    tpu.vector_store %arg6[%337, %c0_77, %c0_78], %340 {strides = array<i32>} : memref<8x2x32xf32, #tpu.memory_space<vmem>>, vector<1x2x32xf32>,
    %341 = arith.index_cast %290 : i32 to index
    %c0_79 = arith.constant 0 : index
    %c0_80 = arith.constant 0 : index
    %342 = vector.load %arg7[%341, %c0_79, %c0_80] : memref<8x2x32xf32, #tpu.memory_space<vmem>>, vector<1x2x32xf32>
    %343 = vector.shape_cast %342 : vector<1x2x32xf32> to vector<2x32xf32>
    %344 = vector.shape_cast %336 : vector<2x32xf32> to vector<1x2x32xf32>
    tpu.vector_store %arg7[%341, %c0_79, %c0_80], %344 {strides = array<i32>} : memref<8x2x32xf32, #tpu.memory_space<vmem>>, vector<1x2x32xf32>,
    %c6_i32 = arith.constant 6 : i32
    %c7_i32_81 = arith.constant 7 : i32
    %345 = arith.subi %c7_i32_81, %c6_i32 : i32
    %346 = tpu.concatenate %320, %336 in 1 : vector<2x32xf32>, vector<2x32xf32> -> vector<2x64xf32>
    %cst_82 = arith.constant dense<0.000000e+00> : vector<2x256xf32>
    %347 = tpu.matmul %346, %7, %cst_82 {dimension_numbers = #tpu.dot_dimension_numbers<[1], [0], [0], [1], [0, 0, 1, 1], [], []>} : vector<2x64xf32>, vector<64x256xf32>, vector<2x256xf32> -> vector<2x256xf32>
    %c2_i32_83 = arith.constant 2 : i32
    %348 = arith.muli %c6_i32, %c2_i32_83 : i32
    %349 = arith.index_cast %348 : i32 to index
    %c0_84 = arith.constant 0 : index
    %350 = vector.load %arg5[%349, %c0_84] : memref<16x256xf32, #tpu.memory_space<vmem>>, vector<2x256xf32>
    %c2_i32_85 = arith.constant 2 : i32
    %351 = arith.muli %345, %c2_i32_85 : i32
    %352 = arith.index_cast %351 : i32 to index
    %c0_86 = arith.constant 0 : index
    %353 = vector.load %arg5[%352, %c0_86] : memref<16x256xf32, #tpu.memory_space<vmem>>, vector<2x256xf32>
    %354 = vector.extract_strided_slice %347 {offsets = [0, 0], sizes = [2, 128], strides = [1, 1]} : vector<2x256xf32> to vector<2x128xf32>
    %355 = vector.extract_strided_slice %350 {offsets = [0, 0], sizes = [2, 128], strides = [1, 1]} : vector<2x256xf32> to vector<2x128xf32>
    %356 = arith.addf %354, %355 : vector<2x128xf32>
    %357 = vector.extract_strided_slice %347 {offsets = [0, 128], sizes = [2, 128], strides = [1, 1]} : vector<2x256xf32> to vector<2x128xf32>
    %358 = vector.extract_strided_slice %353 {offsets = [0, 128], sizes = [2, 128], strides = [1, 1]} : vector<2x256xf32> to vector<2x128xf32>
    %359 = arith.addf %357, %358 : vector<2x128xf32>
    %360 = arith.negf %356 : vector<2x128xf32>
    %361 = math.exp %360 : vector<2x128xf32>
    %cst_87 = arith.constant 1.000000e+00 : f32
    %362 = vector.broadcast %cst_87 : f32 to vector<2x128xf32>
    %363 = arith.addf %362, %361 : vector<2x128xf32>
    %364 = arith.divf %362, %363 : vector<2x128xf32>
    %365 = math.tanh %356 : vector<2x128xf32>
    %366 = arith.select %13, %365, %364 : vector<2x128xi1>, vector<2x128xf32>
    %367 = vector.extract_strided_slice %366 {offsets = [0, 0], sizes = [2, 32], strides = [1, 1]} : vector<2x128xf32> to vector<2x32xf32>
    %368 = vector.extract_strided_slice %366 {offsets = [0, 32], sizes = [2, 32], strides = [1, 1]} : vector<2x128xf32> to vector<2x32xf32>
    %369 = vector.extract_strided_slice %366 {offsets = [0, 64], sizes = [2, 32], strides = [1, 1]} : vector<2x128xf32> to vector<2x32xf32>
    %370 = vector.extract_strided_slice %366 {offsets = [0, 96], sizes = [2, 32], strides = [1, 1]} : vector<2x128xf32> to vector<2x32xf32>
    %371 = arith.mulf %368, %318 : vector<2x32xf32>
    %372 = arith.mulf %367, %369 : vector<2x32xf32>
    %373 = arith.addf %371, %372 : vector<2x32xf32>
    %374 = math.tanh %373 : vector<2x32xf32>
    %375 = arith.mulf %370, %374 : vector<2x32xf32>
    %376 = arith.negf %359 : vector<2x128xf32>
    %377 = math.exp %376 : vector<2x128xf32>
    %cst_88 = arith.constant 1.000000e+00 : f32
    %378 = vector.broadcast %cst_88 : f32 to vector<2x128xf32>
    %379 = arith.addf %378, %377 : vector<2x128xf32>
    %380 = arith.divf %378, %379 : vector<2x128xf32>
    %381 = math.tanh %359 : vector<2x128xf32>
    %382 = arith.select %13, %381, %380 : vector<2x128xi1>, vector<2x128xf32>
    %383 = vector.extract_strided_slice %382 {offsets = [0, 0], sizes = [2, 32], strides = [1, 1]} : vector<2x128xf32> to vector<2x32xf32>
    %384 = vector.extract_strided_slice %382 {offsets = [0, 32], sizes = [2, 32], strides = [1, 1]} : vector<2x128xf32> to vector<2x32xf32>
    %385 = vector.extract_strided_slice %382 {offsets = [0, 64], sizes = [2, 32], strides = [1, 1]} : vector<2x128xf32> to vector<2x32xf32>
    %386 = vector.extract_strided_slice %382 {offsets = [0, 96], sizes = [2, 32], strides = [1, 1]} : vector<2x128xf32> to vector<2x32xf32>
    %387 = arith.mulf %384, %334 : vector<2x32xf32>
    %388 = arith.mulf %383, %385 : vector<2x32xf32>
    %389 = arith.addf %387, %388 : vector<2x32xf32>
    %390 = math.tanh %389 : vector<2x32xf32>
    %391 = arith.mulf %386, %390 : vector<2x32xf32>
    %392 = arith.index_cast %c6_i32 : i32 to index
    %c0_89 = arith.constant 0 : index
    %c0_90 = arith.constant 0 : index
    %393 = vector.load %arg6[%392, %c0_89, %c0_90] : memref<8x2x32xf32, #tpu.memory_space<vmem>>, vector<1x2x32xf32>
    %394 = vector.shape_cast %393 : vector<1x2x32xf32> to vector<2x32xf32>
    %395 = vector.shape_cast %375 : vector<2x32xf32> to vector<1x2x32xf32>
    tpu.vector_store %arg6[%392, %c0_89, %c0_90], %395 {strides = array<i32>} : memref<8x2x32xf32, #tpu.memory_space<vmem>>, vector<1x2x32xf32>,
    %396 = arith.index_cast %345 : i32 to index
    %c0_91 = arith.constant 0 : index
    %c0_92 = arith.constant 0 : index
    %397 = vector.load %arg7[%396, %c0_91, %c0_92] : memref<8x2x32xf32, #tpu.memory_space<vmem>>, vector<1x2x32xf32>
    %398 = vector.shape_cast %397 : vector<1x2x32xf32> to vector<2x32xf32>
    %399 = vector.shape_cast %391 : vector<2x32xf32> to vector<1x2x32xf32>
    tpu.vector_store %arg7[%396, %c0_91, %c0_92], %399 {strides = array<i32>} : memref<8x2x32xf32, #tpu.memory_space<vmem>>, vector<1x2x32xf32>,
    %c7_i32_93 = arith.constant 7 : i32
    %c7_i32_94 = arith.constant 7 : i32
    %400 = arith.subi %c7_i32_94, %c7_i32_93 : i32
    %401 = tpu.concatenate %375, %391 in 1 : vector<2x32xf32>, vector<2x32xf32> -> vector<2x64xf32>
    %cst_95 = arith.constant dense<0.000000e+00> : vector<2x256xf32>
    %402 = tpu.matmul %401, %7, %cst_95 {dimension_numbers = #tpu.dot_dimension_numbers<[1], [0], [0], [1], [0, 0, 1, 1], [], []>} : vector<2x64xf32>, vector<64x256xf32>, vector<2x256xf32> -> vector<2x256xf32>
    %c2_i32_96 = arith.constant 2 : i32
    %403 = arith.muli %c7_i32_93, %c2_i32_96 : i32
    %404 = arith.index_cast %403 : i32 to index
    %c0_97 = arith.constant 0 : index
    %405 = vector.load %arg5[%404, %c0_97] : memref<16x256xf32, #tpu.memory_space<vmem>>, vector<2x256xf32>
    %c2_i32_98 = arith.constant 2 : i32
    %406 = arith.muli %400, %c2_i32_98 : i32
    %407 = arith.index_cast %406 : i32 to index
    %c0_99 = arith.constant 0 : index
    %408 = vector.load %arg5[%407, %c0_99] : memref<16x256xf32, #tpu.memory_space<vmem>>, vector<2x256xf32>
    %409 = vector.extract_strided_slice %402 {offsets = [0, 0], sizes = [2, 128], strides = [1, 1]} : vector<2x256xf32> to vector<2x128xf32>
    %410 = vector.extract_strided_slice %405 {offsets = [0, 0], sizes = [2, 128], strides = [1, 1]} : vector<2x256xf32> to vector<2x128xf32>
    %411 = arith.addf %409, %410 : vector<2x128xf32>
    %412 = vector.extract_strided_slice %402 {offsets = [0, 128], sizes = [2, 128], strides = [1, 1]} : vector<2x256xf32> to vector<2x128xf32>
    %413 = vector.extract_strided_slice %408 {offsets = [0, 128], sizes = [2, 128], strides = [1, 1]} : vector<2x256xf32> to vector<2x128xf32>
    %414 = arith.addf %412, %413 : vector<2x128xf32>
    %415 = arith.negf %411 : vector<2x128xf32>
    %416 = math.exp %415 : vector<2x128xf32>
    %cst_100 = arith.constant 1.000000e+00 : f32
    %417 = vector.broadcast %cst_100 : f32 to vector<2x128xf32>
    %418 = arith.addf %417, %416 : vector<2x128xf32>
    %419 = arith.divf %417, %418 : vector<2x128xf32>
    %420 = math.tanh %411 : vector<2x128xf32>
    %421 = arith.select %13, %420, %419 : vector<2x128xi1>, vector<2x128xf32>
    %422 = vector.extract_strided_slice %421 {offsets = [0, 0], sizes = [2, 32], strides = [1, 1]} : vector<2x128xf32> to vector<2x32xf32>
    %423 = vector.extract_strided_slice %421 {offsets = [0, 32], sizes = [2, 32], strides = [1, 1]} : vector<2x128xf32> to vector<2x32xf32>
    %424 = vector.extract_strided_slice %421 {offsets = [0, 64], sizes = [2, 32], strides = [1, 1]} : vector<2x128xf32> to vector<2x32xf32>
    %425 = vector.extract_strided_slice %421 {offsets = [0, 96], sizes = [2, 32], strides = [1, 1]} : vector<2x128xf32> to vector<2x32xf32>
    %426 = arith.mulf %423, %373 : vector<2x32xf32>
    %427 = arith.mulf %422, %424 : vector<2x32xf32>
    %428 = arith.addf %426, %427 : vector<2x32xf32>
    %429 = math.tanh %428 : vector<2x32xf32>
    %430 = arith.mulf %425, %429 : vector<2x32xf32>
    %431 = arith.negf %414 : vector<2x128xf32>
    %432 = math.exp %431 : vector<2x128xf32>
    %cst_101 = arith.constant 1.000000e+00 : f32
    %433 = vector.broadcast %cst_101 : f32 to vector<2x128xf32>
    %434 = arith.addf %433, %432 : vector<2x128xf32>
    %435 = arith.divf %433, %434 : vector<2x128xf32>
    %436 = math.tanh %414 : vector<2x128xf32>
    %437 = arith.select %13, %436, %435 : vector<2x128xi1>, vector<2x128xf32>
    %438 = vector.extract_strided_slice %437 {offsets = [0, 0], sizes = [2, 32], strides = [1, 1]} : vector<2x128xf32> to vector<2x32xf32>
    %439 = vector.extract_strided_slice %437 {offsets = [0, 32], sizes = [2, 32], strides = [1, 1]} : vector<2x128xf32> to vector<2x32xf32>
    %440 = vector.extract_strided_slice %437 {offsets = [0, 64], sizes = [2, 32], strides = [1, 1]} : vector<2x128xf32> to vector<2x32xf32>
    %441 = vector.extract_strided_slice %437 {offsets = [0, 96], sizes = [2, 32], strides = [1, 1]} : vector<2x128xf32> to vector<2x32xf32>
    %442 = arith.mulf %439, %389 : vector<2x32xf32>
    %443 = arith.mulf %438, %440 : vector<2x32xf32>
    %444 = arith.addf %442, %443 : vector<2x32xf32>
    %445 = math.tanh %444 : vector<2x32xf32>
    %446 = arith.mulf %441, %445 : vector<2x32xf32>
    %447 = arith.index_cast %c7_i32_93 : i32 to index
    %c0_102 = arith.constant 0 : index
    %c0_103 = arith.constant 0 : index
    %448 = vector.load %arg6[%447, %c0_102, %c0_103] : memref<8x2x32xf32, #tpu.memory_space<vmem>>, vector<1x2x32xf32>
    %449 = vector.shape_cast %448 : vector<1x2x32xf32> to vector<2x32xf32>
    %450 = vector.shape_cast %430 : vector<2x32xf32> to vector<1x2x32xf32>
    tpu.vector_store %arg6[%447, %c0_102, %c0_103], %450 {strides = array<i32>} : memref<8x2x32xf32, #tpu.memory_space<vmem>>, vector<1x2x32xf32>,
    %451 = arith.index_cast %400 : i32 to index
    %c0_104 = arith.constant 0 : index
    %c0_105 = arith.constant 0 : index
    %452 = vector.load %arg7[%451, %c0_104, %c0_105] : memref<8x2x32xf32, #tpu.memory_space<vmem>>, vector<1x2x32xf32>
    %453 = vector.shape_cast %452 : vector<1x2x32xf32> to vector<2x32xf32>
    %454 = vector.shape_cast %446 : vector<2x32xf32> to vector<1x2x32xf32>
    tpu.vector_store %arg7[%451, %c0_104, %c0_105], %454 {strides = array<i32>} : memref<8x2x32xf32, #tpu.memory_space<vmem>>, vector<1x2x32xf32>,
    %c8_i32 = arith.constant 8 : i32
    %c0_106 = arith.constant 0 : index
    %c0_107 = arith.constant 0 : index
    %c0_108 = arith.constant 0 : index
    %455 = vector.load %arg6[%c0_106, %c0_107, %c0_108] : memref<8x2x32xf32, #tpu.memory_space<vmem>>, vector<8x2x32xf32>
    %c0_109 = arith.constant 0 : index
    %c0_110 = arith.constant 0 : index
    %c0_111 = arith.constant 0 : index
    %456 = vector.load %arg7[%c0_109, %c0_110, %c0_111] : memref<8x2x32xf32, #tpu.memory_space<vmem>>, vector<8x2x32xf32>
    %457 = tpu.concatenate %455, %456 in 2 : vector<8x2x32xf32>, vector<8x2x32xf32> -> vector<8x2x64xf32>
    %c0_112 = arith.constant 0 : index
    %c0_113 = arith.constant 0 : index
    %c0_114 = arith.constant 0 : index
    %458 = vector.load %arg4[%c0_112, %c0_113, %c0_114] : memref<8x2x64xf32, #tpu.memory_space<vmem>>, vector<8x2x64xf32>
    tpu.vector_store %arg4[%c0_112, %c0_113, %c0_114], %457 {strides = array<i32>} : memref<8x2x64xf32, #tpu.memory_space<vmem>>, vector<8x2x64xf32>,
    return
  }
}

module attributes {stable_mosaic.version = 11 : i64} {
  func.func @_bilstm_layer_kernel(%arg0: memref<16x32xf32, #tpu.memory_space<vmem>>, %arg1: memref<32x256xf32, #tpu.memory_space<vmem>>, %arg2: memref<64x256xf32, #tpu.memory_space<vmem>>, %arg3: memref<1x256xf32, #tpu.memory_space<vmem>>, %arg4: memref<8x2x64xf32, #tpu.memory_space<vmem>>, %arg5: memref<16x256xf32, #tpu.memory_space<vmem>>, %arg6: memref<8x2x32xf32, #tpu.memory_space<vmem>>, %arg7: memref<8x2x32xf32, #tpu.memory_space<vmem>>) attributes {dimension_semantics = [], scalar_prefetch = 0 : i64, scratch_operands = 3 : i64, tpu.core_type = #tpu.core_type<tc>} {
    %c0 = arith.constant 0 : index
    %c0_0 = arith.constant 0 : index
    %0 = vector.load %arg0[%c0, %c0_0] : memref<16x32xf32, #tpu.memory_space<vmem>>, vector<16x32xf32>
    %c0_1 = arith.constant 0 : index
    %c0_2 = arith.constant 0 : index
    %1 = vector.load %arg1[%c0_1, %c0_2] : memref<32x256xf32, #tpu.memory_space<vmem>>, vector<32x256xf32>
    %cst = arith.constant dense<0.000000e+00> : vector<16x256xf32>
    %2 = tpu.matmul %0, %1, %cst {dimension_numbers = #tpu.dot_dimension_numbers<[1], [0], [0], [1], [0, 0, 1, 1], [], []>} : vector<16x32xf32>, vector<32x256xf32>, vector<16x256xf32> -> vector<16x256xf32>
    %c0_3 = arith.constant 0 : index
    %c0_4 = arith.constant 0 : index
    %3 = vector.load %arg3[%c0_3, %c0_4] : memref<1x256xf32, #tpu.memory_space<vmem>>, vector<1x256xf32>
    %4 = vector.broadcast %3 : vector<1x256xf32> to vector<16x256xf32>
    %5 = arith.addf %2, %4 : vector<16x256xf32>
    %c0_5 = arith.constant 0 : index
    %c0_6 = arith.constant 0 : index
    %6 = vector.load %arg5[%c0_5, %c0_6] : memref<16x256xf32, #tpu.memory_space<vmem>>, vector<16x256xf32>
    tpu.vector_store %arg5[%c0_5, %c0_6], %5 {strides = array<i32>} : memref<16x256xf32, #tpu.memory_space<vmem>>, vector<16x256xf32>,
    %c0_7 = arith.constant 0 : index
    %c0_8 = arith.constant 0 : index
    %7 = vector.load %arg2[%c0_7, %c0_8] : memref<64x256xf32, #tpu.memory_space<vmem>>, vector<64x256xf32>
    %8 = tpu.iota {dimensions = array<i32: 1>} : vector<2x128xi32>
    %c64_i32 = arith.constant 64 : i32
    %9 = vector.broadcast %c64_i32 : i32 to vector<2x128xi32>
    %10 = arith.cmpi sge, %8, %9 : vector<2x128xi32>
    %c96_i32 = arith.constant 96 : i32
    %11 = vector.broadcast %c96_i32 : i32 to vector<2x128xi32>
    %12 = arith.cmpi slt, %8, %11 : vector<2x128xi32>
    %13 = arith.andi %10, %12 : vector<2x128xi1>
    %cst_9 = arith.constant 0.000000e+00 : f32
    %14 = vector.broadcast %cst_9 : f32 to vector<2x32xf32>
    %c0_i32 = arith.constant 0 : i32
    %c7_i32 = arith.constant 7 : i32
    %15 = arith.subi %c7_i32, %c0_i32 : i32
    %16 = tpu.concatenate %14, %14 in 1 : vector<2x32xf32>, vector<2x32xf32> -> vector<2x64xf32>
    %cst_10 = arith.constant dense<0.000000e+00> : vector<2x256xf32>
    %17 = tpu.matmul %16, %7, %cst_10 {dimension_numbers = #tpu.dot_dimension_numbers<[1], [0], [0], [1], [0, 0, 1, 1], [], []>} : vector<2x64xf32>, vector<64x256xf32>, vector<2x256xf32> -> vector<2x256xf32>
    %c2_i32 = arith.constant 2 : i32
    %18 = arith.muli %c0_i32, %c2_i32 : i32
    %19 = arith.index_cast %18 : i32 to index
    %c0_11 = arith.constant 0 : index
    %20 = vector.load %arg5[%19, %c0_11] : memref<16x256xf32, #tpu.memory_space<vmem>>, vector<2x256xf32>
    %c2_i32_12 = arith.constant 2 : i32
    %21 = arith.muli %15, %c2_i32_12 : i32
    %22 = arith.index_cast %21 : i32 to index
    %c0_13 = arith.constant 0 : index
    %23 = vector.load %arg5[%22, %c0_13] : memref<16x256xf32, #tpu.memory_space<vmem>>, vector<2x256xf32>
    %24 = vector.extract_strided_slice %17 {offsets = [0, 0], sizes = [2, 128], strides = [1, 1]} : vector<2x256xf32> to vector<2x128xf32>
    %25 = vector.extract_strided_slice %20 {offsets = [0, 0], sizes = [2, 128], strides = [1, 1]} : vector<2x256xf32> to vector<2x128xf32>
    %26 = arith.addf %24, %25 : vector<2x128xf32>
    %27 = vector.extract_strided_slice %17 {offsets = [0, 128], sizes = [2, 128], strides = [1, 1]} : vector<2x256xf32> to vector<2x128xf32>
    %28 = vector.extract_strided_slice %23 {offsets = [0, 128], sizes = [2, 128], strides = [1, 1]} : vector<2x256xf32> to vector<2x128xf32>
    %29 = arith.addf %27, %28 : vector<2x128xf32>
    %30 = arith.negf %26 : vector<2x128xf32>
    %31 = math.exp %30 : vector<2x128xf32>
    %cst_14 = arith.constant 1.000000e+00 : f32
    %32 = vector.broadcast %cst_14 : f32 to vector<2x128xf32>
    %33 = arith.addf %32, %31 : vector<2x128xf32>
    %34 = arith.divf %32, %33 : vector<2x128xf32>
    %35 = math.tanh %26 : vector<2x128xf32>
    %36 = arith.select %13, %35, %34 : vector<2x128xi1>, vector<2x128xf32>
    %37 = vector.extract_strided_slice %36 {offsets = [0, 0], sizes = [2, 32], strides = [1, 1]} : vector<2x128xf32> to vector<2x32xf32>
    %38 = vector.extract_strided_slice %36 {offsets = [0, 32], sizes = [2, 32], strides = [1, 1]} : vector<2x128xf32> to vector<2x32xf32>
    %39 = vector.extract_strided_slice %36 {offsets = [0, 64], sizes = [2, 32], strides = [1, 1]} : vector<2x128xf32> to vector<2x32xf32>
    %40 = vector.extract_strided_slice %36 {offsets = [0, 96], sizes = [2, 32], strides = [1, 1]} : vector<2x128xf32> to vector<2x32xf32>
    %41 = arith.mulf %38, %14 : vector<2x32xf32>
    %42 = arith.mulf %37, %39 : vector<2x32xf32>
    %43 = arith.addf %41, %42 : vector<2x32xf32>
    %44 = math.tanh %43 : vector<2x32xf32>
    %45 = arith.mulf %40, %44 : vector<2x32xf32>
    %46 = arith.negf %29 : vector<2x128xf32>
    %47 = math.exp %46 : vector<2x128xf32>
    %cst_15 = arith.constant 1.000000e+00 : f32
    %48 = vector.broadcast %cst_15 : f32 to vector<2x128xf32>
    %49 = arith.addf %48, %47 : vector<2x128xf32>
    %50 = arith.divf %48, %49 : vector<2x128xf32>
    %51 = math.tanh %29 : vector<2x128xf32>
    %52 = arith.select %13, %51, %50 : vector<2x128xi1>, vector<2x128xf32>
    %53 = vector.extract_strided_slice %52 {offsets = [0, 0], sizes = [2, 32], strides = [1, 1]} : vector<2x128xf32> to vector<2x32xf32>
    %54 = vector.extract_strided_slice %52 {offsets = [0, 32], sizes = [2, 32], strides = [1, 1]} : vector<2x128xf32> to vector<2x32xf32>
    %55 = vector.extract_strided_slice %52 {offsets = [0, 64], sizes = [2, 32], strides = [1, 1]} : vector<2x128xf32> to vector<2x32xf32>
    %56 = vector.extract_strided_slice %52 {offsets = [0, 96], sizes = [2, 32], strides = [1, 1]} : vector<2x128xf32> to vector<2x32xf32>
    %57 = arith.mulf %54, %14 : vector<2x32xf32>
    %58 = arith.mulf %53, %55 : vector<2x32xf32>
    %59 = arith.addf %57, %58 : vector<2x32xf32>
    %60 = math.tanh %59 : vector<2x32xf32>
    %61 = arith.mulf %56, %60 : vector<2x32xf32>
    %62 = arith.index_cast %c0_i32 : i32 to index
    %c0_16 = arith.constant 0 : index
    %c0_17 = arith.constant 0 : index
    %63 = vector.load %arg6[%62, %c0_16, %c0_17] : memref<8x2x32xf32, #tpu.memory_space<vmem>>, vector<1x2x32xf32>
    %64 = vector.shape_cast %63 : vector<1x2x32xf32> to vector<2x32xf32>
    %65 = vector.shape_cast %45 : vector<2x32xf32> to vector<1x2x32xf32>
    tpu.vector_store %arg6[%62, %c0_16, %c0_17], %65 {strides = array<i32>} : memref<8x2x32xf32, #tpu.memory_space<vmem>>, vector<1x2x32xf32>,
    %66 = arith.index_cast %15 : i32 to index
    %c0_18 = arith.constant 0 : index
    %c0_19 = arith.constant 0 : index
    %67 = vector.load %arg7[%66, %c0_18, %c0_19] : memref<8x2x32xf32, #tpu.memory_space<vmem>>, vector<1x2x32xf32>
    %68 = vector.shape_cast %67 : vector<1x2x32xf32> to vector<2x32xf32>
    %69 = vector.shape_cast %61 : vector<2x32xf32> to vector<1x2x32xf32>
    tpu.vector_store %arg7[%66, %c0_18, %c0_19], %69 {strides = array<i32>} : memref<8x2x32xf32, #tpu.memory_space<vmem>>, vector<1x2x32xf32>,
    %c1_i32 = arith.constant 1 : i32
    %c7_i32_20 = arith.constant 7 : i32
    %70 = arith.subi %c7_i32_20, %c1_i32 : i32
    %71 = tpu.concatenate %45, %61 in 1 : vector<2x32xf32>, vector<2x32xf32> -> vector<2x64xf32>
    %cst_21 = arith.constant dense<0.000000e+00> : vector<2x256xf32>
    %72 = tpu.matmul %71, %7, %cst_21 {dimension_numbers = #tpu.dot_dimension_numbers<[1], [0], [0], [1], [0, 0, 1, 1], [], []>} : vector<2x64xf32>, vector<64x256xf32>, vector<2x256xf32> -> vector<2x256xf32>
    %c2_i32_22 = arith.constant 2 : i32
    %73 = arith.muli %c1_i32, %c2_i32_22 : i32
    %74 = arith.index_cast %73 : i32 to index
    %c0_23 = arith.constant 0 : index
    %75 = vector.load %arg5[%74, %c0_23] : memref<16x256xf32, #tpu.memory_space<vmem>>, vector<2x256xf32>
    %c2_i32_24 = arith.constant 2 : i32
    %76 = arith.muli %70, %c2_i32_24 : i32
    %77 = arith.index_cast %76 : i32 to index
    %c0_25 = arith.constant 0 : index
    %78 = vector.load %arg5[%77, %c0_25] : memref<16x256xf32, #tpu.memory_space<vmem>>, vector<2x256xf32>
    %79 = vector.extract_strided_slice %72 {offsets = [0, 0], sizes = [2, 128], strides = [1, 1]} : vector<2x256xf32> to vector<2x128xf32>
    %80 = vector.extract_strided_slice %75 {offsets = [0, 0], sizes = [2, 128], strides = [1, 1]} : vector<2x256xf32> to vector<2x128xf32>
    %81 = arith.addf %79, %80 : vector<2x128xf32>
    %82 = vector.extract_strided_slice %72 {offsets = [0, 128], sizes = [2, 128], strides = [1, 1]} : vector<2x256xf32> to vector<2x128xf32>
    %83 = vector.extract_strided_slice %78 {offsets = [0, 128], sizes = [2, 128], strides = [1, 1]} : vector<2x256xf32> to vector<2x128xf32>
    %84 = arith.addf %82, %83 : vector<2x128xf32>
    %85 = arith.negf %81 : vector<2x128xf32>
    %86 = math.exp %85 : vector<2x128xf32>
    %cst_26 = arith.constant 1.000000e+00 : f32
    %87 = vector.broadcast %cst_26 : f32 to vector<2x128xf32>
    %88 = arith.addf %87, %86 : vector<2x128xf32>
    %89 = arith.divf %87, %88 : vector<2x128xf32>
    %90 = math.tanh %81 : vector<2x128xf32>
    %91 = arith.select %13, %90, %89 : vector<2x128xi1>, vector<2x128xf32>
    %92 = vector.extract_strided_slice %91 {offsets = [0, 0], sizes = [2, 32], strides = [1, 1]} : vector<2x128xf32> to vector<2x32xf32>
    %93 = vector.extract_strided_slice %91 {offsets = [0, 32], sizes = [2, 32], strides = [1, 1]} : vector<2x128xf32> to vector<2x32xf32>
    %94 = vector.extract_strided_slice %91 {offsets = [0, 64], sizes = [2, 32], strides = [1, 1]} : vector<2x128xf32> to vector<2x32xf32>
    %95 = vector.extract_strided_slice %91 {offsets = [0, 96], sizes = [2, 32], strides = [1, 1]} : vector<2x128xf32> to vector<2x32xf32>
    %96 = arith.mulf %93, %43 : vector<2x32xf32>
    %97 = arith.mulf %92, %94 : vector<2x32xf32>
    %98 = arith.addf %96, %97 : vector<2x32xf32>
    %99 = math.tanh %98 : vector<2x32xf32>
    %100 = arith.mulf %95, %99 : vector<2x32xf32>
    %101 = arith.negf %84 : vector<2x128xf32>
    %102 = math.exp %101 : vector<2x128xf32>
    %cst_27 = arith.constant 1.000000e+00 : f32
    %103 = vector.broadcast %cst_27 : f32 to vector<2x128xf32>
    %104 = arith.addf %103, %102 : vector<2x128xf32>
    %105 = arith.divf %103, %104 : vector<2x128xf32>
    %106 = math.tanh %84 : vector<2x128xf32>
    %107 = arith.select %13, %106, %105 : vector<2x128xi1>, vector<2x128xf32>
    %108 = vector.extract_strided_slice %107 {offsets = [0, 0], sizes = [2, 32], strides = [1, 1]} : vector<2x128xf32> to vector<2x32xf32>
    %109 = vector.extract_strided_slice %107 {offsets = [0, 32], sizes = [2, 32], strides = [1, 1]} : vector<2x128xf32> to vector<2x32xf32>
    %110 = vector.extract_strided_slice %107 {offsets = [0, 64], sizes = [2, 32], strides = [1, 1]} : vector<2x128xf32> to vector<2x32xf32>
    %111 = vector.extract_strided_slice %107 {offsets = [0, 96], sizes = [2, 32], strides = [1, 1]} : vector<2x128xf32> to vector<2x32xf32>
    %112 = arith.mulf %109, %59 : vector<2x32xf32>
    %113 = arith.mulf %108, %110 : vector<2x32xf32>
    %114 = arith.addf %112, %113 : vector<2x32xf32>
    %115 = math.tanh %114 : vector<2x32xf32>
    %116 = arith.mulf %111, %115 : vector<2x32xf32>
    %117 = arith.index_cast %c1_i32 : i32 to index
    %c0_28 = arith.constant 0 : index
    %c0_29 = arith.constant 0 : index
    %118 = vector.load %arg6[%117, %c0_28, %c0_29] : memref<8x2x32xf32, #tpu.memory_space<vmem>>, vector<1x2x32xf32>
    %119 = vector.shape_cast %118 : vector<1x2x32xf32> to vector<2x32xf32>
    %120 = vector.shape_cast %100 : vector<2x32xf32> to vector<1x2x32xf32>
    tpu.vector_store %arg6[%117, %c0_28, %c0_29], %120 {strides = array<i32>} : memref<8x2x32xf32, #tpu.memory_space<vmem>>, vector<1x2x32xf32>,
    %121 = arith.index_cast %70 : i32 to index
    %c0_30 = arith.constant 0 : index
    %c0_31 = arith.constant 0 : index
    %122 = vector.load %arg7[%121, %c0_30, %c0_31] : memref<8x2x32xf32, #tpu.memory_space<vmem>>, vector<1x2x32xf32>
    %123 = vector.shape_cast %122 : vector<1x2x32xf32> to vector<2x32xf32>
    %124 = vector.shape_cast %116 : vector<2x32xf32> to vector<1x2x32xf32>
    tpu.vector_store %arg7[%121, %c0_30, %c0_31], %124 {strides = array<i32>} : memref<8x2x32xf32, #tpu.memory_space<vmem>>, vector<1x2x32xf32>,
    %c2_i32_32 = arith.constant 2 : i32
    %c7_i32_33 = arith.constant 7 : i32
    %125 = arith.subi %c7_i32_33, %c2_i32_32 : i32
    %126 = tpu.concatenate %100, %116 in 1 : vector<2x32xf32>, vector<2x32xf32> -> vector<2x64xf32>
    %cst_34 = arith.constant dense<0.000000e+00> : vector<2x256xf32>
    %127 = tpu.matmul %126, %7, %cst_34 {dimension_numbers = #tpu.dot_dimension_numbers<[1], [0], [0], [1], [0, 0, 1, 1], [], []>} : vector<2x64xf32>, vector<64x256xf32>, vector<2x256xf32> -> vector<2x256xf32>
    %c2_i32_35 = arith.constant 2 : i32
    %128 = arith.muli %c2_i32_32, %c2_i32_35 : i32
    %129 = arith.index_cast %128 : i32 to index
    %c0_36 = arith.constant 0 : index
    %130 = vector.load %arg5[%129, %c0_36] : memref<16x256xf32, #tpu.memory_space<vmem>>, vector<2x256xf32>
    %c2_i32_37 = arith.constant 2 : i32
    %131 = arith.muli %125, %c2_i32_37 : i32
    %132 = arith.index_cast %131 : i32 to index
    %c0_38 = arith.constant 0 : index
    %133 = vector.load %arg5[%132, %c0_38] : memref<16x256xf32, #tpu.memory_space<vmem>>, vector<2x256xf32>
    %134 = vector.extract_strided_slice %127 {offsets = [0, 0], sizes = [2, 128], strides = [1, 1]} : vector<2x256xf32> to vector<2x128xf32>
    %135 = vector.extract_strided_slice %130 {offsets = [0, 0], sizes = [2, 128], strides = [1, 1]} : vector<2x256xf32> to vector<2x128xf32>
    %136 = arith.addf %134, %135 : vector<2x128xf32>
    %137 = vector.extract_strided_slice %127 {offsets = [0, 128], sizes = [2, 128], strides = [1, 1]} : vector<2x256xf32> to vector<2x128xf32>
    %138 = vector.extract_strided_slice %133 {offsets = [0, 128], sizes = [2, 128], strides = [1, 1]} : vector<2x256xf32> to vector<2x128xf32>
    %139 = arith.addf %137, %138 : vector<2x128xf32>
    %140 = arith.negf %136 : vector<2x128xf32>
    %141 = math.exp %140 : vector<2x128xf32>
    %cst_39 = arith.constant 1.000000e+00 : f32
    %142 = vector.broadcast %cst_39 : f32 to vector<2x128xf32>
    %143 = arith.addf %142, %141 : vector<2x128xf32>
    %144 = arith.divf %142, %143 : vector<2x128xf32>
    %145 = math.tanh %136 : vector<2x128xf32>
    %146 = arith.select %13, %145, %144 : vector<2x128xi1>, vector<2x128xf32>
    %147 = vector.extract_strided_slice %146 {offsets = [0, 0], sizes = [2, 32], strides = [1, 1]} : vector<2x128xf32> to vector<2x32xf32>
    %148 = vector.extract_strided_slice %146 {offsets = [0, 32], sizes = [2, 32], strides = [1, 1]} : vector<2x128xf32> to vector<2x32xf32>
    %149 = vector.extract_strided_slice %146 {offsets = [0, 64], sizes = [2, 32], strides = [1, 1]} : vector<2x128xf32> to vector<2x32xf32>
    %150 = vector.extract_strided_slice %146 {offsets = [0, 96], sizes = [2, 32], strides = [1, 1]} : vector<2x128xf32> to vector<2x32xf32>
    %151 = arith.mulf %148, %98 : vector<2x32xf32>
    %152 = arith.mulf %147, %149 : vector<2x32xf32>
    %153 = arith.addf %151, %152 : vector<2x32xf32>
    %154 = math.tanh %153 : vector<2x32xf32>
    %155 = arith.mulf %150, %154 : vector<2x32xf32>
    %156 = arith.negf %139 : vector<2x128xf32>
    %157 = math.exp %156 : vector<2x128xf32>
    %cst_40 = arith.constant 1.000000e+00 : f32
    %158 = vector.broadcast %cst_40 : f32 to vector<2x128xf32>
    %159 = arith.addf %158, %157 : vector<2x128xf32>
    %160 = arith.divf %158, %159 : vector<2x128xf32>
    %161 = math.tanh %139 : vector<2x128xf32>
    %162 = arith.select %13, %161, %160 : vector<2x128xi1>, vector<2x128xf32>
    %163 = vector.extract_strided_slice %162 {offsets = [0, 0], sizes = [2, 32], strides = [1, 1]} : vector<2x128xf32> to vector<2x32xf32>
    %164 = vector.extract_strided_slice %162 {offsets = [0, 32], sizes = [2, 32], strides = [1, 1]} : vector<2x128xf32> to vector<2x32xf32>
    %165 = vector.extract_strided_slice %162 {offsets = [0, 64], sizes = [2, 32], strides = [1, 1]} : vector<2x128xf32> to vector<2x32xf32>
    %166 = vector.extract_strided_slice %162 {offsets = [0, 96], sizes = [2, 32], strides = [1, 1]} : vector<2x128xf32> to vector<2x32xf32>
    %167 = arith.mulf %164, %114 : vector<2x32xf32>
    %168 = arith.mulf %163, %165 : vector<2x32xf32>
    %169 = arith.addf %167, %168 : vector<2x32xf32>
    %170 = math.tanh %169 : vector<2x32xf32>
    %171 = arith.mulf %166, %170 : vector<2x32xf32>
    %172 = arith.index_cast %c2_i32_32 : i32 to index
    %c0_41 = arith.constant 0 : index
    %c0_42 = arith.constant 0 : index
    %173 = vector.load %arg6[%172, %c0_41, %c0_42] : memref<8x2x32xf32, #tpu.memory_space<vmem>>, vector<1x2x32xf32>
    %174 = vector.shape_cast %173 : vector<1x2x32xf32> to vector<2x32xf32>
    %175 = vector.shape_cast %155 : vector<2x32xf32> to vector<1x2x32xf32>
    tpu.vector_store %arg6[%172, %c0_41, %c0_42], %175 {strides = array<i32>} : memref<8x2x32xf32, #tpu.memory_space<vmem>>, vector<1x2x32xf32>,
    %176 = arith.index_cast %125 : i32 to index
    %c0_43 = arith.constant 0 : index
    %c0_44 = arith.constant 0 : index
    %177 = vector.load %arg7[%176, %c0_43, %c0_44] : memref<8x2x32xf32, #tpu.memory_space<vmem>>, vector<1x2x32xf32>
    %178 = vector.shape_cast %177 : vector<1x2x32xf32> to vector<2x32xf32>
    %179 = vector.shape_cast %171 : vector<2x32xf32> to vector<1x2x32xf32>
    tpu.vector_store %arg7[%176, %c0_43, %c0_44], %179 {strides = array<i32>} : memref<8x2x32xf32, #tpu.memory_space<vmem>>, vector<1x2x32xf32>,
    %c3_i32 = arith.constant 3 : i32
    %c7_i32_45 = arith.constant 7 : i32
    %180 = arith.subi %c7_i32_45, %c3_i32 : i32
    %181 = tpu.concatenate %155, %171 in 1 : vector<2x32xf32>, vector<2x32xf32> -> vector<2x64xf32>
    %cst_46 = arith.constant dense<0.000000e+00> : vector<2x256xf32>
    %182 = tpu.matmul %181, %7, %cst_46 {dimension_numbers = #tpu.dot_dimension_numbers<[1], [0], [0], [1], [0, 0, 1, 1], [], []>} : vector<2x64xf32>, vector<64x256xf32>, vector<2x256xf32> -> vector<2x256xf32>
    %c2_i32_47 = arith.constant 2 : i32
    %183 = arith.muli %c3_i32, %c2_i32_47 : i32
    %184 = arith.index_cast %183 : i32 to index
    %c0_48 = arith.constant 0 : index
    %185 = vector.load %arg5[%184, %c0_48] : memref<16x256xf32, #tpu.memory_space<vmem>>, vector<2x256xf32>
    %c2_i32_49 = arith.constant 2 : i32
    %186 = arith.muli %180, %c2_i32_49 : i32
    %187 = arith.index_cast %186 : i32 to index
    %c0_50 = arith.constant 0 : index
    %188 = vector.load %arg5[%187, %c0_50] : memref<16x256xf32, #tpu.memory_space<vmem>>, vector<2x256xf32>
    %189 = vector.extract_strided_slice %182 {offsets = [0, 0], sizes = [2, 128], strides = [1, 1]} : vector<2x256xf32> to vector<2x128xf32>
    %190 = vector.extract_strided_slice %185 {offsets = [0, 0], sizes = [2, 128], strides = [1, 1]} : vector<2x256xf32> to vector<2x128xf32>
    %191 = arith.addf %189, %190 : vector<2x128xf32>
    %192 = vector.extract_strided_slice %182 {offsets = [0, 128], sizes = [2, 128], strides = [1, 1]} : vector<2x256xf32> to vector<2x128xf32>
    %193 = vector.extract_strided_slice %188 {offsets = [0, 128], sizes = [2, 128], strides = [1, 1]} : vector<2x256xf32> to vector<2x128xf32>
    %194 = arith.addf %192, %193 : vector<2x128xf32>
    %195 = arith.negf %191 : vector<2x128xf32>
    %196 = math.exp %195 : vector<2x128xf32>
    %cst_51 = arith.constant 1.000000e+00 : f32
    %197 = vector.broadcast %cst_51 : f32 to vector<2x128xf32>
    %198 = arith.addf %197, %196 : vector<2x128xf32>
    %199 = arith.divf %197, %198 : vector<2x128xf32>
    %200 = math.tanh %191 : vector<2x128xf32>
    %201 = arith.select %13, %200, %199 : vector<2x128xi1>, vector<2x128xf32>
    %202 = vector.extract_strided_slice %201 {offsets = [0, 0], sizes = [2, 32], strides = [1, 1]} : vector<2x128xf32> to vector<2x32xf32>
    %203 = vector.extract_strided_slice %201 {offsets = [0, 32], sizes = [2, 32], strides = [1, 1]} : vector<2x128xf32> to vector<2x32xf32>
    %204 = vector.extract_strided_slice %201 {offsets = [0, 64], sizes = [2, 32], strides = [1, 1]} : vector<2x128xf32> to vector<2x32xf32>
    %205 = vector.extract_strided_slice %201 {offsets = [0, 96], sizes = [2, 32], strides = [1, 1]} : vector<2x128xf32> to vector<2x32xf32>
    %206 = arith.mulf %203, %153 : vector<2x32xf32>
    %207 = arith.mulf %202, %204 : vector<2x32xf32>
    %208 = arith.addf %206, %207 : vector<2x32xf32>
    %209 = math.tanh %208 : vector<2x32xf32>
    %210 = arith.mulf %205, %209 : vector<2x32xf32>
    %211 = arith.negf %194 : vector<2x128xf32>
    %212 = math.exp %211 : vector<2x128xf32>
    %cst_52 = arith.constant 1.000000e+00 : f32
    %213 = vector.broadcast %cst_52 : f32 to vector<2x128xf32>
    %214 = arith.addf %213, %212 : vector<2x128xf32>
    %215 = arith.divf %213, %214 : vector<2x128xf32>
    %216 = math.tanh %194 : vector<2x128xf32>
    %217 = arith.select %13, %216, %215 : vector<2x128xi1>, vector<2x128xf32>
    %218 = vector.extract_strided_slice %217 {offsets = [0, 0], sizes = [2, 32], strides = [1, 1]} : vector<2x128xf32> to vector<2x32xf32>
    %219 = vector.extract_strided_slice %217 {offsets = [0, 32], sizes = [2, 32], strides = [1, 1]} : vector<2x128xf32> to vector<2x32xf32>
    %220 = vector.extract_strided_slice %217 {offsets = [0, 64], sizes = [2, 32], strides = [1, 1]} : vector<2x128xf32> to vector<2x32xf32>
    %221 = vector.extract_strided_slice %217 {offsets = [0, 96], sizes = [2, 32], strides = [1, 1]} : vector<2x128xf32> to vector<2x32xf32>
    %222 = arith.mulf %219, %169 : vector<2x32xf32>
    %223 = arith.mulf %218, %220 : vector<2x32xf32>
    %224 = arith.addf %222, %223 : vector<2x32xf32>
    %225 = math.tanh %224 : vector<2x32xf32>
    %226 = arith.mulf %221, %225 : vector<2x32xf32>
    %227 = arith.index_cast %c3_i32 : i32 to index
    %c0_53 = arith.constant 0 : index
    %c0_54 = arith.constant 0 : index
    %228 = vector.load %arg6[%227, %c0_53, %c0_54] : memref<8x2x32xf32, #tpu.memory_space<vmem>>, vector<1x2x32xf32>
    %229 = vector.shape_cast %228 : vector<1x2x32xf32> to vector<2x32xf32>
    %230 = vector.shape_cast %210 : vector<2x32xf32> to vector<1x2x32xf32>
    tpu.vector_store %arg6[%227, %c0_53, %c0_54], %230 {strides = array<i32>} : memref<8x2x32xf32, #tpu.memory_space<vmem>>, vector<1x2x32xf32>,
    %231 = arith.index_cast %180 : i32 to index
    %c0_55 = arith.constant 0 : index
    %c0_56 = arith.constant 0 : index
    %232 = vector.load %arg7[%231, %c0_55, %c0_56] : memref<8x2x32xf32, #tpu.memory_space<vmem>>, vector<1x2x32xf32>
    %233 = vector.shape_cast %232 : vector<1x2x32xf32> to vector<2x32xf32>
    %234 = vector.shape_cast %226 : vector<2x32xf32> to vector<1x2x32xf32>
    tpu.vector_store %arg7[%231, %c0_55, %c0_56], %234 {strides = array<i32>} : memref<8x2x32xf32, #tpu.memory_space<vmem>>, vector<1x2x32xf32>,
    %c4_i32 = arith.constant 4 : i32
    %c7_i32_57 = arith.constant 7 : i32
    %235 = arith.subi %c7_i32_57, %c4_i32 : i32
    %236 = tpu.concatenate %210, %226 in 1 : vector<2x32xf32>, vector<2x32xf32> -> vector<2x64xf32>
    %cst_58 = arith.constant dense<0.000000e+00> : vector<2x256xf32>
    %237 = tpu.matmul %236, %7, %cst_58 {dimension_numbers = #tpu.dot_dimension_numbers<[1], [0], [0], [1], [0, 0, 1, 1], [], []>} : vector<2x64xf32>, vector<64x256xf32>, vector<2x256xf32> -> vector<2x256xf32>
    %c2_i32_59 = arith.constant 2 : i32
    %238 = arith.muli %c4_i32, %c2_i32_59 : i32
    %239 = arith.index_cast %238 : i32 to index
    %c0_60 = arith.constant 0 : index
    %240 = vector.load %arg5[%239, %c0_60] : memref<16x256xf32, #tpu.memory_space<vmem>>, vector<2x256xf32>
    %c2_i32_61 = arith.constant 2 : i32
    %241 = arith.muli %235, %c2_i32_61 : i32
    %242 = arith.index_cast %241 : i32 to index
    %c0_62 = arith.constant 0 : index
    %243 = vector.load %arg5[%242, %c0_62] : memref<16x256xf32, #tpu.memory_space<vmem>>, vector<2x256xf32>
    %244 = vector.extract_strided_slice %237 {offsets = [0, 0], sizes = [2, 128], strides = [1, 1]} : vector<2x256xf32> to vector<2x128xf32>
    %245 = vector.extract_strided_slice %240 {offsets = [0, 0], sizes = [2, 128], strides = [1, 1]} : vector<2x256xf32> to vector<2x128xf32>
    %246 = arith.addf %244, %245 : vector<2x128xf32>
    %247 = vector.extract_strided_slice %237 {offsets = [0, 128], sizes = [2, 128], strides = [1, 1]} : vector<2x256xf32> to vector<2x128xf32>
    %248 = vector.extract_strided_slice %243 {offsets = [0, 128], sizes = [2, 128], strides = [1, 1]} : vector<2x256xf32> to vector<2x128xf32>
    %249 = arith.addf %247, %248 : vector<2x128xf32>
    %250 = arith.negf %246 : vector<2x128xf32>
    %251 = math.exp %250 : vector<2x128xf32>
    %cst_63 = arith.constant 1.000000e+00 : f32
    %252 = vector.broadcast %cst_63 : f32 to vector<2x128xf32>
    %253 = arith.addf %252, %251 : vector<2x128xf32>
    %254 = arith.divf %252, %253 : vector<2x128xf32>
    %255 = math.tanh %246 : vector<2x128xf32>
    %256 = arith.select %13, %255, %254 : vector<2x128xi1>, vector<2x128xf32>
    %257 = vector.extract_strided_slice %256 {offsets = [0, 0], sizes = [2, 32], strides = [1, 1]} : vector<2x128xf32> to vector<2x32xf32>
    %258 = vector.extract_strided_slice %256 {offsets = [0, 32], sizes = [2, 32], strides = [1, 1]} : vector<2x128xf32> to vector<2x32xf32>
    %259 = vector.extract_strided_slice %256 {offsets = [0, 64], sizes = [2, 32], strides = [1, 1]} : vector<2x128xf32> to vector<2x32xf32>
    %260 = vector.extract_strided_slice %256 {offsets = [0, 96], sizes = [2, 32], strides = [1, 1]} : vector<2x128xf32> to vector<2x32xf32>
    %261 = arith.mulf %258, %208 : vector<2x32xf32>
    %262 = arith.mulf %257, %259 : vector<2x32xf32>
    %263 = arith.addf %261, %262 : vector<2x32xf32>
    %264 = math.tanh %263 : vector<2x32xf32>
    %265 = arith.mulf %260, %264 : vector<2x32xf32>
    %266 = arith.negf %249 : vector<2x128xf32>
    %267 = math.exp %266 : vector<2x128xf32>
    %cst_64 = arith.constant 1.000000e+00 : f32
    %268 = vector.broadcast %cst_64 : f32 to vector<2x128xf32>
    %269 = arith.addf %268, %267 : vector<2x128xf32>
    %270 = arith.divf %268, %269 : vector<2x128xf32>
    %271 = math.tanh %249 : vector<2x128xf32>
    %272 = arith.select %13, %271, %270 : vector<2x128xi1>, vector<2x128xf32>
    %273 = vector.extract_strided_slice %272 {offsets = [0, 0], sizes = [2, 32], strides = [1, 1]} : vector<2x128xf32> to vector<2x32xf32>
    %274 = vector.extract_strided_slice %272 {offsets = [0, 32], sizes = [2, 32], strides = [1, 1]} : vector<2x128xf32> to vector<2x32xf32>
    %275 = vector.extract_strided_slice %272 {offsets = [0, 64], sizes = [2, 32], strides = [1, 1]} : vector<2x128xf32> to vector<2x32xf32>
    %276 = vector.extract_strided_slice %272 {offsets = [0, 96], sizes = [2, 32], strides = [1, 1]} : vector<2x128xf32> to vector<2x32xf32>
    %277 = arith.mulf %274, %224 : vector<2x32xf32>
    %278 = arith.mulf %273, %275 : vector<2x32xf32>
    %279 = arith.addf %277, %278 : vector<2x32xf32>
    %280 = math.tanh %279 : vector<2x32xf32>
    %281 = arith.mulf %276, %280 : vector<2x32xf32>
    %282 = arith.index_cast %c4_i32 : i32 to index
    %c0_65 = arith.constant 0 : index
    %c0_66 = arith.constant 0 : index
    %283 = vector.load %arg6[%282, %c0_65, %c0_66] : memref<8x2x32xf32, #tpu.memory_space<vmem>>, vector<1x2x32xf32>
    %284 = vector.shape_cast %283 : vector<1x2x32xf32> to vector<2x32xf32>
    %285 = vector.shape_cast %265 : vector<2x32xf32> to vector<1x2x32xf32>
    tpu.vector_store %arg6[%282, %c0_65, %c0_66], %285 {strides = array<i32>} : memref<8x2x32xf32, #tpu.memory_space<vmem>>, vector<1x2x32xf32>,
    %286 = arith.index_cast %235 : i32 to index
    %c0_67 = arith.constant 0 : index
    %c0_68 = arith.constant 0 : index
    %287 = vector.load %arg7[%286, %c0_67, %c0_68] : memref<8x2x32xf32, #tpu.memory_space<vmem>>, vector<1x2x32xf32>
    %288 = vector.shape_cast %287 : vector<1x2x32xf32> to vector<2x32xf32>
    %289 = vector.shape_cast %281 : vector<2x32xf32> to vector<1x2x32xf32>
    tpu.vector_store %arg7[%286, %c0_67, %c0_68], %289 {strides = array<i32>} : memref<8x2x32xf32, #tpu.memory_space<vmem>>, vector<1x2x32xf32>,
    %c5_i32 = arith.constant 5 : i32
    %c7_i32_69 = arith.constant 7 : i32
    %290 = arith.subi %c7_i32_69, %c5_i32 : i32
    %291 = tpu.concatenate %265, %281 in 1 : vector<2x32xf32>, vector<2x32xf32> -> vector<2x64xf32>
    %cst_70 = arith.constant dense<0.000000e+00> : vector<2x256xf32>
    %292 = tpu.matmul %291, %7, %cst_70 {dimension_numbers = #tpu.dot_dimension_numbers<[1], [0], [0], [1], [0, 0, 1, 1], [], []>} : vector<2x64xf32>, vector<64x256xf32>, vector<2x256xf32> -> vector<2x256xf32>
    %c2_i32_71 = arith.constant 2 : i32
    %293 = arith.muli %c5_i32, %c2_i32_71 : i32
    %294 = arith.index_cast %293 : i32 to index
    %c0_72 = arith.constant 0 : index
    %295 = vector.load %arg5[%294, %c0_72] : memref<16x256xf32, #tpu.memory_space<vmem>>, vector<2x256xf32>
    %c2_i32_73 = arith.constant 2 : i32
    %296 = arith.muli %290, %c2_i32_73 : i32
    %297 = arith.index_cast %296 : i32 to index
    %c0_74 = arith.constant 0 : index
    %298 = vector.load %arg5[%297, %c0_74] : memref<16x256xf32, #tpu.memory_space<vmem>>, vector<2x256xf32>
    %299 = vector.extract_strided_slice %292 {offsets = [0, 0], sizes = [2, 128], strides = [1, 1]} : vector<2x256xf32> to vector<2x128xf32>
    %300 = vector.extract_strided_slice %295 {offsets = [0, 0], sizes = [2, 128], strides = [1, 1]} : vector<2x256xf32> to vector<2x128xf32>
    %301 = arith.addf %299, %300 : vector<2x128xf32>
    %302 = vector.extract_strided_slice %292 {offsets = [0, 128], sizes = [2, 128], strides = [1, 1]} : vector<2x256xf32> to vector<2x128xf32>
    %303 = vector.extract_strided_slice %298 {offsets = [0, 128], sizes = [2, 128], strides = [1, 1]} : vector<2x256xf32> to vector<2x128xf32>
    %304 = arith.addf %302, %303 : vector<2x128xf32>
    %305 = arith.negf %301 : vector<2x128xf32>
    %306 = math.exp %305 : vector<2x128xf32>
    %cst_75 = arith.constant 1.000000e+00 : f32
    %307 = vector.broadcast %cst_75 : f32 to vector<2x128xf32>
    %308 = arith.addf %307, %306 : vector<2x128xf32>
    %309 = arith.divf %307, %308 : vector<2x128xf32>
    %310 = math.tanh %301 : vector<2x128xf32>
    %311 = arith.select %13, %310, %309 : vector<2x128xi1>, vector<2x128xf32>
    %312 = vector.extract_strided_slice %311 {offsets = [0, 0], sizes = [2, 32], strides = [1, 1]} : vector<2x128xf32> to vector<2x32xf32>
    %313 = vector.extract_strided_slice %311 {offsets = [0, 32], sizes = [2, 32], strides = [1, 1]} : vector<2x128xf32> to vector<2x32xf32>
    %314 = vector.extract_strided_slice %311 {offsets = [0, 64], sizes = [2, 32], strides = [1, 1]} : vector<2x128xf32> to vector<2x32xf32>
    %315 = vector.extract_strided_slice %311 {offsets = [0, 96], sizes = [2, 32], strides = [1, 1]} : vector<2x128xf32> to vector<2x32xf32>
    %316 = arith.mulf %313, %263 : vector<2x32xf32>
    %317 = arith.mulf %312, %314 : vector<2x32xf32>
    %318 = arith.addf %316, %317 : vector<2x32xf32>
    %319 = math.tanh %318 : vector<2x32xf32>
    %320 = arith.mulf %315, %319 : vector<2x32xf32>
    %321 = arith.negf %304 : vector<2x128xf32>
    %322 = math.exp %321 : vector<2x128xf32>
    %cst_76 = arith.constant 1.000000e+00 : f32
    %323 = vector.broadcast %cst_76 : f32 to vector<2x128xf32>
    %324 = arith.addf %323, %322 : vector<2x128xf32>
    %325 = arith.divf %323, %324 : vector<2x128xf32>
    %326 = math.tanh %304 : vector<2x128xf32>
    %327 = arith.select %13, %326, %325 : vector<2x128xi1>, vector<2x128xf32>
    %328 = vector.extract_strided_slice %327 {offsets = [0, 0], sizes = [2, 32], strides = [1, 1]} : vector<2x128xf32> to vector<2x32xf32>
    %329 = vector.extract_strided_slice %327 {offsets = [0, 32], sizes = [2, 32], strides = [1, 1]} : vector<2x128xf32> to vector<2x32xf32>
    %330 = vector.extract_strided_slice %327 {offsets = [0, 64], sizes = [2, 32], strides = [1, 1]} : vector<2x128xf32> to vector<2x32xf32>
    %331 = vector.extract_strided_slice %327 {offsets = [0, 96], sizes = [2, 32], strides = [1, 1]} : vector<2x128xf32> to vector<2x32xf32>
    %332 = arith.mulf %329, %279 : vector<2x32xf32>
    %333 = arith.mulf %328, %330 : vector<2x32xf32>
    %334 = arith.addf %332, %333 : vector<2x32xf32>
    %335 = math.tanh %334 : vector<2x32xf32>
    %336 = arith.mulf %331, %335 : vector<2x32xf32>
    %337 = arith.index_cast %c5_i32 : i32 to index
    %c0_77 = arith.constant 0 : index
    %c0_78 = arith.constant 0 : index
    %338 = vector.load %arg6[%337, %c0_77, %c0_78] : memref<8x2x32xf32, #tpu.memory_space<vmem>>, vector<1x2x32xf32>
    %339 = vector.shape_cast %338 : vector<1x2x32xf32> to vector<2x32xf32>
    %340 = vector.shape_cast %320 : vector<2x32xf32> to vector<1x2x32xf32>
    tpu.vector_store %arg6[%337, %c0_77, %c0_78], %340 {strides = array<i32>} : memref<8x2x32xf32, #tpu.memory_space<vmem>>, vector<1x2x32xf32>,
    %341 = arith.index_cast %290 : i32 to index
    %c0_79 = arith.constant 0 : index
    %c0_80 = arith.constant 0 : index
    %342 = vector.load %arg7[%341, %c0_79, %c0_80] : memref<8x2x32xf32, #tpu.memory_space<vmem>>, vector<1x2x32xf32>
    %343 = vector.shape_cast %342 : vector<1x2x32xf32> to vector<2x32xf32>
    %344 = vector.shape_cast %336 : vector<2x32xf32> to vector<1x2x32xf32>
    tpu.vector_store %arg7[%341, %c0_79, %c0_80], %344 {strides = array<i32>} : memref<8x2x32xf32, #tpu.memory_space<vmem>>, vector<1x2x32xf32>,
    %c6_i32 = arith.constant 6 : i32
    %c7_i32_81 = arith.constant 7 : i32
    %345 = arith.subi %c7_i32_81, %c6_i32 : i32
    %346 = tpu.concatenate %320, %336 in 1 : vector<2x32xf32>, vector<2x32xf32> -> vector<2x64xf32>
    %cst_82 = arith.constant dense<0.000000e+00> : vector<2x256xf32>
    %347 = tpu.matmul %346, %7, %cst_82 {dimension_numbers = #tpu.dot_dimension_numbers<[1], [0], [0], [1], [0, 0, 1, 1], [], []>} : vector<2x64xf32>, vector<64x256xf32>, vector<2x256xf32> -> vector<2x256xf32>
    %c2_i32_83 = arith.constant 2 : i32
    %348 = arith.muli %c6_i32, %c2_i32_83 : i32
    %349 = arith.index_cast %348 : i32 to index
    %c0_84 = arith.constant 0 : index
    %350 = vector.load %arg5[%349, %c0_84] : memref<16x256xf32, #tpu.memory_space<vmem>>, vector<2x256xf32>
    %c2_i32_85 = arith.constant 2 : i32
    %351 = arith.muli %345, %c2_i32_85 : i32
    %352 = arith.index_cast %351 : i32 to index
    %c0_86 = arith.constant 0 : index
    %353 = vector.load %arg5[%352, %c0_86] : memref<16x256xf32, #tpu.memory_space<vmem>>, vector<2x256xf32>
    %354 = vector.extract_strided_slice %347 {offsets = [0, 0], sizes = [2, 128], strides = [1, 1]} : vector<2x256xf32> to vector<2x128xf32>
    %355 = vector.extract_strided_slice %350 {offsets = [0, 0], sizes = [2, 128], strides = [1, 1]} : vector<2x256xf32> to vector<2x128xf32>
    %356 = arith.addf %354, %355 : vector<2x128xf32>
    %357 = vector.extract_strided_slice %347 {offsets = [0, 128], sizes = [2, 128], strides = [1, 1]} : vector<2x256xf32> to vector<2x128xf32>
    %358 = vector.extract_strided_slice %353 {offsets = [0, 128], sizes = [2, 128], strides = [1, 1]} : vector<2x256xf32> to vector<2x128xf32>
    %359 = arith.addf %357, %358 : vector<2x128xf32>
    %360 = arith.negf %356 : vector<2x128xf32>
    %361 = math.exp %360 : vector<2x128xf32>
    %cst_87 = arith.constant 1.000000e+00 : f32
    %362 = vector.broadcast %cst_87 : f32 to vector<2x128xf32>
    %363 = arith.addf %362, %361 : vector<2x128xf32>
    %364 = arith.divf %362, %363 : vector<2x128xf32>
    %365 = math.tanh %356 : vector<2x128xf32>
    %366 = arith.select %13, %365, %364 : vector<2x128xi1>, vector<2x128xf32>
    %367 = vector.extract_strided_slice %366 {offsets = [0, 0], sizes = [2, 32], strides = [1, 1]} : vector<2x128xf32> to vector<2x32xf32>
    %368 = vector.extract_strided_slice %366 {offsets = [0, 32], sizes = [2, 32], strides = [1, 1]} : vector<2x128xf32> to vector<2x32xf32>
    %369 = vector.extract_strided_slice %366 {offsets = [0, 64], sizes = [2, 32], strides = [1, 1]} : vector<2x128xf32> to vector<2x32xf32>
    %370 = vector.extract_strided_slice %366 {offsets = [0, 96], sizes = [2, 32], strides = [1, 1]} : vector<2x128xf32> to vector<2x32xf32>
    %371 = arith.mulf %368, %318 : vector<2x32xf32>
    %372 = arith.mulf %367, %369 : vector<2x32xf32>
    %373 = arith.addf %371, %372 : vector<2x32xf32>
    %374 = math.tanh %373 : vector<2x32xf32>
    %375 = arith.mulf %370, %374 : vector<2x32xf32>
    %376 = arith.negf %359 : vector<2x128xf32>
    %377 = math.exp %376 : vector<2x128xf32>
    %cst_88 = arith.constant 1.000000e+00 : f32
    %378 = vector.broadcast %cst_88 : f32 to vector<2x128xf32>
    %379 = arith.addf %378, %377 : vector<2x128xf32>
    %380 = arith.divf %378, %379 : vector<2x128xf32>
    %381 = math.tanh %359 : vector<2x128xf32>
    %382 = arith.select %13, %381, %380 : vector<2x128xi1>, vector<2x128xf32>
    %383 = vector.extract_strided_slice %382 {offsets = [0, 0], sizes = [2, 32], strides = [1, 1]} : vector<2x128xf32> to vector<2x32xf32>
    %384 = vector.extract_strided_slice %382 {offsets = [0, 32], sizes = [2, 32], strides = [1, 1]} : vector<2x128xf32> to vector<2x32xf32>
    %385 = vector.extract_strided_slice %382 {offsets = [0, 64], sizes = [2, 32], strides = [1, 1]} : vector<2x128xf32> to vector<2x32xf32>
    %386 = vector.extract_strided_slice %382 {offsets = [0, 96], sizes = [2, 32], strides = [1, 1]} : vector<2x128xf32> to vector<2x32xf32>
    %387 = arith.mulf %384, %334 : vector<2x32xf32>
    %388 = arith.mulf %383, %385 : vector<2x32xf32>
    %389 = arith.addf %387, %388 : vector<2x32xf32>
    %390 = math.tanh %389 : vector<2x32xf32>
    %391 = arith.mulf %386, %390 : vector<2x32xf32>
    %392 = arith.index_cast %c6_i32 : i32 to index
    %c0_89 = arith.constant 0 : index
    %c0_90 = arith.constant 0 : index
    %393 = vector.load %arg6[%392, %c0_89, %c0_90] : memref<8x2x32xf32, #tpu.memory_space<vmem>>, vector<1x2x32xf32>
    %394 = vector.shape_cast %393 : vector<1x2x32xf32> to vector<2x32xf32>
    %395 = vector.shape_cast %375 : vector<2x32xf32> to vector<1x2x32xf32>
    tpu.vector_store %arg6[%392, %c0_89, %c0_90], %395 {strides = array<i32>} : memref<8x2x32xf32, #tpu.memory_space<vmem>>, vector<1x2x32xf32>,
    %396 = arith.index_cast %345 : i32 to index
    %c0_91 = arith.constant 0 : index
    %c0_92 = arith.constant 0 : index
    %397 = vector.load %arg7[%396, %c0_91, %c0_92] : memref<8x2x32xf32, #tpu.memory_space<vmem>>, vector<1x2x32xf32>
    %398 = vector.shape_cast %397 : vector<1x2x32xf32> to vector<2x32xf32>
    %399 = vector.shape_cast %391 : vector<2x32xf32> to vector<1x2x32xf32>
    tpu.vector_store %arg7[%396, %c0_91, %c0_92], %399 {strides = array<i32>} : memref<8x2x32xf32, #tpu.memory_space<vmem>>, vector<1x2x32xf32>,
    %c7_i32_93 = arith.constant 7 : i32
    %c7_i32_94 = arith.constant 7 : i32
    %400 = arith.subi %c7_i32_94, %c7_i32_93 : i32
    %401 = tpu.concatenate %375, %391 in 1 : vector<2x32xf32>, vector<2x32xf32> -> vector<2x64xf32>
    %cst_95 = arith.constant dense<0.000000e+00> : vector<2x256xf32>
    %402 = tpu.matmul %401, %7, %cst_95 {dimension_numbers = #tpu.dot_dimension_numbers<[1], [0], [0], [1], [0, 0, 1, 1], [], []>} : vector<2x64xf32>, vector<64x256xf32>, vector<2x256xf32> -> vector<2x256xf32>
    %c2_i32_96 = arith.constant 2 : i32
    %403 = arith.muli %c7_i32_93, %c2_i32_96 : i32
    %404 = arith.index_cast %403 : i32 to index
    %c0_97 = arith.constant 0 : index
    %405 = vector.load %arg5[%404, %c0_97] : memref<16x256xf32, #tpu.memory_space<vmem>>, vector<2x256xf32>
    %c2_i32_98 = arith.constant 2 : i32
    %406 = arith.muli %400, %c2_i32_98 : i32
    %407 = arith.index_cast %406 : i32 to index
    %c0_99 = arith.constant 0 : index
    %408 = vector.load %arg5[%407, %c0_99] : memref<16x256xf32, #tpu.memory_space<vmem>>, vector<2x256xf32>
    %409 = vector.extract_strided_slice %402 {offsets = [0, 0], sizes = [2, 128], strides = [1, 1]} : vector<2x256xf32> to vector<2x128xf32>
    %410 = vector.extract_strided_slice %405 {offsets = [0, 0], sizes = [2, 128], strides = [1, 1]} : vector<2x256xf32> to vector<2x128xf32>
    %411 = arith.addf %409, %410 : vector<2x128xf32>
    %412 = vector.extract_strided_slice %402 {offsets = [0, 128], sizes = [2, 128], strides = [1, 1]} : vector<2x256xf32> to vector<2x128xf32>
    %413 = vector.extract_strided_slice %408 {offsets = [0, 128], sizes = [2, 128], strides = [1, 1]} : vector<2x256xf32> to vector<2x128xf32>
    %414 = arith.addf %412, %413 : vector<2x128xf32>
    %415 = arith.negf %411 : vector<2x128xf32>
    %416 = math.exp %415 : vector<2x128xf32>
    %cst_100 = arith.constant 1.000000e+00 : f32
    %417 = vector.broadcast %cst_100 : f32 to vector<2x128xf32>
    %418 = arith.addf %417, %416 : vector<2x128xf32>
    %419 = arith.divf %417, %418 : vector<2x128xf32>
    %420 = math.tanh %411 : vector<2x128xf32>
    %421 = arith.select %13, %420, %419 : vector<2x128xi1>, vector<2x128xf32>
    %422 = vector.extract_strided_slice %421 {offsets = [0, 0], sizes = [2, 32], strides = [1, 1]} : vector<2x128xf32> to vector<2x32xf32>
    %423 = vector.extract_strided_slice %421 {offsets = [0, 32], sizes = [2, 32], strides = [1, 1]} : vector<2x128xf32> to vector<2x32xf32>
    %424 = vector.extract_strided_slice %421 {offsets = [0, 64], sizes = [2, 32], strides = [1, 1]} : vector<2x128xf32> to vector<2x32xf32>
    %425 = vector.extract_strided_slice %421 {offsets = [0, 96], sizes = [2, 32], strides = [1, 1]} : vector<2x128xf32> to vector<2x32xf32>
    %426 = arith.mulf %423, %373 : vector<2x32xf32>
    %427 = arith.mulf %422, %424 : vector<2x32xf32>
    %428 = arith.addf %426, %427 : vector<2x32xf32>
    %429 = math.tanh %428 : vector<2x32xf32>
    %430 = arith.mulf %425, %429 : vector<2x32xf32>
    %431 = arith.negf %414 : vector<2x128xf32>
    %432 = math.exp %431 : vector<2x128xf32>
    %cst_101 = arith.constant 1.000000e+00 : f32
    %433 = vector.broadcast %cst_101 : f32 to vector<2x128xf32>
    %434 = arith.addf %433, %432 : vector<2x128xf32>
    %435 = arith.divf %433, %434 : vector<2x128xf32>
    %436 = math.tanh %414 : vector<2x128xf32>
    %437 = arith.select %13, %436, %435 : vector<2x128xi1>, vector<2x128xf32>
    %438 = vector.extract_strided_slice %437 {offsets = [0, 0], sizes = [2, 32], strides = [1, 1]} : vector<2x128xf32> to vector<2x32xf32>
    %439 = vector.extract_strided_slice %437 {offsets = [0, 32], sizes = [2, 32], strides = [1, 1]} : vector<2x128xf32> to vector<2x32xf32>
    %440 = vector.extract_strided_slice %437 {offsets = [0, 64], sizes = [2, 32], strides = [1, 1]} : vector<2x128xf32> to vector<2x32xf32>
    %441 = vector.extract_strided_slice %437 {offsets = [0, 96], sizes = [2, 32], strides = [1, 1]} : vector<2x128xf32> to vector<2x32xf32>
    %442 = arith.mulf %439, %389 : vector<2x32xf32>
    %443 = arith.mulf %438, %440 : vector<2x32xf32>
    %444 = arith.addf %442, %443 : vector<2x32xf32>
    %445 = math.tanh %444 : vector<2x32xf32>
    %446 = arith.mulf %441, %445 : vector<2x32xf32>
    %447 = arith.index_cast %c7_i32_93 : i32 to index
    %c0_102 = arith.constant 0 : index
    %c0_103 = arith.constant 0 : index
    %448 = vector.load %arg6[%447, %c0_102, %c0_103] : memref<8x2x32xf32, #tpu.memory_space<vmem>>, vector<1x2x32xf32>
    %449 = vector.shape_cast %448 : vector<1x2x32xf32> to vector<2x32xf32>
    %450 = vector.shape_cast %430 : vector<2x32xf32> to vector<1x2x32xf32>
    tpu.vector_store %arg6[%447, %c0_102, %c0_103], %450 {strides = array<i32>} : memref<8x2x32xf32, #tpu.memory_space<vmem>>, vector<1x2x32xf32>,
    %451 = arith.index_cast %400 : i32 to index
    %c0_104 = arith.constant 0 : index
    %c0_105 = arith.constant 0 : index
    %452 = vector.load %arg7[%451, %c0_104, %c0_105] : memref<8x2x32xf32, #tpu.memory_space<vmem>>, vector<1x2x32xf32>
    %453 = vector.shape_cast %452 : vector<1x2x32xf32> to vector<2x32xf32>
    %454 = vector.shape_cast %446 : vector<2x32xf32> to vector<1x2x32xf32>
    tpu.vector_store %arg7[%451, %c0_104, %c0_105], %454 {strides = array<i32>} : memref<8x2x32xf32, #tpu.memory_space<vmem>>, vector<1x2x32xf32>,
    %c8_i32 = arith.constant 8 : i32
    %c0_106 = arith.constant 0 : index
    %c0_107 = arith.constant 0 : index
    %c0_108 = arith.constant 0 : index
    %455 = vector.load %arg6[%c0_106, %c0_107, %c0_108] : memref<8x2x32xf32, #tpu.memory_space<vmem>>, vector<8x2x32xf32>
    %c0_109 = arith.constant 0 : index
    %c0_110 = arith.constant 0 : index
    %c0_111 = arith.constant 0 : index
    %456 = vector.load %arg7[%c0_109, %c0_110, %c0_111] : memref<8x2x32xf32, #tpu.memory_space<vmem>>, vector<8x2x32xf32>
    %457 = tpu.concatenate %455, %456 in 2 : vector<8x2x32xf32>, vector<8x2x32xf32> -> vector<8x2x64xf32>
    %c0_112 = arith.constant 0 : index
    %c0_113 = arith.constant 0 : index
    %c0_114 = arith.constant 0 : index
    %458 = vector.load %arg4[%c0_112, %c0_113, %c0_114] : memref<8x2x64xf32, #tpu.memory_space<vmem>>, vector<8x2x64xf32>
    tpu.vector_store %arg4[%c0_112, %c0_113, %c0_114], %457 {strides = array<i32>} : memref<8x2x64xf32, #tpu.memory_space<vmem>>, vector<8x2x64xf32>,
    return
  }
}

</mosaic_0001>

<bundles_post_ra>
// kernel: encoder_forward.2
= control target key start
LH: loop header
LB: loop body
LE: loop exit
PB: predicated region body
PF: predicated region fallthrough
CT: control target
= control target key end

     0   :  { %9 = vsyncpa [#allocation6], 0  ;;  %s2158_s0 = inlined_call_operand.vmem [shape: f32[16,32], index: 0, kind: input, shape index: {}]   ;;  %s2159_s1 = inlined_call_operand.hbm [shape: f32[32,256], index: 1, kind: input, shape index: {}]   ;;  %s2160_s2 = inlined_call_operand.hbm [shape: f32[64,256], index: 2, kind: input, shape index: {}]   ;;  %s2161_s3 = inlined_call_operand.vmem [shape: f32[1,256], index: 3, kind: input, shape index: {}]   ;;  %s2162_s4 = inlined_call_operand.vmem [shape: f32[8,2,64], index: 4, kind: output, shape index: {}]  }
   0x1   :  { %10 = vsyncpa [#allocation8], 0  ;;  %s1775_s15 = smov [#allocation5]   ;;  %s1727_s19 = scalar_lea.hbm %s2159_s1, 1024 }
   0x2   :  { %s18_s16 = sshll.u32 %s1775_s15, 4  ;;  %p1728_p0 = scmp.ne.s32.totalorder %s2159_s1, %s1727_s19  ;;  %s19_s16 = int_to_ptr.vmem [resolvable:$true] %s18_s16 }
   0x3   :  { %p1731_p1 = scmp.lt.u32.totalorder %s1727_s19, %s2159_s1 }
   0x5   :  { %p1733_p2 = pnand %p1731_p1, %p1728_p0 }
   0x7   :  { %1736 = shalt.err (!%p1733_p2)
}
   0x8   :  { %s1737_s24 = scalar_lea.vmem %s19_s16, 1024  ;;  %p1742_p4 = scmp.lt.s32.totalorder %s19_s16, %s19_s16 }
   0x9   :  { %p1738_p3 = scmp.ne.s32.totalorder %s19_s16, %s1737_s24  ;;  %p1743_p5 = scmp.lt.s32.totalorder %s1737_s24, %s1737_s24 }
   0xb   :  { %p1744_p6 = por %p1743_p5, %p1742_p4 }
   0xd   :  { %p1745_p7 = pnand %p1744_p6, %p1738_p3 }
   0xf   :  { %1748 = shalt.err (!%p1745_p7)
}
  0x10   :  { %s1776_s25 = smov 256   ;;  %s1777_s26 = smov 16  }
  0x11   :  { %24 = dma.hbm_to_vmem [thread:$0]  %s2159_s1, 1024, %s19_s16, [#allocation6], %s1776_s25, %s1776_s25, %s1777_s26  }
  0x12   :  { %s1778_s29 = smov [#allocation7]   ;;  %s1749_s7 = scalar_lea.hbm %s2160_s2, 2048 }
  0x13   :  { %s30_s30 = sshll.u32 %s1778_s29, 4  ;;  %p1750_p8 = scmp.ne.s32.totalorder %s2160_s2, %s1749_s7  ;;  %s31_s30 = int_to_ptr.vmem [resolvable:$true] %s30_s30 }
  0x14   :  { %p1753_p9 = scmp.lt.u32.totalorder %s1749_s7, %s2160_s2 }
  0x16   :  { %p1755_p10 = pnand %p1753_p9, %p1750_p8 }
  0x18   :  { %1758 = shalt.err (!%p1755_p10)
}
  0x19   :  { %s1759_s12 = scalar_lea.vmem %s31_s30, 2048  ;;  %p1764_p12 = scmp.lt.s32.totalorder %s31_s30, %s31_s30 }
  0x1a   :  { %p1760_p11 = scmp.ne.s32.totalorder %s31_s30, %s1759_s12  ;;  %p1765_p13 = scmp.lt.s32.totalorder %s1759_s12, %s1759_s12 }
  0x1c   :  { %p1766_p0 = por %p1765_p13, %p1764_p12 }
  0x1e   :  { %p1767_p1 = pnand %p1766_p0, %p1760_p11 }
  0x20   :  { %1770 = shalt.err (!%p1767_p1)
}
  0x21   :  { %36 = dma.hbm_to_vmem [thread:$0]  %s2160_s2, 2048, %s31_s30, [#allocation8], %s1776_s25, %s1776_s25, %s1777_s26  }
  0x22   :  { %1771 = dma.done.wait [#allocation6], 1024  }
  0x23   :  { %1772 = vsyncadd [#allocation6], 4294966272 }
  0x24   :  { %1773 = dma.done.wait [#allocation8], 2048  }
  0x25   :  { %1774 = vsyncadd [#allocation8], 4294965248  ;;  %v1779_v0 = vmov 0.0   ;;  %v48_v1 = vld [vmem:[#allocation5 + $0x8] sm:$0xff]  ;;  %v50_v2 = vld [vmem:[#allocation5 + $0x18] sm:$0xff]  ;;  %vm67_vm0 = vcmask 261120   ;;  %v57_v39 = vlaneseq }
  0x26   :  { %138 = vmatprep.mubr.f32.mxu0 %v1779_v0  ;;  %244 = vmatprep.mubr.f32.mxu1 %v1779_v0  ;;  %v47_v3 = vld [vmem:[#allocation5] sm:$0xff]  ;;  %v1456_v4 = vpack.c.bf16 %v50_v2, %v48_v1  ;;  %v49_v5 = vld [vmem:[#allocation5 + $0x10] sm:$0xff]  ;;  %v156_v6 = vld [vmem:[#allocation7 + $0x8] sm:$0xff]  ;;  %s1781_s18 = smov 32   ;;  %vm312_vm4 = vcmask 254976   ;;  %vm176_vm5 = vcmask 523264  }
  0x27   :  { %v158_v7 = vld [vmem:[#allocation7 + $0x18] sm:$0xff]  ;;  %v1458_v8 = vpack.c.bf16 %v49_v5, %v47_v3  ;;  %v155_v10 = vld [vmem:[#allocation7] sm:$0xff]  ;;  %v157_v11 = vld [vmem:[#allocation7 + $0x10] sm:$0xff]  ;;  %v58_v40 = vshrl.u32 %v57_v39, 7  ;;  %v172_v2 = vand.u32 127, %v57_v39  ;;  %vm1416_vm6 = vcmask 517120  }
  0x28   :  { %v1833_v9 = vpack.c.bf16 %v158_v7, %v156_v6  ;;  %v52_v12 = vld [vmem:[#allocation5 + $0x28] sm:$0xff]  ;;  %1457 = vmatprep.subr.bf16.mxu0 %v1456_v4  ;;  %v1835_v13 = vpack.c.bf16 %v157_v11, %v155_v10  ;;  %v54_v14 = vld [vmem:[#allocation5 + $0x38] sm:$0xff]  ;;  %v51_v15 = vld [vmem:[#allocation5 + $0x20] sm:$0xff] }
  0x29   :  { %v53_v16 = vld [vmem:[#allocation5 + $0x30] sm:$0xff]  ;;  %1459 = vmatpush1.bf16.msra.mxu0 %v1458_v8  ;;  %v1460_v17 = vpack.c.bf16 %v54_v14, %v52_v12  ;;  %v160_v19 = vld [vmem:[#allocation7 + $0x28] sm:$0xff]  ;;  %v162_v20 = vld [vmem:[#allocation7 + $0x38] sm:$0xff]  ;;  %v59_v41 = vsub.s32 0, %v58_v40  ;;  %v63_v43 = vsub.s32 1, %v58_v40  ;;  %vm173_vm1 = vcmp.ge.s32.totalorder %v172_v2, 64 }
  0x2a   :  { %1465 = vmatprep.subr.bf16.mxu1 %v1833_v9  ;;  %v1462_v18 = vpack.c.bf16 %v53_v16, %v51_v15  ;;  %v159_v21 = vld [vmem:[#allocation7 + $0x20] sm:$0xff]  ;;  %v1839_v22 = vpack.c.bf16 %v162_v20, %v160_v19  ;;  %v161_v23 = vld [vmem:[#allocation7 + $0x30] sm:$0xff]  ;;  %v164_v24 = vld [vmem:[#allocation7 + $0x48] sm:$0xff]  ;;  %vm174_vm2 = vcmp.lt.s32.totalorder %v172_v2, 96 }
  0x2b   :  { %1467 = vmatpush1.bf16.msra.mxu1 %v1835_v13  ;;  %1461 = vmatprep.subr.bf16.mxu0 %v1460_v17  ;;  %v1841_v25 = vpack.c.bf16 %v161_v23, %v159_v21  ;;  %v166_v26 = vld [vmem:[#allocation7 + $0x58] sm:$0xff]  ;;  %v163_v27 = vld [vmem:[#allocation7 + $0x40] sm:$0xff]  ;;  %v165_v28 = vld [vmem:[#allocation7 + $0x50] sm:$0xff] }
  0x2c   :  { %1469 = vmatprep.subr.bf16.mxu1 %v1839_v22  ;;  %v1844_v29 = vpack.c.bf16 %v166_v26, %v164_v24  ;;  %v168_v30 = vld [vmem:[#allocation7 + $0x68] sm:$0xff]  ;;  %v170_v31 = vld [vmem:[#allocation7 + $0x78] sm:$0xff]  ;;  %v45_v32 = vld [vmem:[%s2158_s0] sm:$0xff]  ;;  %v1850_v33 = vpack.c.bf16 %v165_v28, %v163_v27 }
  0x2d   :  { %1463 = vmatpush1.bf16.msra.mxu0 %v1462_v18  ;;  %v1854_v34 = vpack.c.bf16 %v170_v31, %v168_v30  ;;  %v167_v35 = vld [vmem:[#allocation7 + $0x60] sm:$0xff]  ;;  %v169_v36 = vld [vmem:[#allocation7 + $0x70] sm:$0xff]  ;;  %v46_v37 = vld [vmem:[%s2158_s0 + $0x8] sm:$0xff] }
  0x2e   :  { %1481 = vmatprep.subr.bf16.mxu0 %v1833_v9  ;;  %v1863_v38 = vpack.c.bf16 %v169_v36, %v167_v35  ;;  %v55_v42 = vld [vmem:[%s2161_s3] sm:$0x3]  ;;  %vm1890_vm3 = vmand %vm173_vm1, %vm174_vm2  ;;  %s1780_s3 = smov 64  }
  0x2f   :  { %1471 = vmatpush1.bf16.msra.mxu1 %v1841_v25  ;;  %v60_v44 = vrot.slane %v55_v42, %v59_v41  ;;  %v64_v45 = vrot.slane %v55_v42, %v63_v43 }
  0x30   :  { %1473 = vmatprep.subr.bf16.mxu1 %v1844_v29  ;;  %1431 = vmatmul.mubr.msk.f32.vlgmr.msra.gmra.mrb[0].mxu0 %vm67_vm0, %v45_v32 }
  0x31   :  { %144 = vmatprep.mubr.f32.mxu0 %v1779_v0  ;;  %1483 = vmatpush1.bf16.msra.mxu0 %v1835_v13 }
  0x32   :  { %1485 = vmatprep.subr.bf16.mxu0 %v1839_v22 }
  0x33   :  { %1475 = vmatpush1.bf16.msra.mxu1 %v1850_v33 }
  0x34   :  { %1477 = vmatprep.subr.bf16.mxu1 %v1854_v34  ;;  %1432 = vmatmul.mubr.msk.f32.gmra.mrb[2].mxu0 %vm67_vm0, %v46_v37 }
  0x35   :  { %1487 = vmatpush1.bf16.msra.mxu0 %v1841_v25  ;;  %391 = vmatprep.mubr.f32.mxu0 %v1779_v0 }
  0x36   :  { %1489 = vmatprep.subr.bf16.mxu0 %v1844_v29 }
  0x37   :  { %1479 = vmatpush1.bf16.msra.mxu1 %v1863_v38 }
  0x38   :  { %1497 = vmatprep.subr.bf16.mxu1 %v1833_v9 }
  0x39   :  { %1491 = vmatpush1.bf16.msra.mxu0 %v1850_v33 }
  0x3a   :  { %245 = vmatmul.mubr.f32.vlgmr.msra.gmra.mrb[0].mxu1 %v1779_v0  ;;  %1493 = vmatprep.subr.bf16.mxu0 %v1854_v34 }
  0x3b   :  { %1499 = vmatpush1.bf16.msra.mxu1 %v1835_v13  ;;  %541 = vmatprep.mubr.f32.mxu1 %v1779_v0 }
  0x3c   :  { %1501 = vmatprep.subr.bf16.mxu1 %v1839_v22 }
  0x3d   :  { %1495 = vmatpush1.bf16.msra.mxu0 %v1863_v38 }
  0x3e   :  { %1513 = vmatprep.subr.bf16.mxu0 %v1833_v9 }
  0x3f   :  { %1503 = vmatpush1.bf16.msra.mxu1 %v1841_v25 }
  0x40   :  { %1505 = vmatprep.subr.bf16.mxu1 %v1844_v29 }
  0x43   :  { %1507 = vmatpush1.bf16.msra.mxu1 %v1850_v33 }
  0x44   :  { %1509 = vmatprep.subr.bf16.mxu1 %v1854_v34 }
  0x47   :  { %1511 = vmatpush1.bf16.msra.mxu1 %v1863_v38 }
  0x48   :  { %1529 = vmatprep.subr.bf16.mxu1 %v1833_v9 }
 0x103   :  { %v140_v46 = vpop.f32.mrb[0].mxu0 }
 0x104   :  { %v141_v47 = vadd.f32 %v140_v46, %v60_v44  ;;  %v142_v48 = vpop.f32.mrb[1].mxu0 }
 0x105   :  { %v143_v49 = vadd.f32 %v142_v48, %v64_v45 }
 0x106   :  { %151 = vst [vmem:[#allocation2] sm:$0xff] %v141_v47 }
 0x107   :  { %152 = vst [vmem:[#allocation2 + $0x8] sm:$0xff] %v143_v49  ;;  %v146_v50 = vpop.f32.mrb[2].mxu0 }
 0x108   :  { %v147_v51 = vadd.f32 %v146_v50, %v60_v44  ;;  %v148_v52 = vpop.f32.mrb[3].mxu0 }
 0x109   :  { %v149_v53 = vadd.f32 %v148_v52, %v64_v45 }
 0x10a   :  { %153 = vst [vmem:[#allocation2 + $0x10] sm:$0xff] %v147_v51 }
 0x10b   :  { %154 = vst [vmem:[#allocation2 + $0x18] sm:$0xff] %v149_v53 }
 0x10d   :  { %v246_v54 = vpop.f32.mrb[0].mxu1  ;;  %v251_v55 = vld [vmem:[#allocation2] sm:$0x3]  ;;  %v398_v39 = vld [vmem:[#allocation2] sm:$0xc] }
 0x10e   :  { %v248_v56 = vpop.f32.mrb[1].mxu1  ;;  %v253_v57 = vadd.f32 %v251_v55, %v246_v54  ;;  %v401_v41 = vrot.slane %v398_v39, 2 }
 0x110   :  { %v1433_v58 = vmul.f32 -1.442695, %v253_v57 }
 0x112   :  { %1599 = vpow2.f32 %v1433_v58  ;;  %v252_v59 = vld [vmem:[#allocation2 + $0x18] sm:$0xc0]  ;;  %v399_v40 = vld [vmem:[#allocation2 + $0x18] sm:$0x30] }
 0x113   :  { %v255_v60 = vrot.slane %v252_v59, 6  ;;  %v405_v43 = vrot.slane %v399_v40, 4 }
 0x115   :  { %v257_v61 = vadd.f32 %v255_v60, %v248_v56 }
 0x117   :  { %v1434_v62 = vmul.f32 -1.442695, %v257_v61 }
 0x119   :  { %1601 = vpow2.f32 %v1434_v62 }
 0x11a   :  { %1603 = vtanh.f32 %v253_v57 }
 0x11c   :  { %v1600_v63 = vpop.eup %1599 }
 0x11d   :  { %v261_v1 = vadd.f32 1.0, %v1600_v63 }
 0x11f   :  { %1605 = vrcp.f32 %v261_v1 }
 0x120   :  { %1607 = vtanh.f32 %v257_v61 }
 0x123   :  { %v1602_v3 = vpop.eup %1601 }
 0x124   :  { %v286_v4 = vadd.f32 1.0, %v1602_v3  ;;  %v1604_v6 = vpop.eup %1603 }
 0x126   :  { %1609 = vrcp.f32 %v286_v4 }
 0x129   :  { %v1606_v7 = vpop.eup %1605 }
 0x12a   :  { %v265_v8 = vsel %vm1890_vm3, %v1604_v6, %v1606_v7  ;;  %v1608_v10 = vpop.eup %1607 }
 0x12b   :  { %268 = vrot.lane.b32.xlu0 %v265_v8, %s1780_s3  ;;  %v266_v18 = vmul.f32 0.0, %v265_v8 }
 0x130   :  { %v1610_v11 = vpop.eup %1609 }
 0x131   :  { %v290_v12 = vsel %vm1890_vm3, %v1608_v10, %v1610_v11 }
 0x132   :  { %293 = vrot.lane.b32.xlu0 %v290_v12, %s1780_s3  ;;  %v291_v21 = vmul.f32 0.0, %v290_v12 }
 0x19d   :  { %v269_v14 = vpop.permute.xlu0 %268 }
 0x19e   :  { %v271_v15 = vmul.f32 %v269_v14, %v265_v8 }
 0x1a0   :  { %273 = vrot.lane.b32.xlu1 %v271_v15, %s1781_s18 }
 0x1a4   :  { %v294_v16 = vpop.permute.xlu0 %293 }
 0x1a5   :  { %v296_v17 = vmul.f32 %v294_v16, %v290_v12 }
 0x1a7   :  { %298 = vrot.lane.b32.xlu1 %v296_v17, %s1781_s18 }
 0x212   :  { %v274_v19 = vpop.permute.xlu1 %273 }
 0x213   :  { %v1902_v20 = vadd.f32 %v274_v19, %v266_v18  ;;  %v548_v18 = vld [vmem:[#allocation2] sm:$0x30]  ;;  %v549_v19 = vld [vmem:[#allocation2 + $0x18] sm:$0xc] }
 0x215   :  { %1611 = vtanh.f32 %v1902_v20 }
 0x219   :  { %v299_v23 = vpop.permute.xlu1 %298 }
 0x21a   :  { %v1905_v24 = vadd.f32 %v299_v23, %v291_v21  ;;  %v555_v23 = vrot.slane %v549_v19, 2 }
 0x21c   :  { %1613 = vtanh.f32 %v1905_v24 }
 0x21f   :  { %v1612_v26 = vpop.eup %1611 }
 0x220   :  { %279 = vrot.lane.b32.xlu0 %v1612_v26, %s1780_s3 }
 0x226   :  { %v1614_v27 = vpop.eup %1613 }
 0x227   :  { %304 = vrot.lane.b32.xlu1 %v1614_v27, %s1780_s3 }
 0x292   :  { %v280_v28 = vpop.permute.xlu0 %279 }
 0x293   :  { %v282_v30 = vmul.f32 %v280_v28, %v265_v8 }
 0x295   :  { %309 = vrot.lane.b32.xlu0 %v282_v30, %s1781_s18 }
 0x299   :  { %v305_v31 = vpop.permute.xlu1 %304 }
 0x29a   :  { %v1911_v32 = vmul.f32 %v305_v31, %v290_v12 }
 0x29c   :  { %320 = vrot.lane.b32.xlu1 %v1911_v32, %s1780_s3 }
 0x307   :  { %v310_v35 = vpop.permute.xlu0 %309 }
 0x308   :  { %313 = vst.msk [vmem:[#allocation3] sm:$0x3] %vm312_vm4, %v310_v35 }
 0x30e   :  { %v321_v36 = vpop.permute.xlu1 %320 }
 0x30f   :  { %v323_v37 = vsel %vm67_vm0, %v310_v35, %v321_v36 }
 0x310   :  { %1435 = vmatmul.mubr.msk.f32.vlgmr.msra.gmra.mrb[4].mxu0 %vm176_vm5, %v323_v37 }
 0x311   :  { %1515 = vmatpush1.bf16.msra.mxu0 %v1835_v13  ;;  %691 = vmatprep.mubr.f32.mxu0 %v1779_v0 }
 0x312   :  { %1517 = vmatprep.subr.bf16.mxu0 %v1839_v22 }
 0x315   :  { %1519 = vmatpush1.bf16.msra.mxu0 %v1841_v25 }
 0x316   :  { %1521 = vmatprep.subr.bf16.mxu0 %v1844_v29 }
 0x319   :  { %1523 = vmatpush1.bf16.msra.mxu0 %v1850_v33 }
 0x31a   :  { %1525 = vmatprep.subr.bf16.mxu0 %v1854_v34 }
 0x31d   :  { %1527 = vmatpush1.bf16.msra.mxu0 %v1863_v38 }
 0x31e   :  { %1545 = vmatprep.subr.bf16.mxu0 %v1833_v9 }
 0x3e3   :  { %v393_v42 = vpop.f32.mrb[4].mxu0 }
 0x3e4   :  { %v403_v44 = vadd.f32 %v401_v41, %v393_v42  ;;  %v395_v45 = vpop.f32.mrb[5].mxu0 }
 0x3e5   :  { %v407_v46 = vadd.f32 %v405_v43, %v395_v45 }
 0x3e6   :  { %v1436_v47 = vmul.f32 -1.442695, %v403_v44 }
 0x3e7   :  { %v1437_v48 = vmul.f32 -1.442695, %v407_v46 }
 0x3e8   :  { %1615 = vpow2.f32 %v1436_v47 }
 0x3e9   :  { %1617 = vpow2.f32 %v1437_v48 }
 0x3ea   :  { %1619 = vtanh.f32 %v403_v44 }
 0x3eb   :  { %1621 = vtanh.f32 %v407_v46 }
 0x3f2   :  { %v1616_v49 = vpop.eup %1615 }
 0x3f3   :  { %v1618_v50 = vpop.eup %1617  ;;  %v411_v51 = vadd.f32 1.0, %v1616_v49 }
 0x3f4   :  { %v436_v52 = vadd.f32 1.0, %v1618_v50  ;;  %v1620_v53 = vpop.eup %1619 }
 0x3f5   :  { %1623 = vrcp.f32 %v411_v51  ;;  %v1622_v54 = vpop.eup %1621 }
 0x3f6   :  { %1625 = vrcp.f32 %v436_v52 }
 0x3ff   :  { %v1624_v55 = vpop.eup %1623 }
 0x400   :  { %v1626_v56 = vpop.eup %1625  ;;  %v415_v57 = vsel %vm1890_vm3, %v1620_v53, %v1624_v55 }
 0x401   :  { %418 = vrot.lane.b32.xlu0 %v415_v57, %s1780_s3  ;;  %v440_v58 = vsel %vm1890_vm3, %v1622_v54, %v1626_v56  ;;  %v416_v63 = vmul.f32 %v415_v57, %v1902_v20  ;;  %v551_v20 = vrot.slane %v548_v18, 4 }
 0x402   :  { %443 = vrot.lane.b32.xlu1 %v440_v58, %s1780_s3  ;;  %v441_v2 = vmul.f32 %v440_v58, %v1905_v24 }
 0x473   :  { %v419_v59 = vpop.permute.xlu0 %418 }
 0x474   :  { %v421_v60 = vmul.f32 %v419_v59, %v415_v57  ;;  %v444_v61 = vpop.permute.xlu1 %443 }
 0x475   :  { %v446_v62 = vmul.f32 %v444_v61, %v440_v58 }
 0x476   :  { %423 = vrot.lane.b32.xlu0 %v421_v60, %s1781_s18 }
 0x477   :  { %448 = vrot.lane.b32.xlu1 %v446_v62, %s1781_s18 }
 0x4e8   :  { %v424_v1 = vpop.permute.xlu0 %423 }
 0x4e9   :  { %v1937_v3 = vadd.f32 %v424_v1, %v416_v63  ;;  %v449_v4 = vpop.permute.xlu1 %448  ;;  %v698_v1 = vld [vmem:[#allocation2] sm:$0xc0] }
 0x4ea   :  { %v1939_v6 = vadd.f32 %v449_v4, %v441_v2  ;;  %v701_v2 = vrot.slane %v698_v1, 6 }
 0x4eb   :  { %1627 = vtanh.f32 %v1937_v3 }
 0x4ec   :  { %1629 = vtanh.f32 %v1939_v6 }
 0x4f5   :  { %v1628_v7 = vpop.eup %1627 }
 0x4f6   :  { %v1630_v8 = vpop.eup %1629  ;;  %429 = vrot.lane.b32.xlu0 %v1628_v7, %s1780_s3  ;;  %v699_v7 = vld [vmem:[#allocation2 + $0x18] sm:$0x3] }
 0x4f7   :  { %454 = vrot.lane.b32.xlu1 %v1630_v8, %s1780_s3 }
 0x568   :  { %v430_v10 = vpop.permute.xlu0 %429 }
 0x569   :  { %v432_v11 = vmul.f32 %v430_v10, %v415_v57  ;;  %v455_v12 = vpop.permute.xlu1 %454 }
 0x56a   :  { %v1945_v14 = vmul.f32 %v455_v12, %v440_v58 }
 0x56b   :  { %459 = vrot.lane.b32.xlu0 %v432_v11, %s1781_s18 }
 0x56c   :  { %470 = vrot.lane.b32.xlu1 %v1945_v14, %s1780_s3 }
 0x5dd   :  { %v460_v15 = vpop.permute.xlu0 %459 }
 0x5de   :  { %463 = vst.msk [vmem:[#allocation3 + $0x2] sm:$0x3] %vm312_vm4, %v460_v15  ;;  %v471_v16 = vpop.permute.xlu1 %470 }
 0x5df   :  { %v473_v17 = vsel %vm67_vm0, %v460_v15, %v471_v16 }
 0x5e0   :  { %1438 = vmatmul.mubr.msk.f32.vlgmr.msra.gmra.mrb[2].mxu1 %vm176_vm5, %v473_v17 }
 0x5e1   :  { %1531 = vmatpush1.bf16.msra.mxu1 %v1835_v13  ;;  %838 = vmatprep.mubr.f32.mxu1 %v1779_v0 }
 0x5e2   :  { %1533 = vmatprep.subr.bf16.mxu1 %v1839_v22 }
 0x5e5   :  { %1535 = vmatpush1.bf16.msra.mxu1 %v1841_v25 }
 0x5e6   :  { %1537 = vmatprep.subr.bf16.mxu1 %v1844_v29 }
 0x5e9   :  { %1539 = vmatpush1.bf16.msra.mxu1 %v1850_v33 }
 0x5ea   :  { %1541 = vmatprep.subr.bf16.mxu1 %v1854_v34 }
 0x5ed   :  { %1543 = vmatpush1.bf16.msra.mxu1 %v1863_v38 }
 0x5ee   :  { %1561 = vmatprep.subr.bf16.mxu1 %v1833_v9 }
 0x6b3   :  { %v543_v21 = vpop.f32.mrb[2].mxu1 }
 0x6b4   :  { %v553_v24 = vadd.f32 %v551_v20, %v543_v21  ;;  %v545_v26 = vpop.f32.mrb[3].mxu1 }
 0x6b5   :  { %v557_v27 = vadd.f32 %v555_v23, %v545_v26 }
 0x6b6   :  { %v1439_v28 = vmul.f32 -1.442695, %v553_v24 }
 0x6b7   :  { %v1440_v30 = vmul.f32 -1.442695, %v557_v27 }
 0x6b8   :  { %1631 = vpow2.f32 %v1439_v28 }
 0x6b9   :  { %1633 = vpow2.f32 %v1440_v30 }
 0x6ba   :  { %1635 = vtanh.f32 %v553_v24 }
 0x6bb   :  { %1637 = vtanh.f32 %v557_v27 }
 0x6c2   :  { %v1632_v31 = vpop.eup %1631 }
 0x6c3   :  { %v1634_v35 = vpop.eup %1633  ;;  %v561_v36 = vadd.f32 1.0, %v1632_v31 }
 0x6c4   :  { %v586_v37 = vadd.f32 1.0, %v1634_v35  ;;  %v1636_v39 = vpop.eup %1635 }
 0x6c5   :  { %1639 = vrcp.f32 %v561_v36  ;;  %v1638_v40 = vpop.eup %1637 }
 0x6c6   :  { %1641 = vrcp.f32 %v586_v37 }
 0x6cf   :  { %v1640_v41 = vpop.eup %1639 }
 0x6d0   :  { %v1642_v42 = vpop.eup %1641  ;;  %v565_v43 = vsel %vm1890_vm3, %v1636_v39, %v1640_v41 }
 0x6d1   :  { %568 = vrot.lane.b32.xlu0 %v565_v43, %s1780_s3  ;;  %v590_v44 = vsel %vm1890_vm3, %v1638_v40, %v1642_v42  ;;  %v566_v49 = vmul.f32 %v565_v43, %v1937_v3 }
 0x6d2   :  { %593 = vrot.lane.b32.xlu1 %v590_v44, %s1780_s3  ;;  %v591_v51 = vmul.f32 %v590_v44, %v1939_v6 }
 0x743   :  { %v569_v45 = vpop.permute.xlu0 %568 }
 0x744   :  { %v571_v46 = vmul.f32 %v569_v45, %v565_v43  ;;  %v594_v47 = vpop.permute.xlu1 %593 }
 0x745   :  { %v596_v48 = vmul.f32 %v594_v47, %v590_v44 }
 0x746   :  { %573 = vrot.lane.b32.xlu0 %v571_v46, %s1781_s18 }
 0x747   :  { %598 = vrot.lane.b32.xlu1 %v596_v48, %s1781_s18 }
 0x7b8   :  { %v574_v50 = vpop.permute.xlu0 %573 }
 0x7b9   :  { %v576_v52 = vadd.f32 %v574_v50, %v566_v49  ;;  %v599_v53 = vpop.permute.xlu1 %598  ;;  %v846_v49 = vld [vmem:[#allocation2 + $0x8] sm:$0xc0] }
 0x7ba   :  { %v601_v54 = vadd.f32 %v599_v53, %v591_v51  ;;  %v845_v51 = vld [vmem:[#allocation2 + $0x10] sm:$0x3] }
 0x7bb   :  { %1643 = vtanh.f32 %v576_v52 }
 0x7bc   :  { %1645 = vtanh.f32 %v601_v54 }
 0x7c5   :  { %v1644_v55 = vpop.eup %1643 }
 0x7c6   :  { %v1646_v56 = vpop.eup %1645  ;;  %579 = vrot.lane.b32.xlu0 %v1644_v55, %s1780_s3 }
 0x7c7   :  { %604 = vrot.lane.b32.xlu1 %v1646_v56, %s1780_s3 }
 0x838   :  { %v580_v57 = vpop.permute.xlu0 %579 }
 0x839   :  { %v582_v58 = vmul.f32 %v580_v57, %v565_v43  ;;  %v605_v59 = vpop.permute.xlu1 %604 }
 0x83a   :  { %v1974_v60 = vmul.f32 %v605_v59, %v590_v44 }
 0x83b   :  { %609 = vrot.lane.b32.xlu0 %v582_v58, %s1781_s18 }
 0x83c   :  { %620 = vrot.lane.b32.xlu1 %v1974_v60, %s1780_s3 }
 0x8ad   :  { %v610_v61 = vpop.permute.xlu0 %609 }
 0x8ae   :  { %613 = vst.msk [vmem:[#allocation3 + $0x4] sm:$0x3] %vm312_vm4, %v610_v61  ;;  %v621_v62 = vpop.permute.xlu1 %620 }
 0x8af   :  { %v623_v63 = vsel %vm67_vm0, %v610_v61, %v621_v62 }
 0x8b0   :  { %1441 = vmatmul.mubr.msk.f32.vlgmr.msra.gmra.mrb[6].mxu0 %vm176_vm5, %v623_v63 }
 0x8b1   :  { %1547 = vmatpush1.bf16.msra.mxu0 %v1835_v13  ;;  %985 = vmatprep.mubr.f32.mxu0 %v1779_v0 }
 0x8b2   :  { %1549 = vmatprep.subr.bf16.mxu0 %v1839_v22 }
 0x8b5   :  { %1551 = vmatpush1.bf16.msra.mxu0 %v1841_v25 }
 0x8b6   :  { %1553 = vmatprep.subr.bf16.mxu0 %v1844_v29 }
 0x8b9   :  { %1555 = vmatpush1.bf16.msra.mxu0 %v1850_v33 }
 0x8ba   :  { %1557 = vmatprep.subr.bf16.mxu0 %v1854_v34 }
 0x8bd   :  { %1559 = vmatpush1.bf16.msra.mxu0 %v1863_v38 }
 0x8be   :  { %1577 = vmatprep.subr.bf16.mxu0 %v1833_v9 }
 0x983   :  { %v693_v3 = vpop.f32.mrb[6].mxu0 }
 0x984   :  { %v703_v4 = vadd.f32 %v701_v2, %v693_v3  ;;  %v695_v6 = vpop.f32.mrb[7].mxu0 }
 0x985   :  { %v704_v8 = vadd.f32 %v699_v7, %v695_v6 }
 0x986   :  { %v1442_v10 = vmul.f32 -1.442695, %v703_v4 }
 0x987   :  { %v1443_v11 = vmul.f32 -1.442695, %v704_v8 }
 0x988   :  { %1647 = vpow2.f32 %v1442_v10 }
 0x989   :  { %1649 = vpow2.f32 %v1443_v11 }
 0x98a   :  { %1651 = vtanh.f32 %v703_v4 }
 0x98b   :  { %1653 = vtanh.f32 %v704_v8 }
 0x992   :  { %v1648_v12 = vpop.eup %1647 }
 0x993   :  { %v1650_v15 = vpop.eup %1649  ;;  %v708_v16 = vadd.f32 1.0, %v1648_v12 }
 0x994   :  { %v733_v17 = vadd.f32 1.0, %v1650_v15  ;;  %v1652_v9 = vpop.eup %1651 }
 0x995   :  { %1655 = vrcp.f32 %v708_v16  ;;  %v1654_v18 = vpop.eup %1653 }
 0x996   :  { %1657 = vrcp.f32 %v733_v17 }
 0x99f   :  { %v1656_v19 = vpop.eup %1655 }
 0x9a0   :  { %v1658_v20 = vpop.eup %1657  ;;  %v712_v21 = vsel %vm1890_vm3, %v1652_v9, %v1656_v19 }
 0x9a1   :  { %715 = vrot.lane.b32.xlu0 %v712_v21, %s1780_s3  ;;  %v737_v23 = vsel %vm1890_vm3, %v1654_v18, %v1658_v20  ;;  %v713_v30 = vmul.f32 %v712_v21, %v576_v52  ;;  %v849_v52 = vrot.slane %v846_v49, 6 }
 0x9a2   :  { %740 = vrot.lane.b32.xlu1 %v737_v23, %s1780_s3  ;;  %v738_v35 = vmul.f32 %v737_v23, %v601_v54 }
 0xa13   :  { %v716_v24 = vpop.permute.xlu0 %715 }
 0xa14   :  { %v718_v26 = vmul.f32 %v716_v24, %v712_v21  ;;  %v741_v27 = vpop.permute.xlu1 %740 }
 0xa15   :  { %v743_v28 = vmul.f32 %v741_v27, %v737_v23 }
 0xa16   :  { %720 = vrot.lane.b32.xlu0 %v718_v26, %s1781_s18 }
 0xa17   :  { %745 = vrot.lane.b32.xlu1 %v743_v28, %s1781_s18 }
 0xa88   :  { %v721_v31 = vpop.permute.xlu0 %720 }
 0xa89   :  { %v723_v36 = vadd.f32 %v721_v31, %v713_v30  ;;  %v746_v37 = vpop.permute.xlu1 %745  ;;  %v992_v31 = vld [vmem:[#allocation2 + $0x10] sm:$0xc] }
 0xa8a   :  { %v748_v39 = vadd.f32 %v746_v37, %v738_v35  ;;  %v993_v35 = vld [vmem:[#allocation2 + $0x8] sm:$0x30] }
 0xa8b   :  { %1659 = vtanh.f32 %v723_v36 }
 0xa8c   :  { %1661 = vtanh.f32 %v748_v39 }
 0xa95   :  { %v1660_v40 = vpop.eup %1659 }
 0xa96   :  { %v1662_v41 = vpop.eup %1661  ;;  %726 = vrot.lane.b32.xlu0 %v1660_v40, %s1780_s3 }
 0xa97   :  { %751 = vrot.lane.b32.xlu1 %v1662_v41, %s1780_s3 }
 0xb08   :  { %v727_v42 = vpop.permute.xlu0 %726 }
 0xb09   :  { %v729_v43 = vmul.f32 %v727_v42, %v712_v21  ;;  %v752_v44 = vpop.permute.xlu1 %751 }
 0xb0a   :  { %v2001_v45 = vmul.f32 %v752_v44, %v737_v23 }
 0xb0b   :  { %756 = vrot.lane.b32.xlu0 %v729_v43, %s1781_s18 }
 0xb0c   :  { %767 = vrot.lane.b32.xlu1 %v2001_v45, %s1780_s3 }
 0xb7d   :  { %v757_v46 = vpop.permute.xlu0 %756 }
 0xb7e   :  { %760 = vst.msk [vmem:[#allocation3 + $0x6] sm:$0x3] %vm312_vm4, %v757_v46  ;;  %v768_v47 = vpop.permute.xlu1 %767 }
 0xb7f   :  { %v770_v48 = vsel %vm67_vm0, %v757_v46, %v768_v47 }
 0xb80   :  { %1444 = vmatmul.mubr.msk.f32.vlgmr.msra.gmra.mrb[4].mxu1 %vm176_vm5, %v770_v48 }
 0xb81   :  { %1563 = vmatpush1.bf16.msra.mxu1 %v1835_v13  ;;  %1135 = vmatprep.mubr.f32.mxu1 %v1779_v0 }
 0xb82   :  { %1565 = vmatprep.subr.bf16.mxu1 %v1839_v22 }
 0xb85   :  { %1567 = vmatpush1.bf16.msra.mxu1 %v1841_v25 }
 0xb86   :  { %1569 = vmatprep.subr.bf16.mxu1 %v1844_v29 }
 0xb89   :  { %1571 = vmatpush1.bf16.msra.mxu1 %v1850_v33 }
 0xb8a   :  { %1573 = vmatprep.subr.bf16.mxu1 %v1854_v34 }
 0xb8d   :  { %1575 = vmatpush1.bf16.msra.mxu1 %v1863_v38 }
 0xc53   :  { %v840_v50 = vpop.f32.mrb[4].mxu1 }
 0xc54   :  { %v847_v53 = vadd.f32 %v845_v51, %v840_v50  ;;  %v842_v54 = vpop.f32.mrb[5].mxu1 }
 0xc55   :  { %v851_v55 = vadd.f32 %v849_v52, %v842_v54 }
 0xc56   :  { %v1445_v56 = vmul.f32 -1.442695, %v847_v53 }
 0xc57   :  { %v1446_v57 = vmul.f32 -1.442695, %v851_v55 }
 0xc58   :  { %1663 = vpow2.f32 %v1445_v56 }
 0xc59   :  { %1665 = vpow2.f32 %v1446_v57 }
 0xc5a   :  { %1667 = vtanh.f32 %v847_v53 }
 0xc5b   :  { %1669 = vtanh.f32 %v851_v55 }
 0xc62   :  { %v1664_v58 = vpop.eup %1663 }
 0xc63   :  { %v1666_v59 = vpop.eup %1665  ;;  %v855_v61 = vadd.f32 1.0, %v1664_v58 }
 0xc64   :  { %v880_v62 = vadd.f32 1.0, %v1666_v59  ;;  %v1668_v63 = vpop.eup %1667 }
 0xc65   :  { %1671 = vrcp.f32 %v855_v61  ;;  %v1670_v1 = vpop.eup %1669 }
 0xc66   :  { %1673 = vrcp.f32 %v880_v62 }
 0xc6f   :  { %v1672_v2 = vpop.eup %1671 }
 0xc70   :  { %v1674_v3 = vpop.eup %1673  ;;  %v859_v4 = vsel %vm1890_vm3, %v1668_v63, %v1672_v2 }
 0xc71   :  { %862 = vrot.lane.b32.xlu0 %v859_v4, %s1780_s3  ;;  %v884_v6 = vsel %vm1890_vm3, %v1670_v1, %v1674_v3  ;;  %v860_v12 = vmul.f32 %v859_v4, %v723_v36  ;;  %v995_v36 = vrot.slane %v992_v31, 2 }
 0xc72   :  { %887 = vrot.lane.b32.xlu1 %v884_v6, %s1780_s3  ;;  %v885_v16 = vmul.f32 %v884_v6, %v748_v39  ;;  %v999_v39 = vrot.slane %v993_v35, 4 }
 0xce3   :  { %v863_v7 = vpop.permute.xlu0 %862 }
 0xce4   :  { %v865_v8 = vmul.f32 %v863_v7, %v859_v4  ;;  %v888_v10 = vpop.permute.xlu1 %887  ;;  %v1143_v7 = vld [vmem:[#allocation2 + $0x8] sm:$0xc] }
 0xce5   :  { %v890_v11 = vmul.f32 %v888_v10, %v884_v6 }
 0xce6   :  { %867 = vrot.lane.b32.xlu0 %v865_v8, %s1781_s18 }
 0xce7   :  { %892 = vrot.lane.b32.xlu1 %v890_v11, %s1781_s18  ;;  %v1149_v11 = vrot.slane %v1143_v7, 2 }
 0xd58   :  { %v868_v15 = vpop.permute.xlu0 %867 }
 0xd59   :  { %v870_v17 = vadd.f32 %v868_v15, %v860_v12  ;;  %v893_v9 = vpop.permute.xlu1 %892 }
 0xd5a   :  { %v895_v18 = vadd.f32 %v893_v9, %v885_v16 }
 0xd5b   :  { %1675 = vtanh.f32 %v870_v17 }
 0xd5c   :  { %1677 = vtanh.f32 %v895_v18 }
 0xd65   :  { %v1676_v19 = vpop.eup %1675 }
 0xd66   :  { %v1678_v20 = vpop.eup %1677  ;;  %873 = vrot.lane.b32.xlu0 %v1676_v19, %s1780_s3 }
 0xd67   :  { %898 = vrot.lane.b32.xlu1 %v1678_v20, %s1780_s3 }
 0xdd8   :  { %v874_v21 = vpop.permute.xlu0 %873 }
 0xdd9   :  { %v876_v23 = vmul.f32 %v874_v21, %v859_v4  ;;  %v899_v24 = vpop.permute.xlu1 %898 }
 0xdda   :  { %v2027_v26 = vmul.f32 %v899_v24, %v884_v6  ;;  %v1142_v6 = vld [vmem:[#allocation2 + $0x10] sm:$0x30] }
 0xddb   :  { %903 = vrot.lane.b32.xlu0 %v876_v23, %s1781_s18  ;;  %v1145_v8 = vrot.slane %v1142_v6, 4 }
 0xddc   :  { %914 = vrot.lane.b32.xlu1 %v2027_v26, %s1780_s3 }
 0xe4d   :  { %v904_v27 = vpop.permute.xlu0 %903 }
 0xe4e   :  { %907 = vst.msk [vmem:[#allocation3 + $0x8] sm:$0x3] %vm312_vm4, %v904_v27  ;;  %v915_v28 = vpop.permute.xlu1 %914 }
 0xe4f   :  { %v917_v30 = vsel %vm67_vm0, %v904_v27, %v915_v28 }
 0xe50   :  { %1447 = vmatmul.mubr.msk.f32.vlgmr.msra.gmra.mrb[8].mxu0 %vm176_vm5, %v917_v30 }
 0xe51   :  { %1579 = vmatpush1.bf16.msra.mxu0 %v1835_v13  ;;  %1285 = vmatprep.mubr.f32.mxu0 %v1779_v0 }
 0xe52   :  { %1581 = vmatprep.subr.bf16.mxu0 %v1839_v22 }
 0xe55   :  { %1583 = vmatpush1.bf16.msra.mxu0 %v1841_v25 }
 0xe56   :  { %1585 = vmatprep.subr.bf16.mxu0 %v1844_v29 }
 0xe59   :  { %1587 = vmatpush1.bf16.msra.mxu0 %v1850_v33 }
 0xe5a   :  { %1589 = vmatprep.subr.bf16.mxu0 %v1854_v34 }
 0xe5d   :  { %1591 = vmatpush1.bf16.msra.mxu0 %v1863_v38 }
 0xf23   :  { %v987_v37 = vpop.f32.mrb[8].mxu0 }
 0xf24   :  { %v997_v13 = vadd.f32 %v995_v36, %v987_v37  ;;  %v989_v40 = vpop.f32.mrb[9].mxu0 }
 0xf25   :  { %v1001_v0 = vadd.f32 %v999_v39, %v989_v40 }
 0xf26   :  { %v1448_v41 = vmul.f32 -1.442695, %v997_v13 }
 0xf27   :  { %v1449_v22 = vmul.f32 -1.442695, %v1001_v0 }
 0xf28   :  { %1679 = vpow2.f32 %v1448_v41 }
 0xf29   :  { %1681 = vpow2.f32 %v1449_v22 }
 0xf2a   :  { %1683 = vtanh.f32 %v997_v13 }
 0xf2b   :  { %1685 = vtanh.f32 %v1001_v0 }
 0xf32   :  { %v1680_v25 = vpop.eup %1679 }
 0xf33   :  { %v1682_v29 = vpop.eup %1681  ;;  %v1005_v42 = vadd.f32 1.0, %v1680_v25 }
 0xf34   :  { %v1030_v33 = vadd.f32 1.0, %v1682_v29  ;;  %v1684_v34 = vpop.eup %1683 }
 0xf35   :  { %1687 = vrcp.f32 %v1005_v42  ;;  %v1686_v38 = vpop.eup %1685 }
 0xf36   :  { %1689 = vrcp.f32 %v1030_v33 }
 0xf3f   :  { %v1688_v43 = vpop.eup %1687 }
 0xf40   :  { %v1690_v44 = vpop.eup %1689  ;;  %v1009_v46 = vsel %vm1890_vm3, %v1684_v34, %v1688_v43 }
 0xf41   :  { %1012 = vrot.lane.b32.xlu0 %v1009_v46, %s1780_s3  ;;  %v1034_v47 = vsel %vm1890_vm3, %v1686_v38, %v1690_v44  ;;  %v1010_v52 = vmul.f32 %v1009_v46, %v870_v17 }
 0xf42   :  { %1037 = vrot.lane.b32.xlu1 %v1034_v47, %s1780_s3  ;;  %v1035_v54 = vmul.f32 %v1034_v47, %v895_v18 }
 0xfb3   :  { %v1013_v48 = vpop.permute.xlu0 %1012 }
 0xfb4   :  { %v1015_v49 = vmul.f32 %v1013_v48, %v1009_v46  ;;  %v1038_v50 = vpop.permute.xlu1 %1037  ;;  %v1292_v48 = vld [vmem:[#allocation2 + $0x10] sm:$0xc0] }
 0xfb5   :  { %v1040_v51 = vmul.f32 %v1038_v50, %v1034_v47 }
 0xfb6   :  { %1017 = vrot.lane.b32.xlu0 %v1015_v49, %s1781_s18  ;;  %v1295_v49 = vrot.slane %v1292_v48, 6 }
 0xfb7   :  { %1042 = vrot.lane.b32.xlu1 %v1040_v51, %s1781_s18 }
0x1028   :  { %v1018_v53 = vpop.permute.xlu0 %1017 }
0x1029   :  { %v1020_v55 = vadd.f32 %v1018_v53, %v1010_v52  ;;  %v1043_v56 = vpop.permute.xlu1 %1042  ;;  %v1293_v53 = vld [vmem:[#allocation2 + $0x8] sm:$0x3] }
0x102a   :  { %v1045_v57 = vadd.f32 %v1043_v56, %v1035_v54 }
0x102b   :  { %1691 = vtanh.f32 %v1020_v55 }
0x102c   :  { %1693 = vtanh.f32 %v1045_v57 }
0x1035   :  { %v1692_v58 = vpop.eup %1691 }
0x1036   :  { %v1694_v59 = vpop.eup %1693  ;;  %1023 = vrot.lane.b32.xlu0 %v1692_v58, %s1780_s3 }
0x1037   :  { %1048 = vrot.lane.b32.xlu1 %v1694_v59, %s1780_s3 }
0x10a8   :  { %v1024_v61 = vpop.permute.xlu0 %1023 }
0x10a9   :  { %v1026_v62 = vmul.f32 %v1024_v61, %v1009_v46  ;;  %v1049_v63 = vpop.permute.xlu1 %1048 }
0x10aa   :  { %v2053_v1 = vmul.f32 %v1049_v63, %v1034_v47 }
0x10ab   :  { %1053 = vrot.lane.b32.xlu0 %v1026_v62, %s1781_s18 }
0x10ac   :  { %1064 = vrot.lane.b32.xlu1 %v2053_v1, %s1780_s3 }
0x111d   :  { %v1054_v2 = vpop.permute.xlu0 %1053 }
0x111e   :  { %1057 = vst.msk [vmem:[#allocation3 + $0xa] sm:$0x3] %vm312_vm4, %v1054_v2  ;;  %v1065_v3 = vpop.permute.xlu1 %1064 }
0x111f   :  { %v1067_v4 = vsel %vm67_vm0, %v1054_v2, %v1065_v3 }
0x1120   :  { %1450 = vmatmul.mubr.msk.f32.vlgmr.msra.gmra.mrb[6].mxu1 %vm176_vm5, %v1067_v4 }
0x1125   :  { %v1365_v48 = vld [vmem:[#allocation3 + $0xa] sm:$0x3] }
0x11f3   :  { %v1137_v10 = vpop.f32.mrb[6].mxu1 }
0x11f4   :  { %v1147_v12 = vadd.f32 %v1145_v8, %v1137_v10  ;;  %v1139_v15 = vpop.f32.mrb[7].mxu1 }
0x11f5   :  { %v1151_v16 = vadd.f32 %v1149_v11, %v1139_v15 }
0x11f6   :  { %v1451_v17 = vmul.f32 -1.442695, %v1147_v12 }
0x11f7   :  { %v1452_v9 = vmul.f32 -1.442695, %v1151_v16 }
0x11f8   :  { %1695 = vpow2.f32 %v1451_v17 }
0x11f9   :  { %1697 = vpow2.f32 %v1452_v9 }
0x11fa   :  { %1699 = vtanh.f32 %v1147_v12 }
0x11fb   :  { %1701 = vtanh.f32 %v1151_v16 }
0x1202   :  { %v1696_v18 = vpop.eup %1695 }
0x1203   :  { %v1698_v19 = vpop.eup %1697  ;;  %v1155_v20 = vadd.f32 1.0, %v1696_v18 }
0x1204   :  { %v1180_v21 = vadd.f32 1.0, %v1698_v19  ;;  %v1700_v23 = vpop.eup %1699 }
0x1205   :  { %1703 = vrcp.f32 %v1155_v20  ;;  %v1702_v24 = vpop.eup %1701 }
0x1206   :  { %1705 = vrcp.f32 %v1180_v21 }
0x120f   :  { %v1704_v27 = vpop.eup %1703 }
0x1210   :  { %v1706_v28 = vpop.eup %1705  ;;  %v1159_v30 = vsel %vm1890_vm3, %v1700_v23, %v1704_v27 }
0x1211   :  { %1162 = vrot.lane.b32.xlu0 %v1159_v30, %s1780_s3  ;;  %v1184_v31 = vsel %vm1890_vm3, %v1702_v24, %v1706_v28  ;;  %v1160_v13 = vmul.f32 %v1159_v30, %v1020_v55 }
0x1212   :  { %1187 = vrot.lane.b32.xlu1 %v1184_v31, %s1780_s3  ;;  %v1185_v0 = vmul.f32 %v1184_v31, %v1045_v57 }
0x1283   :  { %v1163_v35 = vpop.permute.xlu0 %1162 }
0x1284   :  { %v1165_v36 = vmul.f32 %v1163_v35, %v1159_v30  ;;  %v1188_v37 = vpop.permute.xlu1 %1187 }
0x1285   :  { %v1190_v39 = vmul.f32 %v1188_v37, %v1184_v31 }
0x1286   :  { %1167 = vrot.lane.b32.xlu0 %v1165_v36, %s1781_s18 }
0x1287   :  { %1192 = vrot.lane.b32.xlu1 %v1190_v39, %s1781_s18 }
0x12f8   :  { %v1168_v40 = vpop.permute.xlu0 %1167 }
0x12f9   :  { %v1170_v41 = vadd.f32 %v1168_v40, %v1160_v13  ;;  %v1193_v22 = vpop.permute.xlu1 %1192 }
0x12fa   :  { %v1195_v25 = vadd.f32 %v1193_v22, %v1185_v0 }
0x12fb   :  { %1707 = vtanh.f32 %v1170_v41 }
0x12fc   :  { %1709 = vtanh.f32 %v1195_v25 }
0x1305   :  { %v1708_v29 = vpop.eup %1707 }
0x1306   :  { %v1710_v42 = vpop.eup %1709  ;;  %1173 = vrot.lane.b32.xlu0 %v1708_v29, %s1780_s3  ;;  %v1364_v29 = vld [vmem:[#allocation3 + $0x8] sm:$0x3] }
0x1307   :  { %1198 = vrot.lane.b32.xlu1 %v1710_v42, %s1780_s3 }
0x1378   :  { %v1174_v33 = vpop.permute.xlu0 %1173 }
0x1379   :  { %v1176_v34 = vmul.f32 %v1174_v33, %v1159_v30  ;;  %v1199_v38 = vpop.permute.xlu1 %1198 }
0x137a   :  { %v1201_v43 = vmul.f32 %v1199_v38, %v1184_v31 }
0x137b   :  { %1203 = vrot.lane.b32.xlu0 %v1176_v34, %s1781_s18  ;;  %v1361_v34 = vld [vmem:[#allocation3 + $0x2] sm:$0x3] }
0x137c   :  { %1214 = vrot.lane.b32.xlu1 %v1201_v43, %s1780_s3 }
0x13ed   :  { %v1204_v44 = vpop.permute.xlu0 %1203 }
0x13ee   :  { %1207 = vst.msk [vmem:[#allocation3 + $0xc] sm:$0x3] %vm312_vm4, %v1204_v44  ;;  %v1215_v46 = vpop.permute.xlu1 %1214 }
0x13ef   :  { %v1217_v47 = vsel %vm67_vm0, %v1204_v44, %v1215_v46  ;;  %v1363_v44 = vld [vmem:[#allocation3 + $0x6] sm:$0x3] }
0x13f0   :  { %1453 = vmatmul.mubr.msk.f32.vlgmr.msra.gmra.mrb[10].mxu0 %vm176_vm5, %v1217_v47 }
0x14c3   :  { %v1287_v50 = vpop.f32.mrb[10].mxu0 }
0x14c4   :  { %v1297_v51 = vadd.f32 %v1295_v49, %v1287_v50  ;;  %v1289_v52 = vpop.f32.mrb[11].mxu0 }
0x14c5   :  { %v1298_v54 = vadd.f32 %v1293_v53, %v1289_v52 }
0x14c6   :  { %v1454_v55 = vmul.f32 -1.442695, %v1297_v51 }
0x14c7   :  { %v1455_v56 = vmul.f32 -1.442695, %v1298_v54 }
0x14c8   :  { %1711 = vpow2.f32 %v1454_v55  ;;  %v1360_v55 = vld [vmem:[#allocation3] sm:$0x3] }
0x14c9   :  { %1713 = vpow2.f32 %v1455_v56 }
0x14ca   :  { %1715 = vtanh.f32 %v1297_v51 }
0x14cb   :  { %1717 = vtanh.f32 %v1298_v54 }
0x14d2   :  { %v1712_v57 = vpop.eup %1711 }
0x14d3   :  { %v1714_v58 = vpop.eup %1713  ;;  %v1302_v59 = vadd.f32 1.0, %v1712_v57  ;;  %v1366_v57 = vld [vmem:[#allocation3 + $0xc] sm:$0x3] }
0x14d4   :  { %v1327_v61 = vadd.f32 1.0, %v1714_v58  ;;  %v1716_v62 = vpop.eup %1715 }
0x14d5   :  { %1719 = vrcp.f32 %v1302_v59  ;;  %v1718_v63 = vpop.eup %1717 }
0x14d6   :  { %1721 = vrcp.f32 %v1327_v61 }
0x14df   :  { %v1720_v2 = vpop.eup %1719 }
0x14e0   :  { %v1722_v3 = vpop.eup %1721  ;;  %v1306_v4 = vsel %vm1890_vm3, %v1716_v62, %v1720_v2 }
0x14e1   :  { %1309 = vrot.lane.b32.xlu1 %v1306_v4, %s1780_s3  ;;  %v1331_v6 = vsel %vm1890_vm3, %v1718_v63, %v1722_v3  ;;  %v1307_v12 = vmul.f32 %v1306_v4, %v1170_v41  ;;  %v1362_v41 = vld [vmem:[#allocation3 + $0x4] sm:$0x3] }
0x14e2   :  { %1334 = vrot.lane.b32.xlu0 %v1331_v6, %s1780_s3  ;;  %v1332_v16 = vmul.f32 %v1331_v6, %v1195_v25 }
0x1553   :  { %v1310_v7 = vpop.permute.xlu1 %1309 }
0x1554   :  { %v1312_v8 = vmul.f32 %v1310_v7, %v1306_v4  ;;  %v1335_v10 = vpop.permute.xlu0 %1334 }
0x1555   :  { %v1337_v11 = vmul.f32 %v1335_v10, %v1331_v6 }
0x1556   :  { %1314 = vrot.lane.b32.xlu1 %v1312_v8, %s1781_s18 }
0x1557   :  { %1339 = vrot.lane.b32.xlu0 %v1337_v11, %s1781_s18 }
0x15c8   :  { %v1315_v15 = vpop.permute.xlu1 %1314 }
0x15c9   :  { %v1317_v17 = vadd.f32 %v1315_v15, %v1307_v12  ;;  %v1340_v9 = vpop.permute.xlu0 %1339 }
0x15ca   :  { %v1342_v18 = vadd.f32 %v1340_v9, %v1332_v16 }
0x15cb   :  { %1723 = vtanh.f32 %v1317_v17 }
0x15cc   :  { %1725 = vtanh.f32 %v1342_v18 }
0x15d5   :  { %v1724_v5 = vpop.eup %1723 }
0x15d6   :  { %v1726_v19 = vpop.eup %1725  ;;  %1320 = vrot.lane.b32.xlu1 %v1724_v5, %s1780_s3 }
0x15d7   :  { %1345 = vrot.lane.b32.xlu0 %v1726_v19, %s1780_s3 }
0x15da   :  { %465 = vrot.lane.b32.xlu1 %v1945_v14, %s1781_s18 }
0x15db   :  { %315 = vrot.lane.b32.xlu0 %v1911_v32, %s1781_s18 }
0x15de   :  { %762 = vrot.lane.b32.xlu1 %v2001_v45, %s1781_s18 }
0x15df   :  { %615 = vrot.lane.b32.xlu0 %v1974_v60, %s1781_s18 }
0x15e2   :  { %1059 = vrot.lane.b32.xlu1 %v2053_v1, %s1781_s18 }
0x15e3   :  { %909 = vrot.lane.b32.xlu0 %v2027_v26, %s1781_s18 }
0x15e7   :  { %1209 = vrot.lane.b32.xlu0 %v1201_v43, %s1781_s18 }
0x1648   :  { %v1321_v20 = vpop.permute.xlu1 %1320 }
0x1649   :  { %v1323_v21 = vmul.f32 %v1321_v20, %v1306_v4  ;;  %v1346_v14 = vpop.permute.xlu0 %1345 }
0x164a   :  { %v1348_v23 = vmul.f32 %v1346_v14, %v1331_v6 }
0x164b   :  { %1350 = vrot.lane.b32.xlu0 %v1323_v21, %s1781_s18 }
0x164c   :  { %v466_v32 = vpop.permute.xlu1 %465  ;;  %1356 = vrot.lane.b32.xlu1 %v1348_v23, %s1781_s18 }
0x164d   :  { %469 = vst.msk [vmem:[#allocation4 + $0xc] sm:$0x3] %vm312_vm4, %v466_v32  ;;  %v316_v60 = vpop.permute.xlu0 %315 }
0x164e   :  { %319 = vst.msk [vmem:[#allocation4 + $0xe] sm:$0x3] %vm312_vm4, %v316_v60 }
0x1650   :  { %v763_v45 = vpop.permute.xlu1 %762 }
0x1651   :  { %766 = vst.msk [vmem:[#allocation4 + $0x8] sm:$0x3] %vm312_vm4, %v763_v45  ;;  %v616_v26 = vpop.permute.xlu0 %615 }
0x1652   :  { %619 = vst.msk [vmem:[#allocation4 + $0xa] sm:$0x3] %vm312_vm4, %v616_v26 }
0x1654   :  { %v1060_v1 = vpop.permute.xlu1 %1059  ;;  %v1374_v0 = vld [vmem:[#allocation4 + $0xc] sm:$0x3] }
0x1655   :  { %1063 = vst.msk [vmem:[#allocation4 + $0x4] sm:$0x3] %vm312_vm4, %v1060_v1  ;;  %v910_v24 = vpop.permute.xlu0 %909  ;;  %v1375_v37 = vld [vmem:[#allocation4 + $0xe] sm:$0x3] }
0x1656   :  { %913 = vst.msk [vmem:[#allocation4 + $0x6] sm:$0x3] %vm312_vm4, %v910_v24 }
0x1658   :  { %v1372_v30 = vld [vmem:[#allocation4 + $0x8] sm:$0x3] }
0x1659   :  { %v1210_v27 = vpop.permute.xlu0 %1209  ;;  %v1373_v36 = vld [vmem:[#allocation4 + $0xa] sm:$0x3] }
0x165a   :  { %1213 = vst.msk [vmem:[#allocation4 + $0x2] sm:$0x3] %vm312_vm4, %v1210_v27 }
0x165c   :  { %v1370_v28 = vld [vmem:[#allocation4 + $0x4] sm:$0x3] }
0x165d   :  { %1388 = vrot.lane.b32.xlu1 %v1370_v28, %s1781_s18  ;;  %v1371_v35 = vld [vmem:[#allocation4 + $0x6] sm:$0x3] }
0x1661   :  { %1392 = vrot.lane.b32.xlu1 %v1372_v30, %s1781_s18  ;;  %v1369_v31 = vld [vmem:[#allocation4 + $0x2] sm:$0x3] }
0x1662   :  { %1386 = vrot.lane.b32.xlu0 %v1369_v31, %s1781_s18 }
0x1666   :  { %1390 = vrot.lane.b32.xlu0 %v1371_v35, %s1781_s18 }
0x166a   :  { %1394 = vrot.lane.b32.xlu0 %v1373_v36, %s1781_s18 }
0x166e   :  { %1398 = vrot.lane.b32.xlu0 %v1375_v37, %s1781_s18 }
0x16bd   :  { %v1351_v39 = vpop.permute.xlu0 %1350 }
0x16be   :  { %1354 = vst.msk [vmem:[#allocation3 + $0xe] sm:$0x3] %vm312_vm4, %v1351_v39  ;;  %v1357_v13 = vpop.permute.xlu1 %1356 }
0x16bf   :  { %1359 = vst.msk [vmem:[#allocation4] sm:$0x3] %vm312_vm4, %v1357_v13 }
0x16c5   :  { %v1367_v51 = vld [vmem:[#allocation3 + $0xe] sm:$0x3] }
0x16c6   :  { %v1368_v40 = vld [vmem:[#allocation4] sm:$0x3] }
0x16c7   :  { %1384 = vrot.lane.b32.xlu1 %v1368_v40, %s1781_s18 }
0x16cb   :  { %1396 = vrot.lane.b32.xlu1 %v1374_v0, %s1781_s18 }
0x16cf   :  { %v1389_v22 = vpop.permute.xlu1 %1388 }
0x16d0   :  { %v1410_v25 = vsel %vm67_vm0, %v1362_v41, %v1389_v22 }
0x16d1   :  { %1419 = vst.msk [vmem:[%s2162_s4 + $0x4] sm:$0x3] %vm1416_vm6, %v1410_v25 }
0x16d3   :  { %v1393_v42 = vpop.permute.xlu1 %1392 }
0x16d4   :  { %v1412_v33 = vsel %vm67_vm0, %v1364_v29, %v1393_v42  ;;  %v1387_v38 = vpop.permute.xlu0 %1386 }
0x16d5   :  { %1421 = vst.msk [vmem:[%s2162_s4 + $0x8] sm:$0x3] %vm1416_vm6, %v1412_v33  ;;  %v1409_v43 = vsel %vm67_vm0, %v1361_v34, %v1387_v38 }
0x16d6   :  { %1418 = vst.msk [vmem:[%s2162_s4 + $0x2] sm:$0x3] %vm1416_vm6, %v1409_v43 }
0x16d8   :  { %v1391_v46 = vpop.permute.xlu0 %1390 }
0x16d9   :  { %v1411_v47 = vsel %vm67_vm0, %v1363_v44, %v1391_v46 }
0x16da   :  { %1420 = vst.msk [vmem:[%s2162_s4 + $0x6] sm:$0x3] %vm1416_vm6, %v1411_v47 }
0x16dc   :  { %v1395_v49 = vpop.permute.xlu0 %1394 }
0x16dd   :  { %v1413_v50 = vsel %vm67_vm0, %v1365_v48, %v1395_v49 }
0x16de   :  { %1422 = vst.msk [vmem:[%s2162_s4 + $0xa] sm:$0x3] %vm1416_vm6, %v1413_v50 }
0x16e0   :  { %v1399_v52 = vpop.permute.xlu0 %1398 }
0x16e1   :  { %v1415_v53 = vsel %vm67_vm0, %v1367_v51, %v1399_v52 }
0x16e2   :  { %1424 = vst.msk [vmem:[%s2162_s4 + $0xe] sm:$0x3] %vm1416_vm6, %v1415_v53 }
0x1739   :  { %v1385_v54 = vpop.permute.xlu1 %1384 }
0x173a   :  { %v1408_v56 = vsel %vm67_vm0, %v1360_v55, %v1385_v54 }
0x173b   :  { %1417 = vst.msk [vmem:[%s2162_s4] sm:$0x3] %vm1416_vm6, %v1408_v56 }
0x173d   :  { %v1397_v58 = vpop.permute.xlu1 %1396 }
0x173e   :  { %v1414_v59 = vsel %vm67_vm0, %v1366_v57, %v1397_v58 }
0x173f   :  { %1423 = vst.msk [vmem:[%s2162_s4 + $0xc] sm:$0x3] %vm1416_vm6, %v1414_v59 }
0x1740   :  { %1429 = vsyncpa [#allocation6], 1 }
0x1741   :  { %1430 = vsyncpa [#allocation8], 1 }

// kernel: encoder_forward.3
= control target key start
LH: loop header
LB: loop body
LE: loop exit
PB: predicated region body
PF: predicated region fallthrough
CT: control target
= control target key end

     0   :  { %v1709_v3 = vmov 0.0   ;;  %vm47_vm0 = vcmask 523264   ;;  %v37_v51 = vlaneseq  ;;  %s1711_s30 = smov 32   ;;  %vm291_vm4 = vcmask 254976   ;;  %s2160_s1 = inlined_call_operand.vmem [shape: f32[64,256], index: 1, kind: input, shape index: {}]   ;;  %s2161_s2 = inlined_call_operand.vmem [shape: f32[64,256], index: 2, kind: input, shape index: {}]   ;;  %s2162_s0 = inlined_call_operand.vmem [shape: f32[16,64], index: 0, kind: input, shape index: {}]   ;;  %s2163_s3 = inlined_call_operand.vmem [shape: f32[1,256], index: 3, kind: input, shape index: {}]   ;;  %s2164_s4 = inlined_call_operand.vmem [shape: f32[8,2,64], index: 4, kind: output, shape index: {}]  }
   0x1   :  { %v20_v0 = vld [vmem:[%s2160_s1 + $0x8] sm:$0xff]  ;;  %v22_v1 = vld [vmem:[%s2160_s1 + $0x18] sm:$0xff]  ;;  %v19_v2 = vld [vmem:[%s2160_s1] sm:$0xff]  ;;  %118 = vmatprep.mubr.f32.mxu0 %v1709_v3  ;;  %223 = vmatprep.mubr.f32.mxu1 %v1709_v3  ;;  %vm302_vm5 = vcmask 261120   ;;  %vm1396_vm6 = vcmask 517120  }
   0x2   :  { %v1434_v4 = vpack.c.bf16 %v22_v1, %v20_v0  ;;  %v21_v5 = vld [vmem:[%s2160_s1 + $0x10] sm:$0xff]  ;;  %v24_v6 = vld [vmem:[%s2160_s1 + $0x28] sm:$0xff]  ;;  %v26_v7 = vld [vmem:[%s2160_s1 + $0x38] sm:$0xff]  ;;  %v38_v52 = vshrl.u32 %v37_v51, 7 }
   0x3   :  { %v1436_v8 = vpack.c.bf16 %v21_v5, %v19_v2  ;;  %v1438_v9 = vpack.c.bf16 %v26_v7, %v24_v6  ;;  %v23_v10 = vld [vmem:[%s2160_s1 + $0x20] sm:$0xff]  ;;  %v25_v11 = vld [vmem:[%s2160_s1 + $0x30] sm:$0xff]  ;;  %v28_v12 = vld [vmem:[%s2160_s1 + $0x48] sm:$0xff] }
   0x4   :  { %1435 = vmatprep.subr.bf16.mxu0 %v1434_v4  ;;  %v30_v13 = vld [vmem:[%s2160_s1 + $0x58] sm:$0xff]  ;;  %v1440_v14 = vpack.c.bf16 %v25_v11, %v23_v10  ;;  %v136_v15 = vld [vmem:[%s2161_s2 + $0x8] sm:$0xff]  ;;  %v135_v17 = vld [vmem:[%s2161_s2] sm:$0xff]  ;;  %v39_v53 = vsub.s32 0, %v38_v52  ;;  %v43_v55 = vsub.s32 1, %v38_v52 }
   0x5   :  { %1437 = vmatpush1.bf16.msra.mxu0 %v1436_v8  ;;  %v138_v16 = vld [vmem:[%s2161_s2 + $0x18] sm:$0xff]  ;;  %v1442_v18 = vpack.c.bf16 %v30_v13, %v28_v12  ;;  %v27_v19 = vld [vmem:[%s2160_s1 + $0x40] sm:$0xff]  ;;  %v29_v20 = vld [vmem:[%s2160_s1 + $0x50] sm:$0xff] }
   0x6   :  { %1439 = vmatprep.subr.bf16.mxu0 %v1438_v9  ;;  %v1784_v21 = vpack.c.bf16 %v138_v16, %v136_v15  ;;  %v137_v22 = vld [vmem:[%s2161_s2 + $0x10] sm:$0xff]  ;;  %v32_v24 = vld [vmem:[%s2160_s1 + $0x68] sm:$0xff]  ;;  %v34_v25 = vld [vmem:[%s2160_s1 + $0x78] sm:$0xff]  ;;  %v1444_v30 = vpack.c.bf16 %v29_v20, %v27_v19 }
   0x7   :  { %v1789_v23 = vpack.c.bf16 %v137_v22, %v135_v17  ;;  %v140_v26 = vld [vmem:[%s2161_s2 + $0x28] sm:$0xff]  ;;  %v142_v27 = vld [vmem:[%s2161_s2 + $0x38] sm:$0xff]  ;;  %v139_v28 = vld [vmem:[%s2161_s2 + $0x20] sm:$0xff]  ;;  %v1446_v36 = vpack.c.bf16 %v34_v25, %v32_v24 }
   0x8   :  { %1451 = vmatprep.subr.bf16.mxu1 %v1784_v21  ;;  %v141_v29 = vld [vmem:[%s2161_s2 + $0x30] sm:$0xff]  ;;  %v31_v31 = vld [vmem:[%s2160_s1 + $0x60] sm:$0xff]  ;;  %v1814_v32 = vpack.c.bf16 %v142_v27, %v140_v26  ;;  %v144_v34 = vld [vmem:[%s2161_s2 + $0x48] sm:$0xff] }
   0x9   :  { %1441 = vmatpush1.bf16.msra.mxu0 %v1440_v14  ;;  %1453 = vmatpush1.bf16.msra.mxu1 %v1789_v23  ;;  %v1816_v33 = vpack.c.bf16 %v141_v29, %v139_v28  ;;  %v146_v35 = vld [vmem:[%s2161_s2 + $0x58] sm:$0xff]  ;;  %v33_v37 = vld [vmem:[%s2160_s1 + $0x70] sm:$0xff]  ;;  %v143_v39 = vld [vmem:[%s2161_s2 + $0x40] sm:$0xff]  ;;  %v152_v14 = vand.u32 127, %v37_v51 }
   0xa   :  { %1443 = vmatprep.subr.bf16.mxu0 %v1442_v18  ;;  %v1827_v38 = vpack.c.bf16 %v146_v35, %v144_v34  ;;  %v145_v40 = vld [vmem:[%s2161_s2 + $0x50] sm:$0xff]  ;;  %1455 = vmatprep.subr.bf16.mxu1 %v1814_v32  ;;  %v148_v41 = vld [vmem:[%s2161_s2 + $0x68] sm:$0xff]  ;;  %v150_v42 = vld [vmem:[%s2161_s2 + $0x78] sm:$0xff]  ;;  %v1448_v43 = vpack.c.bf16 %v33_v37, %v31_v31 }
   0xb   :  { %v1843_v44 = vpack.c.bf16 %v145_v40, %v143_v39  ;;  %v1846_v45 = vpack.c.bf16 %v150_v42, %v148_v41  ;;  %v147_v46 = vld [vmem:[%s2161_s2 + $0x60] sm:$0xff]  ;;  %v149_v47 = vld [vmem:[%s2161_s2 + $0x70] sm:$0xff]  ;;  %v18_v50 = vld [vmem:[%s2162_s0 + $0x8] sm:$0xff]  ;;  %vm153_vm1 = vcmp.ge.s32.totalorder %v152_v14, 64  ;;  %vm154_vm2 = vcmp.lt.s32.totalorder %v152_v14, 96 }
   0xc   :  { %v17_v48 = vld [vmem:[%s2162_s0] sm:$0xff]  ;;  %v1858_v49 = vpack.c.bf16 %v149_v47, %v147_v46  ;;  %vm1892_vm3 = vmand %vm153_vm1, %vm154_vm2 }
   0xd   :  { %1445 = vmatpush1.bf16.msra.mxu0 %v1444_v30  ;;  %1457 = vmatpush1.bf16.msra.mxu1 %v1816_v33  ;;  %v35_v54 = vld [vmem:[%s2163_s3] sm:$0x3]  ;;  %s1710_s3 = smov 64  }
   0xe   :  { %1447 = vmatprep.subr.bf16.mxu0 %v1446_v36  ;;  %1459 = vmatprep.subr.bf16.mxu1 %v1827_v38  ;;  %v40_v56 = vrot.slane %v35_v54, %v39_v53  ;;  %v44_v57 = vrot.slane %v35_v54, %v43_v55 }
  0x11   :  { %1449 = vmatpush1.bf16.msra.mxu0 %v1448_v43  ;;  %1461 = vmatpush1.bf16.msra.mxu1 %v1843_v44 }
  0x12   :  { %1463 = vmatprep.subr.bf16.mxu1 %v1846_v45  ;;  %1467 = vmatprep.subr.bf16.mxu0 %v1784_v21 }
  0x14   :  { %1409 = vmatmul.mubr.msk.f32.vlgmr.msra.gmra.mrb[0].mxu0 %vm47_vm0, %v17_v48 }
  0x15   :  { %124 = vmatprep.mubr.f32.mxu0 %v1709_v3  ;;  %1465 = vmatpush1.bf16.msra.mxu1 %v1858_v49 }
  0x16   :  { %1469 = vmatpush1.bf16.msra.mxu0 %v1789_v23  ;;  %1483 = vmatprep.subr.bf16.mxu1 %v1784_v21 }
  0x17   :  { %1471 = vmatprep.subr.bf16.mxu0 %v1814_v32 }
  0x18   :  { %1410 = vmatmul.mubr.msk.f32.gmra.mrb[2].mxu0 %vm47_vm0, %v18_v50  ;;  %224 = vmatmul.mubr.f32.vlgmr.msra.gmra.mrb[0].mxu1 %v1709_v3 }
  0x19   :  { %371 = vmatprep.mubr.f32.mxu0 %v1709_v3  ;;  %1485 = vmatpush1.bf16.msra.mxu1 %v1789_v23 }
  0x1a   :  { %1473 = vmatpush1.bf16.msra.mxu0 %v1816_v33  ;;  %1487 = vmatprep.subr.bf16.mxu1 %v1814_v32 }
  0x1b   :  { %1475 = vmatprep.subr.bf16.mxu0 %v1827_v38  ;;  %521 = vmatprep.mubr.f32.mxu1 %v1709_v3 }
  0x1d   :  { %1489 = vmatpush1.bf16.msra.mxu1 %v1816_v33 }
  0x1e   :  { %1477 = vmatpush1.bf16.msra.mxu0 %v1843_v44  ;;  %1491 = vmatprep.subr.bf16.mxu1 %v1827_v38 }
  0x1f   :  { %1479 = vmatprep.subr.bf16.mxu0 %v1846_v45 }
  0x21   :  { %1493 = vmatpush1.bf16.msra.mxu1 %v1843_v44 }
  0x22   :  { %1481 = vmatpush1.bf16.msra.mxu0 %v1858_v49  ;;  %1495 = vmatprep.subr.bf16.mxu1 %v1846_v45 }
  0x23   :  { %1499 = vmatprep.subr.bf16.mxu0 %v1784_v21 }
  0x25   :  { %1497 = vmatpush1.bf16.msra.mxu1 %v1858_v49 }
  0x26   :  { %1515 = vmatprep.subr.bf16.mxu1 %v1784_v21 }
  0xe7   :  { %v120_v58 = vpop.f32.mrb[0].mxu0 }
  0xe8   :  { %v121_v59 = vadd.f32 %v120_v58, %v40_v56  ;;  %v122_v60 = vpop.f32.mrb[1].mxu0 }
  0xe9   :  { %v123_v61 = vadd.f32 %v122_v60, %v44_v57 }
  0xea   :  { %131 = vst [vmem:[#allocation2] sm:$0xff] %v121_v59 }
  0xeb   :  { %132 = vst [vmem:[#allocation2 + $0x8] sm:$0xff] %v123_v61  ;;  %v126_v62 = vpop.f32.mrb[2].mxu0  ;;  %v225_v63 = vpop.f32.mrb[0].mxu1 }
  0xec   :  { %v127_v0 = vadd.f32 %v126_v62, %v40_v56  ;;  %v128_v1 = vpop.f32.mrb[3].mxu0  ;;  %v227_v2 = vpop.f32.mrb[1].mxu1 }
  0xed   :  { %v129_v4 = vadd.f32 %v128_v1, %v44_v57 }
  0xee   :  { %133 = vst [vmem:[#allocation2 + $0x10] sm:$0xff] %v127_v0 }
  0xef   :  { %134 = vst [vmem:[#allocation2 + $0x18] sm:$0xff] %v129_v4 }
  0xf1   :  { %v230_v5 = vld [vmem:[#allocation2] sm:$0x3]  ;;  %v378_v51 = vld [vmem:[#allocation2] sm:$0xc] }
  0xf2   :  { %v232_v6 = vadd.f32 %v230_v5, %v225_v63  ;;  %v381_v53 = vrot.slane %v378_v51, 2 }
  0xf4   :  { %v1411_v7 = vmul.f32 -1.442695, %v232_v6 }
  0xf6   :  { %1581 = vpow2.f32 %v1411_v7  ;;  %v231_v8 = vld [vmem:[#allocation2 + $0x18] sm:$0xc0]  ;;  %v379_v52 = vld [vmem:[#allocation2 + $0x18] sm:$0x30] }
  0xf7   :  { %v234_v9 = vrot.slane %v231_v8, 6  ;;  %v385_v55 = vrot.slane %v379_v52, 4 }
  0xf9   :  { %v236_v10 = vadd.f32 %v234_v9, %v227_v2 }
  0xfb   :  { %v1412_v11 = vmul.f32 -1.442695, %v236_v10 }
  0xfd   :  { %1583 = vpow2.f32 %v1412_v11 }
  0xfe   :  { %1585 = vtanh.f32 %v232_v6 }
 0x100   :  { %v1582_v12 = vpop.eup %1581 }
 0x101   :  { %v240_v13 = vadd.f32 1.0, %v1582_v12 }
 0x103   :  { %1587 = vrcp.f32 %v240_v13 }
 0x104   :  { %1589 = vtanh.f32 %v236_v10 }
 0x107   :  { %v1584_v15 = vpop.eup %1583 }
 0x108   :  { %v265_v16 = vadd.f32 1.0, %v1584_v15  ;;  %v1586_v18 = vpop.eup %1585 }
 0x10a   :  { %1591 = vrcp.f32 %v265_v16 }
 0x10d   :  { %v1588_v19 = vpop.eup %1587 }
 0x10e   :  { %v244_v20 = vsel %vm1892_vm3, %v1586_v18, %v1588_v19  ;;  %v1590_v22 = vpop.eup %1589 }
 0x10f   :  { %247 = vrot.lane.b32.xlu0 %v244_v20, %s1710_s3  ;;  %v245_v30 = vmul.f32 0.0, %v244_v20 }
 0x114   :  { %v1592_v24 = vpop.eup %1591 }
 0x115   :  { %v269_v25 = vsel %vm1892_vm3, %v1590_v22, %v1592_v24 }
 0x116   :  { %272 = vrot.lane.b32.xlu0 %v269_v25, %s1710_s3  ;;  %v270_v35 = vmul.f32 0.0, %v269_v25 }
 0x181   :  { %v248_v26 = vpop.permute.xlu0 %247 }
 0x182   :  { %v250_v27 = vmul.f32 %v248_v26, %v244_v20 }
 0x184   :  { %252 = vrot.lane.b32.xlu1 %v250_v27, %s1711_s30 }
 0x188   :  { %v273_v28 = vpop.permute.xlu0 %272 }
 0x189   :  { %v275_v29 = vmul.f32 %v273_v28, %v269_v25 }
 0x18b   :  { %277 = vrot.lane.b32.xlu1 %v275_v29, %s1711_s30 }
 0x1f6   :  { %v253_v31 = vpop.permute.xlu1 %252 }
 0x1f7   :  { %v1904_v34 = vadd.f32 %v253_v31, %v245_v30  ;;  %v528_v30 = vld [vmem:[#allocation2] sm:$0x30]  ;;  %v529_v31 = vld [vmem:[#allocation2 + $0x18] sm:$0xc] }
 0x1f9   :  { %1593 = vtanh.f32 %v1904_v34 }
 0x1fd   :  { %v278_v36 = vpop.permute.xlu1 %277 }
 0x1fe   :  { %v1907_v37 = vadd.f32 %v278_v36, %v270_v35  ;;  %v535_v36 = vrot.slane %v529_v31, 2 }
 0x200   :  { %1595 = vtanh.f32 %v1907_v37 }
 0x203   :  { %v1594_v39 = vpop.eup %1593 }
 0x204   :  { %258 = vrot.lane.b32.xlu0 %v1594_v39, %s1710_s3 }
 0x20a   :  { %v1596_v40 = vpop.eup %1595 }
 0x20b   :  { %283 = vrot.lane.b32.xlu1 %v1596_v40, %s1710_s3 }
 0x276   :  { %v259_v41 = vpop.permute.xlu0 %258 }
 0x277   :  { %v261_v42 = vmul.f32 %v259_v41, %v244_v20 }
 0x279   :  { %288 = vrot.lane.b32.xlu0 %v261_v42, %s1711_s30 }
 0x27d   :  { %v284_v43 = vpop.permute.xlu1 %283 }
 0x27e   :  { %v1913_v46 = vmul.f32 %v284_v43, %v269_v25 }
 0x280   :  { %299 = vrot.lane.b32.xlu1 %v1913_v46, %s1710_s3 }
 0x2eb   :  { %v289_v47 = vpop.permute.xlu0 %288 }
 0x2ec   :  { %292 = vst.msk [vmem:[#allocation3] sm:$0x3] %vm291_vm4, %v289_v47 }
 0x2f2   :  { %v300_v48 = vpop.permute.xlu1 %299 }
 0x2f3   :  { %v303_v50 = vsel %vm302_vm5, %v289_v47, %v300_v48 }
 0x2f4   :  { %1413 = vmatmul.mubr.msk.f32.vlgmr.msra.gmra.mrb[4].mxu0 %vm47_vm0, %v303_v50 }
 0x2f5   :  { %1501 = vmatpush1.bf16.msra.mxu0 %v1789_v23  ;;  %671 = vmatprep.mubr.f32.mxu0 %v1709_v3 }
 0x2f6   :  { %1503 = vmatprep.subr.bf16.mxu0 %v1814_v32 }
 0x2f9   :  { %1505 = vmatpush1.bf16.msra.mxu0 %v1816_v33 }
 0x2fa   :  { %1507 = vmatprep.subr.bf16.mxu0 %v1827_v38 }
 0x2fd   :  { %1509 = vmatpush1.bf16.msra.mxu0 %v1843_v44 }
 0x2fe   :  { %1511 = vmatprep.subr.bf16.mxu0 %v1846_v45 }
 0x301   :  { %1513 = vmatpush1.bf16.msra.mxu0 %v1858_v49 }
 0x302   :  { %1531 = vmatprep.subr.bf16.mxu0 %v1784_v21 }
 0x3c7   :  { %v373_v54 = vpop.f32.mrb[4].mxu0 }
 0x3c8   :  { %v383_v56 = vadd.f32 %v381_v53, %v373_v54  ;;  %v375_v57 = vpop.f32.mrb[5].mxu0 }
 0x3c9   :  { %v387_v58 = vadd.f32 %v385_v55, %v375_v57 }
 0x3ca   :  { %v1414_v59 = vmul.f32 -1.442695, %v383_v56 }
 0x3cb   :  { %v1415_v60 = vmul.f32 -1.442695, %v387_v58 }
 0x3cc   :  { %1597 = vpow2.f32 %v1414_v59 }
 0x3cd   :  { %1599 = vpow2.f32 %v1415_v60 }
 0x3ce   :  { %1601 = vtanh.f32 %v383_v56 }
 0x3cf   :  { %1603 = vtanh.f32 %v387_v58 }
 0x3d6   :  { %v1598_v61 = vpop.eup %1597 }
 0x3d7   :  { %v1600_v62 = vpop.eup %1599  ;;  %v391_v63 = vadd.f32 1.0, %v1598_v61 }
 0x3d8   :  { %v416_v0 = vadd.f32 1.0, %v1600_v62  ;;  %v1602_v1 = vpop.eup %1601 }
 0x3d9   :  { %1605 = vrcp.f32 %v391_v63  ;;  %v1604_v2 = vpop.eup %1603 }
 0x3da   :  { %1607 = vrcp.f32 %v416_v0 }
 0x3e3   :  { %v1606_v4 = vpop.eup %1605 }
 0x3e4   :  { %v1608_v5 = vpop.eup %1607  ;;  %v395_v6 = vsel %vm1892_vm3, %v1602_v1, %v1606_v4 }
 0x3e5   :  { %398 = vrot.lane.b32.xlu0 %v395_v6, %s1710_s3  ;;  %v420_v7 = vsel %vm1892_vm3, %v1604_v2, %v1608_v5  ;;  %v396_v12 = vmul.f32 %v395_v6, %v1904_v34  ;;  %v531_v34 = vrot.slane %v528_v30, 4 }
 0x3e6   :  { %423 = vrot.lane.b32.xlu1 %v420_v7, %s1710_s3  ;;  %v421_v14 = vmul.f32 %v420_v7, %v1907_v37 }
 0x457   :  { %v399_v8 = vpop.permute.xlu0 %398 }
 0x458   :  { %v401_v9 = vmul.f32 %v399_v8, %v395_v6  ;;  %v424_v10 = vpop.permute.xlu1 %423 }
 0x459   :  { %v426_v11 = vmul.f32 %v424_v10, %v420_v7 }
 0x45a   :  { %403 = vrot.lane.b32.xlu0 %v401_v9, %s1711_s30 }
 0x45b   :  { %428 = vrot.lane.b32.xlu1 %v426_v11, %s1711_s30 }
 0x4cc   :  { %v404_v13 = vpop.permute.xlu0 %403 }
 0x4cd   :  { %v1939_v15 = vadd.f32 %v404_v13, %v396_v12  ;;  %v429_v16 = vpop.permute.xlu1 %428  ;;  %v678_v13 = vld [vmem:[#allocation2] sm:$0xc0] }
 0x4ce   :  { %v1941_v18 = vadd.f32 %v429_v16, %v421_v14  ;;  %v681_v14 = vrot.slane %v678_v13, 6 }
 0x4cf   :  { %1609 = vtanh.f32 %v1939_v15 }
 0x4d0   :  { %1611 = vtanh.f32 %v1941_v18 }
 0x4d9   :  { %v1610_v19 = vpop.eup %1609 }
 0x4da   :  { %v1612_v20 = vpop.eup %1611  ;;  %409 = vrot.lane.b32.xlu0 %v1610_v19, %s1710_s3  ;;  %v679_v19 = vld [vmem:[#allocation2 + $0x18] sm:$0x3] }
 0x4db   :  { %434 = vrot.lane.b32.xlu1 %v1612_v20, %s1710_s3 }
 0x54c   :  { %v410_v22 = vpop.permute.xlu0 %409 }
 0x54d   :  { %v412_v24 = vmul.f32 %v410_v22, %v395_v6  ;;  %v435_v25 = vpop.permute.xlu1 %434 }
 0x54e   :  { %v1947_v26 = vmul.f32 %v435_v25, %v420_v7 }
 0x54f   :  { %439 = vrot.lane.b32.xlu0 %v412_v24, %s1711_s30 }
 0x550   :  { %450 = vrot.lane.b32.xlu1 %v1947_v26, %s1710_s3 }
 0x5c1   :  { %v440_v27 = vpop.permute.xlu0 %439 }
 0x5c2   :  { %443 = vst.msk [vmem:[#allocation3 + $0x2] sm:$0x3] %vm291_vm4, %v440_v27  ;;  %v451_v28 = vpop.permute.xlu1 %450 }
 0x5c3   :  { %v453_v29 = vsel %vm302_vm5, %v440_v27, %v451_v28 }
 0x5c4   :  { %1416 = vmatmul.mubr.msk.f32.vlgmr.msra.gmra.mrb[2].mxu1 %vm47_vm0, %v453_v29 }
 0x5c5   :  { %1517 = vmatpush1.bf16.msra.mxu1 %v1789_v23  ;;  %818 = vmatprep.mubr.f32.mxu1 %v1709_v3 }
 0x5c6   :  { %1519 = vmatprep.subr.bf16.mxu1 %v1814_v32 }
 0x5c9   :  { %1521 = vmatpush1.bf16.msra.mxu1 %v1816_v33 }
 0x5ca   :  { %1523 = vmatprep.subr.bf16.mxu1 %v1827_v38 }
 0x5cd   :  { %1525 = vmatpush1.bf16.msra.mxu1 %v1843_v44 }
 0x5ce   :  { %1527 = vmatprep.subr.bf16.mxu1 %v1846_v45 }
 0x5d1   :  { %1529 = vmatpush1.bf16.msra.mxu1 %v1858_v49 }
 0x5d2   :  { %1547 = vmatprep.subr.bf16.mxu1 %v1784_v21 }
 0x697   :  { %v523_v35 = vpop.f32.mrb[2].mxu1 }
 0x698   :  { %v533_v37 = vadd.f32 %v531_v34, %v523_v35  ;;  %v525_v39 = vpop.f32.mrb[3].mxu1 }
 0x699   :  { %v537_v40 = vadd.f32 %v535_v36, %v525_v39 }
 0x69a   :  { %v1417_v41 = vmul.f32 -1.442695, %v533_v37 }
 0x69b   :  { %v1418_v42 = vmul.f32 -1.442695, %v537_v40 }
 0x69c   :  { %1613 = vpow2.f32 %v1417_v41 }
 0x69d   :  { %1615 = vpow2.f32 %v1418_v42 }
 0x69e   :  { %1617 = vtanh.f32 %v533_v37 }
 0x69f   :  { %1619 = vtanh.f32 %v537_v40 }
 0x6a6   :  { %v1614_v43 = vpop.eup %1613 }
 0x6a7   :  { %v1616_v47 = vpop.eup %1615  ;;  %v541_v48 = vadd.f32 1.0, %v1614_v43 }
 0x6a8   :  { %v566_v50 = vadd.f32 1.0, %v1616_v47  ;;  %v1618_v51 = vpop.eup %1617 }
 0x6a9   :  { %1621 = vrcp.f32 %v541_v48  ;;  %v1620_v52 = vpop.eup %1619 }
 0x6aa   :  { %1623 = vrcp.f32 %v566_v50 }
 0x6b3   :  { %v1622_v53 = vpop.eup %1621 }
 0x6b4   :  { %v1624_v54 = vpop.eup %1623  ;;  %v545_v55 = vsel %vm1892_vm3, %v1618_v51, %v1622_v53 }
 0x6b5   :  { %548 = vrot.lane.b32.xlu0 %v545_v55, %s1710_s3  ;;  %v570_v56 = vsel %vm1892_vm3, %v1620_v52, %v1624_v54  ;;  %v546_v61 = vmul.f32 %v545_v55, %v1939_v15 }
 0x6b6   :  { %573 = vrot.lane.b32.xlu1 %v570_v56, %s1710_s3  ;;  %v571_v63 = vmul.f32 %v570_v56, %v1941_v18 }
 0x727   :  { %v549_v57 = vpop.permute.xlu0 %548 }
 0x728   :  { %v551_v58 = vmul.f32 %v549_v57, %v545_v55  ;;  %v574_v59 = vpop.permute.xlu1 %573 }
 0x729   :  { %v576_v60 = vmul.f32 %v574_v59, %v570_v56 }
 0x72a   :  { %553 = vrot.lane.b32.xlu0 %v551_v58, %s1711_s30 }
 0x72b   :  { %578 = vrot.lane.b32.xlu1 %v576_v60, %s1711_s30 }
 0x79c   :  { %v554_v62 = vpop.permute.xlu0 %553 }
 0x79d   :  { %v556_v0 = vadd.f32 %v554_v62, %v546_v61  ;;  %v579_v1 = vpop.permute.xlu1 %578  ;;  %v826_v61 = vld [vmem:[#allocation2 + $0x8] sm:$0xc0] }
 0x79e   :  { %v581_v2 = vadd.f32 %v579_v1, %v571_v63  ;;  %v825_v63 = vld [vmem:[#allocation2 + $0x10] sm:$0x3] }
 0x79f   :  { %1625 = vtanh.f32 %v556_v0 }
 0x7a0   :  { %1627 = vtanh.f32 %v581_v2 }
 0x7a9   :  { %v1626_v4 = vpop.eup %1625 }
 0x7aa   :  { %v1628_v5 = vpop.eup %1627  ;;  %559 = vrot.lane.b32.xlu0 %v1626_v4, %s1710_s3 }
 0x7ab   :  { %584 = vrot.lane.b32.xlu1 %v1628_v5, %s1710_s3 }
 0x81c   :  { %v560_v6 = vpop.permute.xlu0 %559 }
 0x81d   :  { %v562_v7 = vmul.f32 %v560_v6, %v545_v55  ;;  %v585_v8 = vpop.permute.xlu1 %584 }
 0x81e   :  { %v1976_v9 = vmul.f32 %v585_v8, %v570_v56 }
 0x81f   :  { %589 = vrot.lane.b32.xlu0 %v562_v7, %s1711_s30 }
 0x820   :  { %600 = vrot.lane.b32.xlu1 %v1976_v9, %s1710_s3 }
 0x891   :  { %v590_v10 = vpop.permute.xlu0 %589 }
 0x892   :  { %593 = vst.msk [vmem:[#allocation3 + $0x4] sm:$0x3] %vm291_vm4, %v590_v10  ;;  %v601_v11 = vpop.permute.xlu1 %600 }
 0x893   :  { %v603_v12 = vsel %vm302_vm5, %v590_v10, %v601_v11 }
 0x894   :  { %1419 = vmatmul.mubr.msk.f32.vlgmr.msra.gmra.mrb[6].mxu0 %vm47_vm0, %v603_v12 }
 0x895   :  { %1533 = vmatpush1.bf16.msra.mxu0 %v1789_v23  ;;  %965 = vmatprep.mubr.f32.mxu0 %v1709_v3 }
 0x896   :  { %1535 = vmatprep.subr.bf16.mxu0 %v1814_v32 }
 0x899   :  { %1537 = vmatpush1.bf16.msra.mxu0 %v1816_v33 }
 0x89a   :  { %1539 = vmatprep.subr.bf16.mxu0 %v1827_v38 }
 0x89d   :  { %1541 = vmatpush1.bf16.msra.mxu0 %v1843_v44 }
 0x89e   :  { %1543 = vmatprep.subr.bf16.mxu0 %v1846_v45 }
 0x8a1   :  { %1545 = vmatpush1.bf16.msra.mxu0 %v1858_v49 }
 0x8a2   :  { %1563 = vmatprep.subr.bf16.mxu0 %v1784_v21 }
 0x967   :  { %v673_v15 = vpop.f32.mrb[6].mxu0 }
 0x968   :  { %v683_v16 = vadd.f32 %v681_v14, %v673_v15  ;;  %v675_v18 = vpop.f32.mrb[7].mxu0 }
 0x969   :  { %v684_v20 = vadd.f32 %v679_v19, %v675_v18 }
 0x96a   :  { %v1420_v22 = vmul.f32 -1.442695, %v683_v16 }
 0x96b   :  { %v1421_v24 = vmul.f32 -1.442695, %v684_v20 }
 0x96c   :  { %1629 = vpow2.f32 %v1420_v22 }
 0x96d   :  { %1631 = vpow2.f32 %v1421_v24 }
 0x96e   :  { %1633 = vtanh.f32 %v683_v16 }
 0x96f   :  { %1635 = vtanh.f32 %v684_v20 }
 0x976   :  { %v1630_v25 = vpop.eup %1629 }
 0x977   :  { %v1632_v27 = vpop.eup %1631  ;;  %v688_v28 = vadd.f32 1.0, %v1630_v25 }
 0x978   :  { %v713_v29 = vadd.f32 1.0, %v1632_v27  ;;  %v1634_v21 = vpop.eup %1633 }
 0x979   :  { %1637 = vrcp.f32 %v688_v28  ;;  %v1636_v30 = vpop.eup %1635 }
 0x97a   :  { %1639 = vrcp.f32 %v713_v29 }
 0x983   :  { %v1638_v31 = vpop.eup %1637 }
 0x984   :  { %v1640_v34 = vpop.eup %1639  ;;  %v692_v35 = vsel %vm1892_vm3, %v1634_v21, %v1638_v31 }
 0x985   :  { %695 = vrot.lane.b32.xlu0 %v692_v35, %s1710_s3  ;;  %v717_v36 = vsel %vm1892_vm3, %v1636_v30, %v1640_v34  ;;  %v693_v42 = vmul.f32 %v692_v35, %v556_v0  ;;  %v829_v0 = vrot.slane %v826_v61, 6 }
 0x986   :  { %720 = vrot.lane.b32.xlu1 %v717_v36, %s1710_s3  ;;  %v718_v47 = vmul.f32 %v717_v36, %v581_v2 }
 0x9f7   :  { %v696_v37 = vpop.permute.xlu0 %695 }
 0x9f8   :  { %v698_v39 = vmul.f32 %v696_v37, %v692_v35  ;;  %v721_v40 = vpop.permute.xlu1 %720 }
 0x9f9   :  { %v723_v41 = vmul.f32 %v721_v40, %v717_v36 }
 0x9fa   :  { %700 = vrot.lane.b32.xlu0 %v698_v39, %s1711_s30 }
 0x9fb   :  { %725 = vrot.lane.b32.xlu1 %v723_v41, %s1711_s30 }
 0xa6c   :  { %v701_v43 = vpop.permute.xlu0 %700 }
 0xa6d   :  { %v703_v48 = vadd.f32 %v701_v43, %v693_v42  ;;  %v726_v50 = vpop.permute.xlu1 %725  ;;  %v972_v43 = vld [vmem:[#allocation2 + $0x10] sm:$0xc] }
 0xa6e   :  { %v728_v51 = vadd.f32 %v726_v50, %v718_v47  ;;  %v973_v47 = vld [vmem:[#allocation2 + $0x8] sm:$0x30] }
 0xa6f   :  { %1641 = vtanh.f32 %v703_v48 }
 0xa70   :  { %1643 = vtanh.f32 %v728_v51 }
 0xa79   :  { %v1642_v52 = vpop.eup %1641 }
 0xa7a   :  { %v1644_v53 = vpop.eup %1643  ;;  %706 = vrot.lane.b32.xlu0 %v1642_v52, %s1710_s3 }
 0xa7b   :  { %731 = vrot.lane.b32.xlu1 %v1644_v53, %s1710_s3 }
 0xaec   :  { %v707_v54 = vpop.permute.xlu0 %706 }
 0xaed   :  { %v709_v55 = vmul.f32 %v707_v54, %v692_v35  ;;  %v732_v56 = vpop.permute.xlu1 %731 }
 0xaee   :  { %v2003_v57 = vmul.f32 %v732_v56, %v717_v36 }
 0xaef   :  { %736 = vrot.lane.b32.xlu0 %v709_v55, %s1711_s30 }
 0xaf0   :  { %747 = vrot.lane.b32.xlu1 %v2003_v57, %s1710_s3 }
 0xb61   :  { %v737_v58 = vpop.permute.xlu0 %736 }
 0xb62   :  { %740 = vst.msk [vmem:[#allocation3 + $0x6] sm:$0x3] %vm291_vm4, %v737_v58  ;;  %v748_v59 = vpop.permute.xlu1 %747 }
 0xb63   :  { %v750_v60 = vsel %vm302_vm5, %v737_v58, %v748_v59 }
 0xb64   :  { %1422 = vmatmul.mubr.msk.f32.vlgmr.msra.gmra.mrb[4].mxu1 %vm47_vm0, %v750_v60 }
 0xb65   :  { %1549 = vmatpush1.bf16.msra.mxu1 %v1789_v23  ;;  %1115 = vmatprep.mubr.f32.mxu1 %v1709_v3 }
 0xb66   :  { %1551 = vmatprep.subr.bf16.mxu1 %v1814_v32 }
 0xb69   :  { %1553 = vmatpush1.bf16.msra.mxu1 %v1816_v33 }
 0xb6a   :  { %1555 = vmatprep.subr.bf16.mxu1 %v1827_v38 }
 0xb6d   :  { %1557 = vmatpush1.bf16.msra.mxu1 %v1843_v44 }
 0xb6e   :  { %1559 = vmatprep.subr.bf16.mxu1 %v1846_v45 }
 0xb71   :  { %1561 = vmatpush1.bf16.msra.mxu1 %v1858_v49 }
 0xc37   :  { %v820_v62 = vpop.f32.mrb[4].mxu1 }
 0xc38   :  { %v827_v1 = vadd.f32 %v825_v63, %v820_v62  ;;  %v822_v2 = vpop.f32.mrb[5].mxu1 }
 0xc39   :  { %v831_v4 = vadd.f32 %v829_v0, %v822_v2 }
 0xc3a   :  { %v1423_v5 = vmul.f32 -1.442695, %v827_v1 }
 0xc3b   :  { %v1424_v6 = vmul.f32 -1.442695, %v831_v4 }
 0xc3c   :  { %1645 = vpow2.f32 %v1423_v5 }
 0xc3d   :  { %1647 = vpow2.f32 %v1424_v6 }
 0xc3e   :  { %1649 = vtanh.f32 %v827_v1 }
 0xc3f   :  { %1651 = vtanh.f32 %v831_v4 }
 0xc46   :  { %v1646_v7 = vpop.eup %1645 }
 0xc47   :  { %v1648_v8 = vpop.eup %1647  ;;  %v835_v10 = vadd.f32 1.0, %v1646_v7 }
 0xc48   :  { %v860_v11 = vadd.f32 1.0, %v1648_v8  ;;  %v1650_v12 = vpop.eup %1649 }
 0xc49   :  { %1653 = vrcp.f32 %v835_v10  ;;  %v1652_v13 = vpop.eup %1651 }
 0xc4a   :  { %1655 = vrcp.f32 %v860_v11 }
 0xc53   :  { %v1654_v14 = vpop.eup %1653 }
 0xc54   :  { %v1656_v15 = vpop.eup %1655  ;;  %v839_v16 = vsel %vm1892_vm3, %v1650_v12, %v1654_v14 }
 0xc55   :  { %842 = vrot.lane.b32.xlu0 %v839_v16, %s1710_s3  ;;  %v864_v18 = vsel %vm1892_vm3, %v1652_v13, %v1656_v15  ;;  %v840_v25 = vmul.f32 %v839_v16, %v703_v48  ;;  %v975_v48 = vrot.slane %v972_v43, 2 }
 0xc56   :  { %867 = vrot.lane.b32.xlu1 %v864_v18, %s1710_s3  ;;  %v865_v28 = vmul.f32 %v864_v18, %v728_v51  ;;  %v979_v51 = vrot.slane %v973_v47, 4 }
 0xcc7   :  { %v843_v19 = vpop.permute.xlu0 %842 }
 0xcc8   :  { %v845_v20 = vmul.f32 %v843_v19, %v839_v16  ;;  %v868_v22 = vpop.permute.xlu1 %867  ;;  %v1123_v19 = vld [vmem:[#allocation2 + $0x8] sm:$0xc] }
 0xcc9   :  { %v870_v24 = vmul.f32 %v868_v22, %v864_v18 }
 0xcca   :  { %847 = vrot.lane.b32.xlu0 %v845_v20, %s1711_s30 }
 0xccb   :  { %872 = vrot.lane.b32.xlu1 %v870_v24, %s1711_s30  ;;  %v1129_v24 = vrot.slane %v1123_v19, 2 }
 0xd3c   :  { %v848_v27 = vpop.permute.xlu0 %847 }
 0xd3d   :  { %v850_v29 = vadd.f32 %v848_v27, %v840_v25  ;;  %v873_v21 = vpop.permute.xlu1 %872 }
 0xd3e   :  { %v875_v30 = vadd.f32 %v873_v21, %v865_v28 }
 0xd3f   :  { %1657 = vtanh.f32 %v850_v29 }
 0xd40   :  { %1659 = vtanh.f32 %v875_v30 }
 0xd49   :  { %v1658_v31 = vpop.eup %1657 }
 0xd4a   :  { %v1660_v34 = vpop.eup %1659  ;;  %853 = vrot.lane.b32.xlu0 %v1658_v31, %s1710_s3 }
 0xd4b   :  { %878 = vrot.lane.b32.xlu1 %v1660_v34, %s1710_s3 }
 0xdbc   :  { %v854_v35 = vpop.permute.xlu0 %853 }
 0xdbd   :  { %v856_v36 = vmul.f32 %v854_v35, %v839_v16  ;;  %v879_v37 = vpop.permute.xlu1 %878 }
 0xdbe   :  { %v2029_v39 = vmul.f32 %v879_v37, %v864_v18  ;;  %v1122_v18 = vld [vmem:[#allocation2 + $0x10] sm:$0x30] }
 0xdbf   :  { %883 = vrot.lane.b32.xlu0 %v856_v36, %s1711_s30  ;;  %v1125_v20 = vrot.slane %v1122_v18, 4 }
 0xdc0   :  { %894 = vrot.lane.b32.xlu1 %v2029_v39, %s1710_s3 }
 0xe31   :  { %v884_v40 = vpop.permute.xlu0 %883 }
 0xe32   :  { %887 = vst.msk [vmem:[#allocation3 + $0x8] sm:$0x3] %vm291_vm4, %v884_v40  ;;  %v895_v41 = vpop.permute.xlu1 %894 }
 0xe33   :  { %v897_v42 = vsel %vm302_vm5, %v884_v40, %v895_v41 }
 0xe34   :  { %1425 = vmatmul.mubr.msk.f32.vlgmr.msra.gmra.mrb[8].mxu0 %vm47_vm0, %v897_v42 }
 0xe35   :  { %1565 = vmatpush1.bf16.msra.mxu0 %v1789_v23  ;;  %1265 = vmatprep.mubr.f32.mxu0 %v1709_v3 }
 0xe36   :  { %1567 = vmatprep.subr.bf16.mxu0 %v1814_v32 }
 0xe39   :  { %1569 = vmatpush1.bf16.msra.mxu0 %v1816_v33 }
 0xe3a   :  { %1571 = vmatprep.subr.bf16.mxu0 %v1827_v38 }
 0xe3d   :  { %1573 = vmatpush1.bf16.msra.mxu0 %v1843_v44 }
 0xe3e   :  { %1575 = vmatprep.subr.bf16.mxu0 %v1846_v45 }
 0xe41   :  { %1577 = vmatpush1.bf16.msra.mxu0 %v1858_v49 }
 0xf07   :  { %v967_v50 = vpop.f32.mrb[8].mxu0 }
 0xf08   :  { %v977_v23 = vadd.f32 %v975_v48, %v967_v50  ;;  %v969_v52 = vpop.f32.mrb[9].mxu0 }
 0xf09   :  { %v981_v3 = vadd.f32 %v979_v51, %v969_v52 }
 0xf0a   :  { %v1426_v53 = vmul.f32 -1.442695, %v977_v23 }
 0xf0b   :  { %v1427_v32 = vmul.f32 -1.442695, %v981_v3 }
 0xf0c   :  { %1661 = vpow2.f32 %v1426_v53 }
 0xf0d   :  { %1663 = vpow2.f32 %v1427_v32 }
 0xf0e   :  { %1665 = vtanh.f32 %v977_v23 }
 0xf0f   :  { %1667 = vtanh.f32 %v981_v3 }
 0xf16   :  { %v1662_v33 = vpop.eup %1661 }
 0xf17   :  { %v1664_v38 = vpop.eup %1663  ;;  %v985_v54 = vadd.f32 1.0, %v1662_v33 }
 0xf18   :  { %v1010_v44 = vadd.f32 1.0, %v1664_v38  ;;  %v1666_v45 = vpop.eup %1665 }
 0xf19   :  { %1669 = vrcp.f32 %v985_v54  ;;  %v1668_v49 = vpop.eup %1667 }
 0xf1a   :  { %1671 = vrcp.f32 %v1010_v44 }
 0xf23   :  { %v1670_v55 = vpop.eup %1669 }
 0xf24   :  { %v1672_v56 = vpop.eup %1671  ;;  %v989_v58 = vsel %vm1892_vm3, %v1666_v45, %v1670_v55 }
 0xf25   :  { %992 = vrot.lane.b32.xlu0 %v989_v58, %s1710_s3  ;;  %v1014_v59 = vsel %vm1892_vm3, %v1668_v49, %v1672_v56  ;;  %v990_v0 = vmul.f32 %v989_v58, %v850_v29 }
 0xf26   :  { %1017 = vrot.lane.b32.xlu1 %v1014_v59, %s1710_s3  ;;  %v1015_v2 = vmul.f32 %v1014_v59, %v875_v30 }
 0xf97   :  { %v993_v60 = vpop.permute.xlu0 %992 }
 0xf98   :  { %v995_v61 = vmul.f32 %v993_v60, %v989_v58  ;;  %v1018_v62 = vpop.permute.xlu1 %1017  ;;  %v1272_v60 = vld [vmem:[#allocation2 + $0x10] sm:$0xc0] }
 0xf99   :  { %v1020_v63 = vmul.f32 %v1018_v62, %v1014_v59 }
 0xf9a   :  { %997 = vrot.lane.b32.xlu0 %v995_v61, %s1711_s30  ;;  %v1275_v61 = vrot.slane %v1272_v60, 6 }
 0xf9b   :  { %1022 = vrot.lane.b32.xlu1 %v1020_v63, %s1711_s30 }
0x100c   :  { %v998_v1 = vpop.permute.xlu0 %997 }
0x100d   :  { %v1000_v4 = vadd.f32 %v998_v1, %v990_v0  ;;  %v1023_v5 = vpop.permute.xlu1 %1022  ;;  %v1273_v1 = vld [vmem:[#allocation2 + $0x8] sm:$0x3] }
0x100e   :  { %v1025_v6 = vadd.f32 %v1023_v5, %v1015_v2 }
0x100f   :  { %1673 = vtanh.f32 %v1000_v4 }
0x1010   :  { %1675 = vtanh.f32 %v1025_v6 }
0x1019   :  { %v1674_v7 = vpop.eup %1673 }
0x101a   :  { %v1676_v8 = vpop.eup %1675  ;;  %1003 = vrot.lane.b32.xlu0 %v1674_v7, %s1710_s3 }
0x101b   :  { %1028 = vrot.lane.b32.xlu1 %v1676_v8, %s1710_s3 }
0x108c   :  { %v1004_v10 = vpop.permute.xlu0 %1003 }
0x108d   :  { %v1006_v11 = vmul.f32 %v1004_v10, %v989_v58  ;;  %v1029_v12 = vpop.permute.xlu1 %1028 }
0x108e   :  { %v2055_v13 = vmul.f32 %v1029_v12, %v1014_v59 }
0x108f   :  { %1033 = vrot.lane.b32.xlu0 %v1006_v11, %s1711_s30 }
0x1090   :  { %1044 = vrot.lane.b32.xlu1 %v2055_v13, %s1710_s3 }
0x1101   :  { %v1034_v14 = vpop.permute.xlu0 %1033 }
0x1102   :  { %1037 = vst.msk [vmem:[#allocation3 + $0xa] sm:$0x3] %vm291_vm4, %v1034_v14  ;;  %v1045_v15 = vpop.permute.xlu1 %1044 }
0x1103   :  { %v1047_v16 = vsel %vm302_vm5, %v1034_v14, %v1045_v15 }
0x1104   :  { %1428 = vmatmul.mubr.msk.f32.vlgmr.msra.gmra.mrb[6].mxu1 %vm47_vm0, %v1047_v16 }
0x1109   :  { %v1345_v60 = vld [vmem:[#allocation3 + $0xa] sm:$0x3] }
0x11d7   :  { %v1117_v22 = vpop.f32.mrb[6].mxu1 }
0x11d8   :  { %v1127_v25 = vadd.f32 %v1125_v20, %v1117_v22  ;;  %v1119_v27 = vpop.f32.mrb[7].mxu1 }
0x11d9   :  { %v1131_v28 = vadd.f32 %v1129_v24, %v1119_v27 }
0x11da   :  { %v1429_v29 = vmul.f32 -1.442695, %v1127_v25 }
0x11db   :  { %v1430_v21 = vmul.f32 -1.442695, %v1131_v28 }
0x11dc   :  { %1677 = vpow2.f32 %v1429_v29 }
0x11dd   :  { %1679 = vpow2.f32 %v1430_v21 }
0x11de   :  { %1681 = vtanh.f32 %v1127_v25 }
0x11df   :  { %1683 = vtanh.f32 %v1131_v28 }
0x11e6   :  { %v1678_v30 = vpop.eup %1677 }
0x11e7   :  { %v1680_v31 = vpop.eup %1679  ;;  %v1135_v34 = vadd.f32 1.0, %v1678_v30 }
0x11e8   :  { %v1160_v35 = vadd.f32 1.0, %v1680_v31  ;;  %v1682_v36 = vpop.eup %1681 }
0x11e9   :  { %1685 = vrcp.f32 %v1135_v34  ;;  %v1684_v37 = vpop.eup %1683 }
0x11ea   :  { %1687 = vrcp.f32 %v1160_v35 }
0x11f3   :  { %v1686_v40 = vpop.eup %1685 }
0x11f4   :  { %v1688_v41 = vpop.eup %1687  ;;  %v1139_v42 = vsel %vm1892_vm3, %v1682_v36, %v1686_v40 }
0x11f5   :  { %1142 = vrot.lane.b32.xlu0 %v1139_v42, %s1710_s3  ;;  %v1164_v43 = vsel %vm1892_vm3, %v1684_v37, %v1688_v41  ;;  %v1140_v23 = vmul.f32 %v1139_v42, %v1000_v4 }
0x11f6   :  { %1167 = vrot.lane.b32.xlu1 %v1164_v43, %s1710_s3  ;;  %v1165_v3 = vmul.f32 %v1164_v43, %v1025_v6 }
0x1267   :  { %v1143_v47 = vpop.permute.xlu0 %1142 }
0x1268   :  { %v1145_v48 = vmul.f32 %v1143_v47, %v1139_v42  ;;  %v1168_v50 = vpop.permute.xlu1 %1167 }
0x1269   :  { %v1170_v51 = vmul.f32 %v1168_v50, %v1164_v43 }
0x126a   :  { %1147 = vrot.lane.b32.xlu0 %v1145_v48, %s1711_s30 }
0x126b   :  { %1172 = vrot.lane.b32.xlu1 %v1170_v51, %s1711_s30 }
0x12dc   :  { %v1148_v52 = vpop.permute.xlu0 %1147 }
0x12dd   :  { %v1150_v53 = vadd.f32 %v1148_v52, %v1140_v23  ;;  %v1173_v32 = vpop.permute.xlu1 %1172 }
0x12de   :  { %v1175_v33 = vadd.f32 %v1173_v32, %v1165_v3 }
0x12df   :  { %1689 = vtanh.f32 %v1150_v53 }
0x12e0   :  { %1691 = vtanh.f32 %v1175_v33 }
0x12e9   :  { %v1690_v38 = vpop.eup %1689 }
0x12ea   :  { %v1692_v54 = vpop.eup %1691  ;;  %1153 = vrot.lane.b32.xlu0 %v1690_v38, %s1710_s3  ;;  %v1344_v38 = vld [vmem:[#allocation3 + $0x8] sm:$0x3] }
0x12eb   :  { %1178 = vrot.lane.b32.xlu1 %v1692_v54, %s1710_s3 }
0x135c   :  { %v1154_v44 = vpop.permute.xlu0 %1153 }
0x135d   :  { %v1156_v45 = vmul.f32 %v1154_v44, %v1139_v42  ;;  %v1179_v49 = vpop.permute.xlu1 %1178 }
0x135e   :  { %v1181_v55 = vmul.f32 %v1179_v49, %v1164_v43 }
0x135f   :  { %1183 = vrot.lane.b32.xlu0 %v1156_v45, %s1711_s30  ;;  %v1341_v45 = vld [vmem:[#allocation3 + $0x2] sm:$0x3] }
0x1360   :  { %1194 = vrot.lane.b32.xlu1 %v1181_v55, %s1710_s3 }
0x13d1   :  { %v1184_v56 = vpop.permute.xlu0 %1183 }
0x13d2   :  { %1187 = vst.msk [vmem:[#allocation3 + $0xc] sm:$0x3] %vm291_vm4, %v1184_v56  ;;  %v1195_v58 = vpop.permute.xlu1 %1194 }
0x13d3   :  { %v1197_v59 = vsel %vm302_vm5, %v1184_v56, %v1195_v58  ;;  %v1343_v56 = vld [vmem:[#allocation3 + $0x6] sm:$0x3] }
0x13d4   :  { %1431 = vmatmul.mubr.msk.f32.vlgmr.msra.gmra.mrb[10].mxu0 %vm47_vm0, %v1197_v59 }
0x14a7   :  { %v1267_v62 = vpop.f32.mrb[10].mxu0 }
0x14a8   :  { %v1277_v63 = vadd.f32 %v1275_v61, %v1267_v62  ;;  %v1269_v0 = vpop.f32.mrb[11].mxu0 }
0x14a9   :  { %v1278_v2 = vadd.f32 %v1273_v1, %v1269_v0 }
0x14aa   :  { %v1432_v4 = vmul.f32 -1.442695, %v1277_v63 }
0x14ab   :  { %v1433_v5 = vmul.f32 -1.442695, %v1278_v2 }
0x14ac   :  { %1693 = vpow2.f32 %v1432_v4  ;;  %v1340_v4 = vld [vmem:[#allocation3] sm:$0x3] }
0x14ad   :  { %1695 = vpow2.f32 %v1433_v5 }
0x14ae   :  { %1697 = vtanh.f32 %v1277_v63 }
0x14af   :  { %1699 = vtanh.f32 %v1278_v2 }
0x14b6   :  { %v1694_v6 = vpop.eup %1693 }
0x14b7   :  { %v1696_v7 = vpop.eup %1695  ;;  %v1282_v8 = vadd.f32 1.0, %v1694_v6  ;;  %v1346_v6 = vld [vmem:[#allocation3 + $0xc] sm:$0x3] }
0x14b8   :  { %v1307_v10 = vadd.f32 1.0, %v1696_v7  ;;  %v1698_v11 = vpop.eup %1697 }
0x14b9   :  { %1701 = vrcp.f32 %v1282_v8  ;;  %v1700_v12 = vpop.eup %1699 }
0x14ba   :  { %1703 = vrcp.f32 %v1307_v10 }
0x14c3   :  { %v1702_v14 = vpop.eup %1701 }
0x14c4   :  { %v1704_v15 = vpop.eup %1703  ;;  %v1286_v16 = vsel %vm1892_vm3, %v1698_v11, %v1702_v14 }
0x14c5   :  { %1289 = vrot.lane.b32.xlu1 %v1286_v16, %s1710_s3  ;;  %v1311_v18 = vsel %vm1892_vm3, %v1700_v12, %v1704_v15  ;;  %v1287_v25 = vmul.f32 %v1286_v16, %v1150_v53  ;;  %v1342_v53 = vld [vmem:[#allocation3 + $0x4] sm:$0x3] }
0x14c6   :  { %1314 = vrot.lane.b32.xlu0 %v1311_v18, %s1710_s3  ;;  %v1312_v28 = vmul.f32 %v1311_v18, %v1175_v33 }
0x1537   :  { %v1290_v19 = vpop.permute.xlu1 %1289 }
0x1538   :  { %v1292_v20 = vmul.f32 %v1290_v19, %v1286_v16  ;;  %v1315_v22 = vpop.permute.xlu0 %1314 }
0x1539   :  { %v1317_v24 = vmul.f32 %v1315_v22, %v1311_v18 }
0x153a   :  { %1294 = vrot.lane.b32.xlu1 %v1292_v20, %s1711_s30 }
0x153b   :  { %1319 = vrot.lane.b32.xlu0 %v1317_v24, %s1711_s30 }
0x15ac   :  { %v1295_v27 = vpop.permute.xlu1 %1294 }
0x15ad   :  { %v1297_v29 = vadd.f32 %v1295_v27, %v1287_v25  ;;  %v1320_v21 = vpop.permute.xlu0 %1319 }
0x15ae   :  { %v1322_v30 = vadd.f32 %v1320_v21, %v1312_v28 }
0x15af   :  { %1705 = vtanh.f32 %v1297_v29 }
0x15b0   :  { %1707 = vtanh.f32 %v1322_v30 }
0x15b9   :  { %v1706_v17 = vpop.eup %1705 }
0x15ba   :  { %v1708_v31 = vpop.eup %1707  ;;  %1300 = vrot.lane.b32.xlu1 %v1706_v17, %s1710_s3 }
0x15bb   :  { %1325 = vrot.lane.b32.xlu0 %v1708_v31, %s1710_s3 }
0x15be   :  { %445 = vrot.lane.b32.xlu1 %v1947_v26, %s1711_s30 }
0x15bf   :  { %294 = vrot.lane.b32.xlu0 %v1913_v46, %s1711_s30 }
0x15c2   :  { %742 = vrot.lane.b32.xlu1 %v2003_v57, %s1711_s30 }
0x15c3   :  { %595 = vrot.lane.b32.xlu0 %v1976_v9, %s1711_s30 }
0x15c6   :  { %1039 = vrot.lane.b32.xlu1 %v2055_v13, %s1711_s30 }
0x15c7   :  { %889 = vrot.lane.b32.xlu0 %v2029_v39, %s1711_s30 }
0x15cb   :  { %1189 = vrot.lane.b32.xlu0 %v1181_v55, %s1711_s30 }
0x162c   :  { %v1301_v34 = vpop.permute.xlu1 %1300 }
0x162d   :  { %v1303_v35 = vmul.f32 %v1301_v34, %v1286_v16  ;;  %v1326_v26 = vpop.permute.xlu0 %1325 }
0x162e   :  { %v1328_v36 = vmul.f32 %v1326_v26, %v1311_v18 }
0x162f   :  { %1330 = vrot.lane.b32.xlu0 %v1303_v35, %s1711_s30 }
0x1630   :  { %v446_v46 = vpop.permute.xlu1 %445  ;;  %1336 = vrot.lane.b32.xlu1 %v1328_v36, %s1711_s30 }
0x1631   :  { %449 = vst.msk [vmem:[#allocation4 + $0xc] sm:$0x3] %vm291_vm4, %v446_v46  ;;  %v295_v9 = vpop.permute.xlu0 %294 }
0x1632   :  { %298 = vst.msk [vmem:[#allocation4 + $0xe] sm:$0x3] %vm291_vm4, %v295_v9 }
0x1634   :  { %v743_v57 = vpop.permute.xlu1 %742 }
0x1635   :  { %746 = vst.msk [vmem:[#allocation4 + $0x8] sm:$0x3] %vm291_vm4, %v743_v57  ;;  %v596_v39 = vpop.permute.xlu0 %595 }
0x1636   :  { %599 = vst.msk [vmem:[#allocation4 + $0xa] sm:$0x3] %vm291_vm4, %v596_v39 }
0x1638   :  { %v1040_v13 = vpop.permute.xlu1 %1039  ;;  %v1354_v3 = vld [vmem:[#allocation4 + $0xc] sm:$0x3] }
0x1639   :  { %1043 = vst.msk [vmem:[#allocation4 + $0x4] sm:$0x3] %vm291_vm4, %v1040_v13  ;;  %v890_v37 = vpop.permute.xlu0 %889  ;;  %v1355_v50 = vld [vmem:[#allocation4 + $0xe] sm:$0x3] }
0x163a   :  { %893 = vst.msk [vmem:[#allocation4 + $0x6] sm:$0x3] %vm291_vm4, %v890_v37 }
0x163c   :  { %v1352_v42 = vld [vmem:[#allocation4 + $0x8] sm:$0x3] }
0x163d   :  { %v1190_v40 = vpop.permute.xlu0 %1189  ;;  %v1353_v48 = vld [vmem:[#allocation4 + $0xa] sm:$0x3] }
0x163e   :  { %1193 = vst.msk [vmem:[#allocation4 + $0x2] sm:$0x3] %vm291_vm4, %v1190_v40 }
0x1640   :  { %v1350_v41 = vld [vmem:[#allocation4 + $0x4] sm:$0x3] }
0x1641   :  { %1368 = vrot.lane.b32.xlu1 %v1350_v41, %s1711_s30  ;;  %v1351_v47 = vld [vmem:[#allocation4 + $0x6] sm:$0x3] }
0x1645   :  { %1372 = vrot.lane.b32.xlu1 %v1352_v42, %s1711_s30  ;;  %v1349_v43 = vld [vmem:[#allocation4 + $0x2] sm:$0x3] }
0x1646   :  { %1366 = vrot.lane.b32.xlu0 %v1349_v43, %s1711_s30 }
0x164a   :  { %1370 = vrot.lane.b32.xlu0 %v1351_v47, %s1711_s30 }
0x164e   :  { %1374 = vrot.lane.b32.xlu0 %v1353_v48, %s1711_s30 }
0x1652   :  { %1378 = vrot.lane.b32.xlu0 %v1355_v50, %s1711_s30 }
0x16a1   :  { %v1331_v51 = vpop.permute.xlu0 %1330 }
0x16a2   :  { %1334 = vst.msk [vmem:[#allocation3 + $0xe] sm:$0x3] %vm291_vm4, %v1331_v51  ;;  %v1337_v23 = vpop.permute.xlu1 %1336 }
0x16a3   :  { %1339 = vst.msk [vmem:[#allocation4] sm:$0x3] %vm291_vm4, %v1337_v23 }
0x16a9   :  { %v1347_v63 = vld [vmem:[#allocation3 + $0xe] sm:$0x3] }
0x16aa   :  { %v1348_v52 = vld [vmem:[#allocation4] sm:$0x3] }
0x16ab   :  { %1364 = vrot.lane.b32.xlu1 %v1348_v52, %s1711_s30 }
0x16af   :  { %1376 = vrot.lane.b32.xlu1 %v1354_v3, %s1711_s30 }
0x16b3   :  { %v1369_v32 = vpop.permute.xlu1 %1368 }
0x16b4   :  { %v1390_v33 = vsel %vm302_vm5, %v1342_v53, %v1369_v32 }
0x16b5   :  { %1399 = vst.msk [vmem:[%s2164_s4 + $0x4] sm:$0x3] %vm1396_vm6, %v1390_v33 }
0x16b7   :  { %v1373_v54 = vpop.permute.xlu1 %1372 }
0x16b8   :  { %v1392_v44 = vsel %vm302_vm5, %v1344_v38, %v1373_v54  ;;  %v1367_v49 = vpop.permute.xlu0 %1366 }
0x16b9   :  { %1401 = vst.msk [vmem:[%s2164_s4 + $0x8] sm:$0x3] %vm1396_vm6, %v1392_v44  ;;  %v1389_v55 = vsel %vm302_vm5, %v1341_v45, %v1367_v49 }
0x16ba   :  { %1398 = vst.msk [vmem:[%s2164_s4 + $0x2] sm:$0x3] %vm1396_vm6, %v1389_v55 }
0x16bc   :  { %v1371_v58 = vpop.permute.xlu0 %1370 }
0x16bd   :  { %v1391_v59 = vsel %vm302_vm5, %v1343_v56, %v1371_v58 }
0x16be   :  { %1400 = vst.msk [vmem:[%s2164_s4 + $0x6] sm:$0x3] %vm1396_vm6, %v1391_v59 }
0x16c0   :  { %v1375_v61 = vpop.permute.xlu0 %1374 }
0x16c1   :  { %v1393_v62 = vsel %vm302_vm5, %v1345_v60, %v1375_v61 }
0x16c2   :  { %1402 = vst.msk [vmem:[%s2164_s4 + $0xa] sm:$0x3] %vm1396_vm6, %v1393_v62 }
0x16c4   :  { %v1379_v0 = vpop.permute.xlu0 %1378 }
0x16c5   :  { %v1395_v1 = vsel %vm302_vm5, %v1347_v63, %v1379_v0 }
0x16c6   :  { %1404 = vst.msk [vmem:[%s2164_s4 + $0xe] sm:$0x3] %vm1396_vm6, %v1395_v1 }
0x171d   :  { %v1365_v2 = vpop.permute.xlu1 %1364 }
0x171e   :  { %v1388_v5 = vsel %vm302_vm5, %v1340_v4, %v1365_v2 }
0x171f   :  { %1397 = vst.msk [vmem:[%s2164_s4] sm:$0x3] %vm1396_vm6, %v1388_v5 }
0x1721   :  { %v1377_v7 = vpop.permute.xlu1 %1376 }
0x1722   :  { %v1394_v8 = vsel %vm302_vm5, %v1346_v6, %v1377_v7 }
0x1723   :  { %1403 = vst.msk [vmem:[%s2164_s4 + $0xc] sm:$0x3] %vm1396_vm6, %v1394_v8 }

</bundles_post_ra>
